<compile_context>
chip_gen: v7x
topology: tpu7x:2x2x1
jax: 0.10.0
libtpu: 0.0.40
codegen_flags: <defaults>
</compile_context>

<pallas_src>
import jax
import jax.numpy as jnp
from jax import lax
from jax.experimental import pallas as pl
from jax.experimental.pallas import tpu as pltpu


# ---------------------------------------------------------------------------
# Fused kernel: whole Two_D_Branch for one (batch, channel-block) tile.
# ---------------------------------------------------------------------------
def _fused_branch_kernel(x_ref, w1_ref, b1_ref, w2_ref, b2_ref, w3_ref, b3_ref,
                         o_ref, xpad_ref, ypad_ref):
    cblk, hp, wp = xpad_ref.shape
    h, w = hp - 2, wp - 2

    # ---- in-kernel zero halo (pad=1) for the original input ----------------
    xpad_ref[...] = jnp.zeros_like(xpad_ref)
    xpad_ref[:, 1:h + 1, 1:w + 1] = x_ref[...].astype(jnp.float32)

    def dw3x3(src_ref, w_ref, b_ref, dil):
        """Depthwise 3x3 conv (dilation `dil`) over a zero-padded scratch,
        with BN already folded into (w, b), followed by ReLU. Full (h, w) res."""
        acc = jnp.zeros((cblk, h, w), jnp.float32)
        for dy in range(3):
            for dx in range(3):
                patch = src_ref[:, dy * dil:dy * dil + h, dx * dil:dx * dil + w]
                acc = acc + patch * w_ref[:, dy:dy + 1, dx:dx + 1]
        return jnp.maximum(acc + b_ref[...], 0.0)

    # ---- conv1 (stride 2) computed as its stride-1 map ---------------------
    # (even rows/cols of y1 are exactly the stride-2 conv1 outputs)
    y1 = dw3x3(xpad_ref, w1_ref, b1_ref, dil=1)

    # ---- conv2 on the stride-2 subsample of y1, then nearest 2x upsample ---
    # Equivalent full-res form: dilation-2 depthwise conv on y1 (zero pad 2),
    # followed by floor-to-even index replication of the result.
    ypad_ref[...] = jnp.zeros_like(ypad_ref)
    ypad_ref[:, 2:h + 2, 2:w + 2] = y1
    v2 = dw3x3(ypad_ref, w2_ref, b2_ref, dil=2)

    row_even = (lax.broadcasted_iota(jnp.int32, (h, w), 0) % 2) == 0
    col_even = (lax.broadcasted_iota(jnp.int32, (h, w), 1) % 2) == 0

    # floor-to-even replication (the nearest-neighbour upsample), realised with
    # shifted reads from the zero-bordered scratch pad (no strided access).
    ypad_ref[:, 2:h + 2, 2:w + 2] = v2
    v2 = jnp.where(row_even, v2, ypad_ref[:, 1:h + 1, 2:w + 2])
    ypad_ref[:, 2:h + 2, 2:w + 2] = v2
    v2 = jnp.where(col_even, v2, ypad_ref[:, 2:h + 2, 1:w + 1])

    # ---- conv3 on the original input + residual add ------------------------
    y3 = dw3x3(xpad_ref, w3_ref, b3_ref, dil=1)
    o_ref[...] = (v2 + y3).astype(o_ref.dtype)


# ---------------------------------------------------------------------------
# Wrapper / parameter handling
# ---------------------------------------------------------------------------
def _fold_bn(p, eps=1e-5):
    """Fold inference BatchNorm into the depthwise conv: BN(conv_w(x)+b)
    == conv_{scale*w}(x) + (beta + scale*(b - mean))."""
    scale = p["gamma"] / jnp.sqrt(p["var"] + eps)
    w_eff = (p["w"] * scale[:, None, None]).astype(jnp.float32)
    b_eff = (p["beta"] + scale * (p["b"] - p["mean"])).reshape(-1, 1, 1)
    return w_eff, b_eff.astype(jnp.float32)


def _pick_channel_block(c, h, w, budget_bytes=2 * 1024 * 1024):
    """Largest divisor of C whose (CBLK, H, W) f32 tile stays under the budget."""
    cap = max(1, budget_bytes // max(1, h * w * 4))
    best = 1
    for d in range(1, c + 1):
        if c % d == 0 and d <= cap:
            best = d
    return best


def two_d_branch_forward(x, params):
    """x: (N, C, H, W) float32 -> (N, C, H, W) float32 (NCHW in and out)."""
    n, c, h, w = x.shape
    w1, b1 = _fold_bn(params["conv1"])
    w2, b2 = _fold_bn(params["conv2"])
    w3, b3 = _fold_bn(params["conv3"])

    cblk = _pick_channel_block(c, h, w)
    grid = (n, c // cblk)

    img_spec = pl.BlockSpec((None, cblk, h, w), lambda b, cb: (b, cb, 0, 0))
    wt_spec = pl.BlockSpec((cblk, 3, 3), lambda b, cb: (cb, 0, 0))
    bs_spec = pl.BlockSpec((cblk, 1, 1), lambda b, cb: (cb, 0, 0))

    return pl.pallas_call(
        _fused_branch_kernel,
        out_shape=jax.ShapeDtypeStruct((n, c, h, w), x.dtype),
        grid_spec=pltpu.PrefetchScalarGridSpec(
            num_scalar_prefetch=0,
            grid=grid,
            in_specs=[img_spec, wt_spec, bs_spec, wt_spec, bs_spec,
                      wt_spec, bs_spec],
            out_specs=img_spec,
            scratch_shapes=[
                pltpu.VMEM((cblk, h + 2, w + 2), jnp.float32),
                pltpu.VMEM((cblk, h + 4, w + 4), jnp.float32),
            ],
        ),
        compiler_params=pltpu.CompilerParams(
            dimension_semantics=("parallel", "parallel")),
    )(x, w1, b1, w2, b2, w3, b3)


def init_params(key, channels):
    def one_block(k):
        kw, kb, kg, kbt, km, kv = jax.random.split(k, 6)
        return dict(
            w=jax.random.normal(kw, (channels, 3, 3), jnp.float32) * 0.2,
            b=jax.random.normal(kb, (channels,), jnp.float32) * 0.1,
            gamma=1.0 + 0.1 * jax.random.normal(kg, (channels,), jnp.float32),
            beta=0.1 * jax.random.normal(kbt, (channels,), jnp.float32),
            mean=0.1 * jax.random.normal(km, (channels,), jnp.float32),
            var=0.5 + jax.random.uniform(kv, (channels,), jnp.float32),
        )

    k1, k2, k3 = jax.random.split(key, 3)
    return dict(conv1=one_block(k1), conv2=one_block(k2), conv3=one_block(k3))


# ---------------------------------------------------------------------------
# Pure-JAX reference (mirrors the PyTorch module) for a correctness self-check.
# ---------------------------------------------------------------------------
def _dw_conv_ref(x, w, b, stride):
    n, c, h, ww = x.shape
    xp = jnp.pad(x, ((0, 0), (0, 0), (1, 1), (1, 1)))
    hout = (h + 2 - 3) // stride + 1
    wout = (ww + 2 - 3) // stride + 1
    acc = jnp.zeros((n, c, hout, wout), jnp.float32)
    for dy in range(3):
        for dx in range(3):
            patch = xp[:, :, dy:dy + stride * (hout - 1) + 1:stride,
                       dx:dx + stride * (wout - 1) + 1:stride]
            acc = acc + patch * w[None, :, dy, dx, None, None]
    return acc + b[None, :, None, None]


def _bn_relu_ref(y, p, eps=1e-5):
    scale = p["gamma"] / jnp.sqrt(p["var"] + eps)
    y = (y - p["mean"][None, :, None, None]) * scale[None, :, None, None] \
        + p["beta"][None, :, None, None]
    return jnp.maximum(y, 0.0)


def two_d_branch_reference(x, params):
    n, c, h, w = x.shape
    p1, p2, p3 = params["conv1"], params["conv2"], params["conv3"]
    c1 = _bn_relu_ref(_dw_conv_ref(x, p1["w"], p1["b"], 2), p1)
    c2 = _bn_relu_ref(_dw_conv_ref(c1, p2["w"], p2["b"], 1), p2)
    h2, w2 = c2.shape[2], c2.shape[3]
    src_h = (jnp.arange(h) * h2) // h     # PyTorch nearest: floor(dst*in/out)
    src_w = (jnp.arange(w) * w2) // w
    up = c2[:, :, src_h, :][:, :, :, src_w]
    c3 = _bn_relu_ref(_dw_conv_ref(x, p3["w"], p3["b"], 1), p3)
    return up + c3


if __name__ == "__main__":
    N, C, H, W = 2, 4, 16, 16
    key = jax.random.PRNGKey(0)
    kx, kp = jax.random.split(key)
    x = jax.random.normal(kx, (N, C, H, W), jnp.float32)
    params = init_params(kp, C)

    out = jax.block_until_ready(two_d_branch_forward(x, params))
    assert out.shape == (N, C, H, W), out.shape
    assert bool(jnp.all(jnp.isfinite(out)))

    ref = jax.block_until_ready(two_d_branch_reference(x, params))
    err = float(jnp.max(jnp.abs(out - ref)))
    assert err < 1e-3, f"mismatch vs reference: max abs err = {err}"

    print("KERNEL_OK")
</pallas_src>

<mosaic_0001>
module attributes {stable_mosaic.version = 11 : i64} {
  func.func @_fused_branch_kernel(%arg0: i32, %arg1: i32, %arg2: memref<1x4x16x16xf32, #tpu.memory_space<vmem>>, %arg3: memref<4x3x3xf32, #tpu.memory_space<vmem>>, %arg4: memref<4x1x1xf32, #tpu.memory_space<vmem>>, %arg5: memref<4x3x3xf32, #tpu.memory_space<vmem>>, %arg6: memref<4x1x1xf32, #tpu.memory_space<vmem>>, %arg7: memref<4x3x3xf32, #tpu.memory_space<vmem>>, %arg8: memref<4x1x1xf32, #tpu.memory_space<vmem>>, %arg9: memref<1x4x16x16xf32, #tpu.memory_space<vmem>>, %arg10: memref<4x18x18xf32, #tpu.memory_space<vmem>>, %arg11: memref<4x20x20xf32, #tpu.memory_space<vmem>>) attributes {dimension_semantics = [#tpu.dimension_semantics<parallel>, #tpu.dimension_semantics<parallel>], iteration_bounds = array<i64: 2, 1>, scalar_prefetch = 0 : i64, scratch_operands = 2 : i64, tpu.core_type = #tpu.core_type<tc>, window_params = [{transform_indices = @transform_0, window_bounds = array<i64: 1, 4, 16, 16>}, {transform_indices = @transform_1, window_bounds = array<i64: 4, 3, 3>}, {transform_indices = @transform_2, window_bounds = array<i64: 4, 1, 1>}, {transform_indices = @transform_3, window_bounds = array<i64: 4, 3, 3>}, {transform_indices = @transform_4, window_bounds = array<i64: 4, 1, 1>}, {transform_indices = @transform_5, window_bounds = array<i64: 4, 3, 3>}, {transform_indices = @transform_6, window_bounds = array<i64: 4, 1, 1>}, {transform_indices = @transform_7, window_bounds = array<i64: 1, 4, 16, 16>}]} {
    %cst = arith.constant 0.000000e+00 : f32
    %0 = vector.broadcast %cst : f32 to vector<4x18x18xf32>
    %c0 = arith.constant 0 : index
    %c0_0 = arith.constant 0 : index
    %c0_1 = arith.constant 0 : index
    %1 = vector.load %arg10[%c0, %c0_0, %c0_1] : memref<4x18x18xf32, #tpu.memory_space<vmem>>, vector<4x18x18xf32>
    tpu.vector_store %arg10[%c0, %c0_0, %c0_1], %0 {strides = array<i32>} : memref<4x18x18xf32, #tpu.memory_space<vmem>>, vector<4x18x18xf32>,
    %c0_2 = arith.constant 0 : index
    %c0_3 = arith.constant 0 : index
    %c0_4 = arith.constant 0 : index
    %c0_5 = arith.constant 0 : index
    %2 = vector.load %arg2[%c0_2, %c0_3, %c0_4, %c0_5] : memref<1x4x16x16xf32, #tpu.memory_space<vmem>>, vector<1x4x16x16xf32>
    %3 = vector.shape_cast %2 : vector<1x4x16x16xf32> to vector<4x16x16xf32>
    %c0_6 = arith.constant 0 : index
    %c1 = arith.constant 1 : index
    %c1_7 = arith.constant 1 : index
    %4 = vector.load %arg10[%c0_6, %c1, %c1_7] : memref<4x18x18xf32, #tpu.memory_space<vmem>>, vector<4x16x16xf32>
    tpu.vector_store %arg10[%c0_6, %c1, %c1_7], %3 {strides = array<i32>} : memref<4x18x18xf32, #tpu.memory_space<vmem>>, vector<4x16x16xf32>,
    %cst_8 = arith.constant 0.000000e+00 : f32
    %5 = vector.broadcast %cst_8 : f32 to vector<4x16x16xf32>
    %c0_9 = arith.constant 0 : index
    %c0_10 = arith.constant 0 : index
    %c0_11 = arith.constant 0 : index
    %6 = vector.load %arg10[%c0_9, %c0_10, %c0_11] : memref<4x18x18xf32, #tpu.memory_space<vmem>>, vector<4x16x16xf32>
    %c0_12 = arith.constant 0 : index
    %c0_13 = arith.constant 0 : index
    %c0_14 = arith.constant 0 : index
    %7 = vector.load %arg3[%c0_12, %c0_13, %c0_14] : memref<4x3x3xf32, #tpu.memory_space<vmem>>, vector<4x1x1xf32>
    %8 = vector.broadcast %7 : vector<4x1x1xf32> to vector<4x16x16xf32>
    %9 = arith.mulf %6, %8 : vector<4x16x16xf32>
    %10 = arith.addf %5, %9 : vector<4x16x16xf32>
    %c0_15 = arith.constant 0 : index
    %c0_16 = arith.constant 0 : index
    %c1_17 = arith.constant 1 : index
    %11 = vector.load %arg10[%c0_15, %c0_16, %c1_17] : memref<4x18x18xf32, #tpu.memory_space<vmem>>, vector<4x16x16xf32>
    %c0_18 = arith.constant 0 : index
    %c0_19 = arith.constant 0 : index
    %c1_20 = arith.constant 1 : index
    %12 = vector.load %arg3[%c0_18, %c0_19, %c1_20] : memref<4x3x3xf32, #tpu.memory_space<vmem>>, vector<4x1x1xf32>
    %13 = vector.broadcast %12 : vector<4x1x1xf32> to vector<4x16x16xf32>
    %14 = arith.mulf %11, %13 : vector<4x16x16xf32>
    %15 = arith.addf %10, %14 : vector<4x16x16xf32>
    %c0_21 = arith.constant 0 : index
    %c0_22 = arith.constant 0 : index
    %c2 = arith.constant 2 : index
    %16 = vector.load %arg10[%c0_21, %c0_22, %c2] : memref<4x18x18xf32, #tpu.memory_space<vmem>>, vector<4x16x16xf32>
    %c0_23 = arith.constant 0 : index
    %c0_24 = arith.constant 0 : index
    %c2_25 = arith.constant 2 : index
    %17 = vector.load %arg3[%c0_23, %c0_24, %c2_25] : memref<4x3x3xf32, #tpu.memory_space<vmem>>, vector<4x1x1xf32>
    %18 = vector.broadcast %17 : vector<4x1x1xf32> to vector<4x16x16xf32>
    %19 = arith.mulf %16, %18 : vector<4x16x16xf32>
    %20 = arith.addf %15, %19 : vector<4x16x16xf32>
    %c0_26 = arith.constant 0 : index
    %c1_27 = arith.constant 1 : index
    %c0_28 = arith.constant 0 : index
    %21 = vector.load %arg10[%c0_26, %c1_27, %c0_28] : memref<4x18x18xf32, #tpu.memory_space<vmem>>, vector<4x16x16xf32>
    %c0_29 = arith.constant 0 : index
    %c1_30 = arith.constant 1 : index
    %c0_31 = arith.constant 0 : index
    %22 = vector.load %arg3[%c0_29, %c1_30, %c0_31] : memref<4x3x3xf32, #tpu.memory_space<vmem>>, vector<4x1x1xf32>
    %23 = vector.broadcast %22 : vector<4x1x1xf32> to vector<4x16x16xf32>
    %24 = arith.mulf %21, %23 : vector<4x16x16xf32>
    %25 = arith.addf %20, %24 : vector<4x16x16xf32>
    %c0_32 = arith.constant 0 : index
    %c1_33 = arith.constant 1 : index
    %c1_34 = arith.constant 1 : index
    %26 = vector.load %arg10[%c0_32, %c1_33, %c1_34] : memref<4x18x18xf32, #tpu.memory_space<vmem>>, vector<4x16x16xf32>
    %c0_35 = arith.constant 0 : index
    %c1_36 = arith.constant 1 : index
    %c1_37 = arith.constant 1 : index
    %27 = vector.load %arg3[%c0_35, %c1_36, %c1_37] : memref<4x3x3xf32, #tpu.memory_space<vmem>>, vector<4x1x1xf32>
    %28 = vector.broadcast %27 : vector<4x1x1xf32> to vector<4x16x16xf32>
    %29 = arith.mulf %26, %28 : vector<4x16x16xf32>
    %30 = arith.addf %25, %29 : vector<4x16x16xf32>
    %c0_38 = arith.constant 0 : index
    %c1_39 = arith.constant 1 : index
    %c2_40 = arith.constant 2 : index
    %31 = vector.load %arg10[%c0_38, %c1_39, %c2_40] : memref<4x18x18xf32, #tpu.memory_space<vmem>>, vector<4x16x16xf32>
    %c0_41 = arith.constant 0 : index
    %c1_42 = arith.constant 1 : index
    %c2_43 = arith.constant 2 : index
    %32 = vector.load %arg3[%c0_41, %c1_42, %c2_43] : memref<4x3x3xf32, #tpu.memory_space<vmem>>, vector<4x1x1xf32>
    %33 = vector.broadcast %32 : vector<4x1x1xf32> to vector<4x16x16xf32>
    %34 = arith.mulf %31, %33 : vector<4x16x16xf32>
    %35 = arith.addf %30, %34 : vector<4x16x16xf32>
    %c0_44 = arith.constant 0 : index
    %c2_45 = arith.constant 2 : index
    %c0_46 = arith.constant 0 : index
    %36 = vector.load %arg10[%c0_44, %c2_45, %c0_46] : memref<4x18x18xf32, #tpu.memory_space<vmem>>, vector<4x16x16xf32>
    %c0_47 = arith.constant 0 : index
    %c2_48 = arith.constant 2 : index
    %c0_49 = arith.constant 0 : index
    %37 = vector.load %arg3[%c0_47, %c2_48, %c0_49] : memref<4x3x3xf32, #tpu.memory_space<vmem>>, vector<4x1x1xf32>
    %38 = vector.broadcast %37 : vector<4x1x1xf32> to vector<4x16x16xf32>
    %39 = arith.mulf %36, %38 : vector<4x16x16xf32>
    %40 = arith.addf %35, %39 : vector<4x16x16xf32>
    %c0_50 = arith.constant 0 : index
    %c2_51 = arith.constant 2 : index
    %c1_52 = arith.constant 1 : index
    %41 = vector.load %arg10[%c0_50, %c2_51, %c1_52] : memref<4x18x18xf32, #tpu.memory_space<vmem>>, vector<4x16x16xf32>
    %c0_53 = arith.constant 0 : index
    %c2_54 = arith.constant 2 : index
    %c1_55 = arith.constant 1 : index
    %42 = vector.load %arg3[%c0_53, %c2_54, %c1_55] : memref<4x3x3xf32, #tpu.memory_space<vmem>>, vector<4x1x1xf32>
    %43 = vector.broadcast %42 : vector<4x1x1xf32> to vector<4x16x16xf32>
    %44 = arith.mulf %41, %43 : vector<4x16x16xf32>
    %45 = arith.addf %40, %44 : vector<4x16x16xf32>
    %c0_56 = arith.constant 0 : index
    %c2_57 = arith.constant 2 : index
    %c2_58 = arith.constant 2 : index
    %46 = vector.load %arg10[%c0_56, %c2_57, %c2_58] : memref<4x18x18xf32, #tpu.memory_space<vmem>>, vector<4x16x16xf32>
    %c0_59 = arith.constant 0 : index
    %c2_60 = arith.constant 2 : index
    %c2_61 = arith.constant 2 : index
    %47 = vector.load %arg3[%c0_59, %c2_60, %c2_61] : memref<4x3x3xf32, #tpu.memory_space<vmem>>, vector<4x1x1xf32>
    %48 = vector.broadcast %47 : vector<4x1x1xf32> to vector<4x16x16xf32>
    %49 = arith.mulf %46, %48 : vector<4x16x16xf32>
    %50 = arith.addf %45, %49 : vector<4x16x16xf32>
    %c0_62 = arith.constant 0 : index
    %c0_63 = arith.constant 0 : index
    %c0_64 = arith.constant 0 : index
    %51 = vector.load %arg4[%c0_62, %c0_63, %c0_64] : memref<4x1x1xf32, #tpu.memory_space<vmem>>, vector<4x1x1xf32>
    %52 = vector.broadcast %51 : vector<4x1x1xf32> to vector<4x16x16xf32>
    %53 = arith.addf %50, %52 : vector<4x16x16xf32>
    %cst_65 = arith.constant 0.000000e+00 : f32
    %54 = vector.broadcast %cst_65 : f32 to vector<4x16x16xf32>
    %55 = arith.maximumf %53, %54 : vector<4x16x16xf32>
    %cst_66 = arith.constant 0.000000e+00 : f32
    %56 = vector.broadcast %cst_66 : f32 to vector<4x20x20xf32>
    %c0_67 = arith.constant 0 : index
    %c0_68 = arith.constant 0 : index
    %c0_69 = arith.constant 0 : index
    %57 = vector.load %arg11[%c0_67, %c0_68, %c0_69] : memref<4x20x20xf32, #tpu.memory_space<vmem>>, vector<4x20x20xf32>
    tpu.vector_store %arg11[%c0_67, %c0_68, %c0_69], %56 {strides = array<i32>} : memref<4x20x20xf32, #tpu.memory_space<vmem>>, vector<4x20x20xf32>,
    %c0_70 = arith.constant 0 : index
    %c2_71 = arith.constant 2 : index
    %c2_72 = arith.constant 2 : index
    %58 = vector.load %arg11[%c0_70, %c2_71, %c2_72] : memref<4x20x20xf32, #tpu.memory_space<vmem>>, vector<4x16x16xf32>
    tpu.vector_store %arg11[%c0_70, %c2_71, %c2_72], %55 {strides = array<i32>} : memref<4x20x20xf32, #tpu.memory_space<vmem>>, vector<4x16x16xf32>,
    %cst_73 = arith.constant 0.000000e+00 : f32
    %59 = vector.broadcast %cst_73 : f32 to vector<4x16x16xf32>
    %c0_74 = arith.constant 0 : index
    %c0_75 = arith.constant 0 : index
    %c0_76 = arith.constant 0 : index
    %60 = vector.load %arg11[%c0_74, %c0_75, %c0_76] : memref<4x20x20xf32, #tpu.memory_space<vmem>>, vector<4x16x16xf32>
    %c0_77 = arith.constant 0 : index
    %c0_78 = arith.constant 0 : index
    %c0_79 = arith.constant 0 : index
    %61 = vector.load %arg5[%c0_77, %c0_78, %c0_79] : memref<4x3x3xf32, #tpu.memory_space<vmem>>, vector<4x1x1xf32>
    %62 = vector.broadcast %61 : vector<4x1x1xf32> to vector<4x16x16xf32>
    %63 = arith.mulf %60, %62 : vector<4x16x16xf32>
    %64 = arith.addf %59, %63 : vector<4x16x16xf32>
    %c0_80 = arith.constant 0 : index
    %c0_81 = arith.constant 0 : index
    %c2_82 = arith.constant 2 : index
    %65 = vector.load %arg11[%c0_80, %c0_81, %c2_82] : memref<4x20x20xf32, #tpu.memory_space<vmem>>, vector<4x16x16xf32>
    %c0_83 = arith.constant 0 : index
    %c0_84 = arith.constant 0 : index
    %c1_85 = arith.constant 1 : index
    %66 = vector.load %arg5[%c0_83, %c0_84, %c1_85] : memref<4x3x3xf32, #tpu.memory_space<vmem>>, vector<4x1x1xf32>
    %67 = vector.broadcast %66 : vector<4x1x1xf32> to vector<4x16x16xf32>
    %68 = arith.mulf %65, %67 : vector<4x16x16xf32>
    %69 = arith.addf %64, %68 : vector<4x16x16xf32>
    %c0_86 = arith.constant 0 : index
    %c0_87 = arith.constant 0 : index
    %c4 = arith.constant 4 : index
    %70 = vector.load %arg11[%c0_86, %c0_87, %c4] : memref<4x20x20xf32, #tpu.memory_space<vmem>>, vector<4x16x16xf32>
    %c0_88 = arith.constant 0 : index
    %c0_89 = arith.constant 0 : index
    %c2_90 = arith.constant 2 : index
    %71 = vector.load %arg5[%c0_88, %c0_89, %c2_90] : memref<4x3x3xf32, #tpu.memory_space<vmem>>, vector<4x1x1xf32>
    %72 = vector.broadcast %71 : vector<4x1x1xf32> to vector<4x16x16xf32>
    %73 = arith.mulf %70, %72 : vector<4x16x16xf32>
    %74 = arith.addf %69, %73 : vector<4x16x16xf32>
    %c0_91 = arith.constant 0 : index
    %c2_92 = arith.constant 2 : index
    %c0_93 = arith.constant 0 : index
    %75 = vector.load %arg11[%c0_91, %c2_92, %c0_93] : memref<4x20x20xf32, #tpu.memory_space<vmem>>, vector<4x16x16xf32>
    %c0_94 = arith.constant 0 : index
    %c1_95 = arith.constant 1 : index
    %c0_96 = arith.constant 0 : index
    %76 = vector.load %arg5[%c0_94, %c1_95, %c0_96] : memref<4x3x3xf32, #tpu.memory_space<vmem>>, vector<4x1x1xf32>
    %77 = vector.broadcast %76 : vector<4x1x1xf32> to vector<4x16x16xf32>
    %78 = arith.mulf %75, %77 : vector<4x16x16xf32>
    %79 = arith.addf %74, %78 : vector<4x16x16xf32>
    %c0_97 = arith.constant 0 : index
    %c2_98 = arith.constant 2 : index
    %c2_99 = arith.constant 2 : index
    %80 = vector.load %arg11[%c0_97, %c2_98, %c2_99] : memref<4x20x20xf32, #tpu.memory_space<vmem>>, vector<4x16x16xf32>
    %c0_100 = arith.constant 0 : index
    %c1_101 = arith.constant 1 : index
    %c1_102 = arith.constant 1 : index
    %81 = vector.load %arg5[%c0_100, %c1_101, %c1_102] : memref<4x3x3xf32, #tpu.memory_space<vmem>>, vector<4x1x1xf32>
    %82 = vector.broadcast %81 : vector<4x1x1xf32> to vector<4x16x16xf32>
    %83 = arith.mulf %80, %82 : vector<4x16x16xf32>
    %84 = arith.addf %79, %83 : vector<4x16x16xf32>
    %c0_103 = arith.constant 0 : index
    %c2_104 = arith.constant 2 : index
    %c4_105 = arith.constant 4 : index
    %85 = vector.load %arg11[%c0_103, %c2_104, %c4_105] : memref<4x20x20xf32, #tpu.memory_space<vmem>>, vector<4x16x16xf32>
    %c0_106 = arith.constant 0 : index
    %c1_107 = arith.constant 1 : index
    %c2_108 = arith.constant 2 : index
    %86 = vector.load %arg5[%c0_106, %c1_107, %c2_108] : memref<4x3x3xf32, #tpu.memory_space<vmem>>, vector<4x1x1xf32>
    %87 = vector.broadcast %86 : vector<4x1x1xf32> to vector<4x16x16xf32>
    %88 = arith.mulf %85, %87 : vector<4x16x16xf32>
    %89 = arith.addf %84, %88 : vector<4x16x16xf32>
    %c0_109 = arith.constant 0 : index
    %c4_110 = arith.constant 4 : index
    %c0_111 = arith.constant 0 : index
    %90 = vector.load %arg11[%c0_109, %c4_110, %c0_111] : memref<4x20x20xf32, #tpu.memory_space<vmem>>, vector<4x16x16xf32>
    %c0_112 = arith.constant 0 : index
    %c2_113 = arith.constant 2 : index
    %c0_114 = arith.constant 0 : index
    %91 = vector.load %arg5[%c0_112, %c2_113, %c0_114] : memref<4x3x3xf32, #tpu.memory_space<vmem>>, vector<4x1x1xf32>
    %92 = vector.broadcast %91 : vector<4x1x1xf32> to vector<4x16x16xf32>
    %93 = arith.mulf %90, %92 : vector<4x16x16xf32>
    %94 = arith.addf %89, %93 : vector<4x16x16xf32>
    %c0_115 = arith.constant 0 : index
    %c4_116 = arith.constant 4 : index
    %c2_117 = arith.constant 2 : index
    %95 = vector.load %arg11[%c0_115, %c4_116, %c2_117] : memref<4x20x20xf32, #tpu.memory_space<vmem>>, vector<4x16x16xf32>
    %c0_118 = arith.constant 0 : index
    %c2_119 = arith.constant 2 : index
    %c1_120 = arith.constant 1 : index
    %96 = vector.load %arg5[%c0_118, %c2_119, %c1_120] : memref<4x3x3xf32, #tpu.memory_space<vmem>>, vector<4x1x1xf32>
    %97 = vector.broadcast %96 : vector<4x1x1xf32> to vector<4x16x16xf32>
    %98 = arith.mulf %95, %97 : vector<4x16x16xf32>
    %99 = arith.addf %94, %98 : vector<4x16x16xf32>
    %c0_121 = arith.constant 0 : index
    %c4_122 = arith.constant 4 : index
    %c4_123 = arith.constant 4 : index
    %100 = vector.load %arg11[%c0_121, %c4_122, %c4_123] : memref<4x20x20xf32, #tpu.memory_space<vmem>>, vector<4x16x16xf32>
    %c0_124 = arith.constant 0 : index
    %c2_125 = arith.constant 2 : index
    %c2_126 = arith.constant 2 : index
    %101 = vector.load %arg5[%c0_124, %c2_125, %c2_126] : memref<4x3x3xf32, #tpu.memory_space<vmem>>, vector<4x1x1xf32>
    %102 = vector.broadcast %101 : vector<4x1x1xf32> to vector<4x16x16xf32>
    %103 = arith.mulf %100, %102 : vector<4x16x16xf32>
    %104 = arith.addf %99, %103 : vector<4x16x16xf32>
    %c0_127 = arith.constant 0 : index
    %c0_128 = arith.constant 0 : index
    %c0_129 = arith.constant 0 : index
    %105 = vector.load %arg6[%c0_127, %c0_128, %c0_129] : memref<4x1x1xf32, #tpu.memory_space<vmem>>, vector<4x1x1xf32>
    %106 = vector.broadcast %105 : vector<4x1x1xf32> to vector<4x16x16xf32>
    %107 = arith.addf %104, %106 : vector<4x16x16xf32>
    %cst_130 = arith.constant 0.000000e+00 : f32
    %108 = vector.broadcast %cst_130 : f32 to vector<4x16x16xf32>
    %109 = arith.maximumf %107, %108 : vector<4x16x16xf32>
    %110 = tpu.iota {dimensions = array<i32: 0>} : vector<16x16xi32>
    %c2_i32 = arith.constant 2 : i32
    %c0_i32 = arith.constant 0 : i32
    %111 = arith.cmpi eq, %c2_i32, %c0_i32 : i32
    %c1_i32 = arith.constant 1 : i32
    %112 = arith.select %111, %c1_i32, %c2_i32 : i32
    %113 = vector.broadcast %112 : i32 to vector<16x16xi32>
    %114 = arith.remsi %110, %113 : vector<16x16xi32>
    %c0_i32_131 = arith.constant 0 : i32
    %115 = vector.broadcast %c0_i32_131 : i32 to vector<16x16xi32>
    %116 = arith.cmpi ne, %114, %115 : vector<16x16xi32>
    %c0_i32_132 = arith.constant 0 : i32
    %117 = vector.broadcast %c0_i32_132 : i32 to vector<16x16xi32>
    %118 = arith.cmpi slt, %114, %117 : vector<16x16xi32>
    %c0_i32_133 = arith.constant 0 : i32
    %119 = arith.cmpi slt, %112, %c0_i32_133 : i32
    %120 = vector.broadcast %119 : i1 to vector<16x16xi1>
    %121 = vector.broadcast %120 : vector<16x16xi1> to vector<16x16xi1>
    %122 = arith.xori %118, %121 : vector<16x16xi1>
    %123 = arith.andi %122, %116 : vector<16x16xi1>
    %124 = vector.broadcast %112 : i32 to vector<16x16xi32>
    %125 = arith.addi %114, %124 : vector<16x16xi32>
    %126 = arith.select %123, %125, %114 : vector<16x16xi1>, vector<16x16xi32>
    %c0_i32_134 = arith.constant 0 : i32
    %127 = vector.broadcast %c0_i32_134 : i32 to vector<16x16xi32>
    %128 = arith.cmpi eq, %126, %127 : vector<16x16xi32>
    %129 = tpu.iota {dimensions = array<i32: 1>} : vector<16x16xi32>
    %c2_i32_135 = arith.constant 2 : i32
    %c0_i32_136 = arith.constant 0 : i32
    %130 = arith.cmpi eq, %c2_i32_135, %c0_i32_136 : i32
    %c1_i32_137 = arith.constant 1 : i32
    %131 = arith.select %130, %c1_i32_137, %c2_i32_135 : i32
    %132 = vector.broadcast %131 : i32 to vector<16x16xi32>
    %133 = arith.remsi %129, %132 : vector<16x16xi32>
    %c0_i32_138 = arith.constant 0 : i32
    %134 = vector.broadcast %c0_i32_138 : i32 to vector<16x16xi32>
    %135 = arith.cmpi ne, %133, %134 : vector<16x16xi32>
    %c0_i32_139 = arith.constant 0 : i32
    %136 = vector.broadcast %c0_i32_139 : i32 to vector<16x16xi32>
    %137 = arith.cmpi slt, %133, %136 : vector<16x16xi32>
    %c0_i32_140 = arith.constant 0 : i32
    %138 = arith.cmpi slt, %131, %c0_i32_140 : i32
    %139 = vector.broadcast %138 : i1 to vector<16x16xi1>
    %140 = vector.broadcast %139 : vector<16x16xi1> to vector<16x16xi1>
    %141 = arith.xori %137, %140 : vector<16x16xi1>
    %142 = arith.andi %141, %135 : vector<16x16xi1>
    %143 = vector.broadcast %131 : i32 to vector<16x16xi32>
    %144 = arith.addi %133, %143 : vector<16x16xi32>
    %145 = arith.select %142, %144, %133 : vector<16x16xi1>, vector<16x16xi32>
    %c0_i32_141 = arith.constant 0 : i32
    %146 = vector.broadcast %c0_i32_141 : i32 to vector<16x16xi32>
    %147 = arith.cmpi eq, %145, %146 : vector<16x16xi32>
    %c0_142 = arith.constant 0 : index
    %c2_143 = arith.constant 2 : index
    %c2_144 = arith.constant 2 : index
    %148 = vector.load %arg11[%c0_142, %c2_143, %c2_144] : memref<4x20x20xf32, #tpu.memory_space<vmem>>, vector<4x16x16xf32>
    tpu.vector_store %arg11[%c0_142, %c2_143, %c2_144], %109 {strides = array<i32>} : memref<4x20x20xf32, #tpu.memory_space<vmem>>, vector<4x16x16xf32>,
    %c0_145 = arith.constant 0 : index
    %c1_146 = arith.constant 1 : index
    %c2_147 = arith.constant 2 : index
    %149 = vector.load %arg11[%c0_145, %c1_146, %c2_147] : memref<4x20x20xf32, #tpu.memory_space<vmem>>, vector<4x16x16xf32>
    %150 = vector.shape_cast %128 : vector<16x16xi1> to vector<1x16x16xi1>
    %151 = vector.broadcast %150 : vector<1x16x16xi1> to vector<4x16x16xi1>
    %152 = arith.select %151, %109, %149 : vector<4x16x16xi1>, vector<4x16x16xf32>
    %c0_148 = arith.constant 0 : index
    %c2_149 = arith.constant 2 : index
    %c2_150 = arith.constant 2 : index
    %153 = vector.load %arg11[%c0_148, %c2_149, %c2_150] : memref<4x20x20xf32, #tpu.memory_space<vmem>>, vector<4x16x16xf32>
    tpu.vector_store %arg11[%c0_148, %c2_149, %c2_150], %152 {strides = array<i32>} : memref<4x20x20xf32, #tpu.memory_space<vmem>>, vector<4x16x16xf32>,
    %c0_151 = arith.constant 0 : index
    %c2_152 = arith.constant 2 : index
    %c1_153 = arith.constant 1 : index
    %154 = vector.load %arg11[%c0_151, %c2_152, %c1_153] : memref<4x20x20xf32, #tpu.memory_space<vmem>>, vector<4x16x16xf32>
    %155 = vector.shape_cast %147 : vector<16x16xi1> to vector<1x16x16xi1>
    %156 = vector.broadcast %155 : vector<1x16x16xi1> to vector<4x16x16xi1>
    %157 = arith.select %156, %152, %154 : vector<4x16x16xi1>, vector<4x16x16xf32>
    %cst_154 = arith.constant 0.000000e+00 : f32
    %158 = vector.broadcast %cst_154 : f32 to vector<4x16x16xf32>
    %c0_155 = arith.constant 0 : index
    %c0_156 = arith.constant 0 : index
    %c0_157 = arith.constant 0 : index
    %159 = vector.load %arg10[%c0_155, %c0_156, %c0_157] : memref<4x18x18xf32, #tpu.memory_space<vmem>>, vector<4x16x16xf32>
    %c0_158 = arith.constant 0 : index
    %c0_159 = arith.constant 0 : index
    %c0_160 = arith.constant 0 : index
    %160 = vector.load %arg7[%c0_158, %c0_159, %c0_160] : memref<4x3x3xf32, #tpu.memory_space<vmem>>, vector<4x1x1xf32>
    %161 = vector.broadcast %160 : vector<4x1x1xf32> to vector<4x16x16xf32>
    %162 = arith.mulf %159, %161 : vector<4x16x16xf32>
    %163 = arith.addf %158, %162 : vector<4x16x16xf32>
    %c0_161 = arith.constant 0 : index
    %c0_162 = arith.constant 0 : index
    %c1_163 = arith.constant 1 : index
    %164 = vector.load %arg10[%c0_161, %c0_162, %c1_163] : memref<4x18x18xf32, #tpu.memory_space<vmem>>, vector<4x16x16xf32>
    %c0_164 = arith.constant 0 : index
    %c0_165 = arith.constant 0 : index
    %c1_166 = arith.constant 1 : index
    %165 = vector.load %arg7[%c0_164, %c0_165, %c1_166] : memref<4x3x3xf32, #tpu.memory_space<vmem>>, vector<4x1x1xf32>
    %166 = vector.broadcast %165 : vector<4x1x1xf32> to vector<4x16x16xf32>
    %167 = arith.mulf %164, %166 : vector<4x16x16xf32>
    %168 = arith.addf %163, %167 : vector<4x16x16xf32>
    %c0_167 = arith.constant 0 : index
    %c0_168 = arith.constant 0 : index
    %c2_169 = arith.constant 2 : index
    %169 = vector.load %arg10[%c0_167, %c0_168, %c2_169] : memref<4x18x18xf32, #tpu.memory_space<vmem>>, vector<4x16x16xf32>
    %c0_170 = arith.constant 0 : index
    %c0_171 = arith.constant 0 : index
    %c2_172 = arith.constant 2 : index
    %170 = vector.load %arg7[%c0_170, %c0_171, %c2_172] : memref<4x3x3xf32, #tpu.memory_space<vmem>>, vector<4x1x1xf32>
    %171 = vector.broadcast %170 : vector<4x1x1xf32> to vector<4x16x16xf32>
    %172 = arith.mulf %169, %171 : vector<4x16x16xf32>
    %173 = arith.addf %168, %172 : vector<4x16x16xf32>
    %c0_173 = arith.constant 0 : index
    %c1_174 = arith.constant 1 : index
    %c0_175 = arith.constant 0 : index
    %174 = vector.load %arg10[%c0_173, %c1_174, %c0_175] : memref<4x18x18xf32, #tpu.memory_space<vmem>>, vector<4x16x16xf32>
    %c0_176 = arith.constant 0 : index
    %c1_177 = arith.constant 1 : index
    %c0_178 = arith.constant 0 : index
    %175 = vector.load %arg7[%c0_176, %c1_177, %c0_178] : memref<4x3x3xf32, #tpu.memory_space<vmem>>, vector<4x1x1xf32>
    %176 = vector.broadcast %175 : vector<4x1x1xf32> to vector<4x16x16xf32>
    %177 = arith.mulf %174, %176 : vector<4x16x16xf32>
    %178 = arith.addf %173, %177 : vector<4x16x16xf32>
    %c0_179 = arith.constant 0 : index
    %c1_180 = arith.constant 1 : index
    %c1_181 = arith.constant 1 : index
    %179 = vector.load %arg10[%c0_179, %c1_180, %c1_181] : memref<4x18x18xf32, #tpu.memory_space<vmem>>, vector<4x16x16xf32>
    %c0_182 = arith.constant 0 : index
    %c1_183 = arith.constant 1 : index
    %c1_184 = arith.constant 1 : index
    %180 = vector.load %arg7[%c0_182, %c1_183, %c1_184] : memref<4x3x3xf32, #tpu.memory_space<vmem>>, vector<4x1x1xf32>
    %181 = vector.broadcast %180 : vector<4x1x1xf32> to vector<4x16x16xf32>
    %182 = arith.mulf %179, %181 : vector<4x16x16xf32>
    %183 = arith.addf %178, %182 : vector<4x16x16xf32>
    %c0_185 = arith.constant 0 : index
    %c1_186 = arith.constant 1 : index
    %c2_187 = arith.constant 2 : index
    %184 = vector.load %arg10[%c0_185, %c1_186, %c2_187] : memref<4x18x18xf32, #tpu.memory_space<vmem>>, vector<4x16x16xf32>
    %c0_188 = arith.constant 0 : index
    %c1_189 = arith.constant 1 : index
    %c2_190 = arith.constant 2 : index
    %185 = vector.load %arg7[%c0_188, %c1_189, %c2_190] : memref<4x3x3xf32, #tpu.memory_space<vmem>>, vector<4x1x1xf32>
    %186 = vector.broadcast %185 : vector<4x1x1xf32> to vector<4x16x16xf32>
    %187 = arith.mulf %184, %186 : vector<4x16x16xf32>
    %188 = arith.addf %183, %187 : vector<4x16x16xf32>
    %c0_191 = arith.constant 0 : index
    %c2_192 = arith.constant 2 : index
    %c0_193 = arith.constant 0 : index
    %189 = vector.load %arg10[%c0_191, %c2_192, %c0_193] : memref<4x18x18xf32, #tpu.memory_space<vmem>>, vector<4x16x16xf32>
    %c0_194 = arith.constant 0 : index
    %c2_195 = arith.constant 2 : index
    %c0_196 = arith.constant 0 : index
    %190 = vector.load %arg7[%c0_194, %c2_195, %c0_196] : memref<4x3x3xf32, #tpu.memory_space<vmem>>, vector<4x1x1xf32>
    %191 = vector.broadcast %190 : vector<4x1x1xf32> to vector<4x16x16xf32>
    %192 = arith.mulf %189, %191 : vector<4x16x16xf32>
    %193 = arith.addf %188, %192 : vector<4x16x16xf32>
    %c0_197 = arith.constant 0 : index
    %c2_198 = arith.constant 2 : index
    %c1_199 = arith.constant 1 : index
    %194 = vector.load %arg10[%c0_197, %c2_198, %c1_199] : memref<4x18x18xf32, #tpu.memory_space<vmem>>, vector<4x16x16xf32>
    %c0_200 = arith.constant 0 : index
    %c2_201 = arith.constant 2 : index
    %c1_202 = arith.constant 1 : index
    %195 = vector.load %arg7[%c0_200, %c2_201, %c1_202] : memref<4x3x3xf32, #tpu.memory_space<vmem>>, vector<4x1x1xf32>
    %196 = vector.broadcast %195 : vector<4x1x1xf32> to vector<4x16x16xf32>
    %197 = arith.mulf %194, %196 : vector<4x16x16xf32>
    %198 = arith.addf %193, %197 : vector<4x16x16xf32>
    %c0_203 = arith.constant 0 : index
    %c2_204 = arith.constant 2 : index
    %c2_205 = arith.constant 2 : index
    %199 = vector.load %arg10[%c0_203, %c2_204, %c2_205] : memref<4x18x18xf32, #tpu.memory_space<vmem>>, vector<4x16x16xf32>
    %c0_206 = arith.constant 0 : index
    %c2_207 = arith.constant 2 : index
    %c2_208 = arith.constant 2 : index
    %200 = vector.load %arg7[%c0_206, %c2_207, %c2_208] : memref<4x3x3xf32, #tpu.memory_space<vmem>>, vector<4x1x1xf32>
    %201 = vector.broadcast %200 : vector<4x1x1xf32> to vector<4x16x16xf32>
    %202 = arith.mulf %199, %201 : vector<4x16x16xf32>
    %203 = arith.addf %198, %202 : vector<4x16x16xf32>
    %c0_209 = arith.constant 0 : index
    %c0_210 = arith.constant 0 : index
    %c0_211 = arith.constant 0 : index
    %204 = vector.load %arg8[%c0_209, %c0_210, %c0_211] : memref<4x1x1xf32, #tpu.memory_space<vmem>>, vector<4x1x1xf32>
    %205 = vector.broadcast %204 : vector<4x1x1xf32> to vector<4x16x16xf32>
    %206 = arith.addf %203, %205 : vector<4x16x16xf32>
    %cst_212 = arith.constant 0.000000e+00 : f32
    %207 = vector.broadcast %cst_212 : f32 to vector<4x16x16xf32>
    %208 = arith.maximumf %206, %207 : vector<4x16x16xf32>
    %209 = arith.addf %157, %208 : vector<4x16x16xf32>
    %c0_213 = arith.constant 0 : index
    %c0_214 = arith.constant 0 : index
    %c0_215 = arith.constant 0 : index
    %c0_216 = arith.constant 0 : index
    %210 = vector.load %arg9[%c0_213, %c0_214, %c0_215, %c0_216] : memref<1x4x16x16xf32, #tpu.memory_space<vmem>>, vector<1x4x16x16xf32>
    %211 = vector.shape_cast %210 : vector<1x4x16x16xf32> to vector<4x16x16xf32>
    %212 = vector.shape_cast %209 : vector<4x16x16xf32> to vector<1x4x16x16xf32>
    tpu.vector_store %arg9[%c0_213, %c0_214, %c0_215, %c0_216], %212 {strides = array<i32>} : memref<1x4x16x16xf32, #tpu.memory_space<vmem>>, vector<1x4x16x16xf32>,
    return
  }
  func.func @transform_0(%arg0: i32, %arg1: i32) -> (i32, i32, i32, i32) {
    %c0_i32 = arith.constant 0 : i32
    %c0_i32_0 = arith.constant 0 : i32
    %c0_i32_1 = arith.constant 0 : i32
    return %arg0, %arg1, %c0_i32, %c0_i32_0 : i32, i32, i32, i32
  }
  func.func @transform_1(%arg0: i32, %arg1: i32) -> (i32, i32, i32) {
    %c0_i32 = arith.constant 0 : i32
    %c0_i32_0 = arith.constant 0 : i32
    %c0_i32_1 = arith.constant 0 : i32
    return %arg1, %c0_i32, %c0_i32_0 : i32, i32, i32
  }
  func.func @transform_2(%arg0: i32, %arg1: i32) -> (i32, i32, i32) {
    %c0_i32 = arith.constant 0 : i32
    %c0_i32_0 = arith.constant 0 : i32
    %c0_i32_1 = arith.constant 0 : i32
    return %arg1, %c0_i32, %c0_i32_0 : i32, i32, i32
  }
  func.func @transform_3(%arg0: i32, %arg1: i32) -> (i32, i32, i32) {
    %c0_i32 = arith.constant 0 : i32
    %c0_i32_0 = arith.constant 0 : i32
    %c0_i32_1 = arith.constant 0 : i32
    return %arg1, %c0_i32, %c0_i32_0 : i32, i32, i32
  }
  func.func @transform_4(%arg0: i32, %arg1: i32) -> (i32, i32, i32) {
    %c0_i32 = arith.constant 0 : i32
    %c0_i32_0 = arith.constant 0 : i32
    %c0_i32_1 = arith.constant 0 : i32
    return %arg1, %c0_i32, %c0_i32_0 : i32, i32, i32
  }
  func.func @transform_5(%arg0: i32, %arg1: i32) -> (i32, i32, i32) {
    %c0_i32 = arith.constant 0 : i32
    %c0_i32_0 = arith.constant 0 : i32
    %c0_i32_1 = arith.constant 0 : i32
    return %arg1, %c0_i32, %c0_i32_0 : i32, i32, i32
  }
  func.func @transform_6(%arg0: i32, %arg1: i32) -> (i32, i32, i32) {
    %c0_i32 = arith.constant 0 : i32
    %c0_i32_0 = arith.constant 0 : i32
    %c0_i32_1 = arith.constant 0 : i32
    return %arg1, %c0_i32, %c0_i32_0 : i32, i32, i32
  }
  func.func @transform_7(%arg0: i32, %arg1: i32) -> (i32, i32, i32, i32) {
    %c0_i32 = arith.constant 0 : i32
    %c0_i32_0 = arith.constant 0 : i32
    %c0_i32_1 = arith.constant 0 : i32
    return %arg0, %arg1, %c0_i32, %c0_i32_0 : i32, i32, i32, i32
  }
}

</mosaic_0001>

<bundles_post_ra>
// kernel: tpu_custom_call.1
= control target key start
LH: loop header
LB: loop body
LE: loop exit
PB: predicated region body
PF: predicated region fallthrough
CT: control target
= control target key end

     0   :  { %s4905_s0 = inlined_call_operand.hbm [shape: f32[2,4,16,16], index: 0, kind: input, shape index: {}]   ;;  %s4906_s1 = inlined_call_operand.vmem [shape: f32[4,3,3], index: 1, kind: input, shape index: {}]   ;;  %s4907_s2 = inlined_call_operand.vmem [shape: f32[4,1,1], index: 2, kind: input, shape index: {}]   ;;  %s4908_s3 = inlined_call_operand.vmem [shape: f32[4,3,3], index: 3, kind: input, shape index: {}]   ;;  %s4909_s4 = inlined_call_operand.vmem [shape: f32[4,1,1], index: 4, kind: input, shape index: {}]   ;;  %s4910_s5 = inlined_call_operand.vmem [shape: f32[4,3,3], index: 5, kind: input, shape index: {}]   ;;  %s4911_s6 = inlined_call_operand.vmem [shape: f32[4,1,1], index: 6, kind: input, shape index: {}]   ;;  %s4912_s7 = inlined_call_operand.hbm [shape: f32[2,4,16,16], index: 7, kind: output, shape index: {}]  }
   0x1   :  { %4926 = sst [smem:[#allocation11_spill]] %s4905_s0 }
   0x2   :  { %4927 = sst [smem:[#allocation12_spill]] %s4906_s1 }
   0x3   :  { %4928 = sst [smem:[#allocation13_spill]] %s4907_s2 }
   0x4   :  { %4929 = sst [smem:[#allocation14_spill]] %s4908_s3 }
   0x5   :  { %4930 = sst [smem:[#allocation15_spill]] %s4909_s4 }
   0x6   :  { %12 = vsyncpa [#allocation5], 0 }
   0x7   :  { %14 = vsyncpa [#allocation5 + $0x1], 0 }
   0x8   :  { %15 = vsyncpa [#allocation6], 0 }
   0x9   :  { %17 = vsyncpa [#allocation6 + $0x1], 0  ;;  %s3272_s24 = smov 0   ;;  %s3274_s25 = smov 0  }
   0xa   :  { %s3276_s26 = smov 0   ;;  %s3278_s27 = smov 0  }
   0xb   :  { %s3280_s28 = smov 0   ;;  %s3282_s29 = smov 0  }
   0xc LB: > { %s2775_s30 = sadd.s32 4294967295, %s3217_s29   ;;  %s2776_s8 = sadd.s32 4294967294, %s3217_s29   ;;  %s3217_s29 = sphi %s3282_s29, %s23_s29   ;;  %s3213_s28 = sphi %s3280_s28, %s4964_s28   ;;  %s3209_s27 = sphi %s3278_s27, %s4963_s27   ;;  %s3205_s26 = sphi %s3276_s26, %s4962_s26   ;;  %s3201_s25 = sphi %s3274_s25, %s4961_s25   ;;  %s3197_s24 = sphi %s3272_s24, %s4960_s24  }
   0xd   : > { %s35_s9 = sadd.s32 1, %s3213_s28  ;;  %s44_s10 = sadd.s32 1, %s3205_s26 }
   0xe   : > { %p37_p0 = scmp.ge.s32.totalorder %s35_s9, 2  ;;  %p51_p1 = scmp.ne.s32.totalorder %s3205_s26, %s3201_s25 }
   0xf   : > { %p52_p2 = scmp.eq.s32.totalorder %s3217_s29, 0  ;;  %p57_p3 = scmp.ne.s32.totalorder %s3201_s25, %s3197_s24 }
  0x10   : > { %s4966_s9 = smov (%p37_p0, %s35_s9), 0  ;;  %p58_p5 = scmp.eq.s32.totalorder %s2775_s30, 0 }
  0x11   : > { %4931 = sst [smem:[#allocation10_spill]] %s4966_s9  ;;  %p3313_p4 = por %p52_p2, %p51_p1 }
  0x12   : > { %s39_s12 = ssub.s32 %s3213_s28, %s4966_s9  ;;  %p239_p6 = scmp.eq.s32.totalorder %s2775_s30, 1 }
  0x13   : > { %p42_p7 = scmp.eq.s32.totalorder %s39_s12, 0  ;;  %p3319_p8 = por %p58_p5, %p57_p3 }
  0x14   : > { %p3323_p9 = por %p239_p6, %p51_p1  ;;  %p245_p10 = scmp.eq.s32.totalorder %s2776_s8, 1 }
  0x15   : > { %s3328_s15 = scalar_select %p42_p7, %s3205_s26, %s44_s10  }
  0x16   : > { %s4934_s14 = scalar_select %p3323_p9, 1, 0 }
  0x17   : > { %p3330_p11 = por %p245_p10, %p57_p3  ;;  %p3038_p13 = scmp.lt.s32.totalorder %s3217_s29, 2 }
  0x18   : > { %s316_s17 = sand.u32 1, %s3205_s26   ;;  %s2808_s19 = sshll.u32 %s3213_s28, 10 }
  0x19   : > { %s4935_s16 = scalar_select %p3330_p11, 1, 0 }
  0x1a   : > { %s2785_s18 = sshll.u32 %s316_s17, 6  ;;  %s4936_s0 = sld [smem:[#allocation11_spill]] }
  0x1b   : > { %s320_s23 = scalar_lea.vmem [#allocation4], %s2785_s18  ;;  %p3347_p0 = pnand %p3038_p13, %p3313_p4 }
  0x1c   : > { %s330_s30 = sshll.u32 %s320_s23, 4  ;;  %s3352_s10 = scalar_lea.sflag [#allocation5], %s316_s17  ;;  %s3343_s30 = int_to_ptr.vmem [resolvable:$true] %s330_s30 }
  0x1d   : > { %p3107_p3 = pneg %p3347_p0 }
  0x20   : > { %s3341_s22 = scalar_lea.hbm %s4936_s0, %s2808_s19  ;;  %s3110_s11 = scalar_lea.hbm %s4936_s0, 2048 }
  0x21   : > { %s3105_s12 = scalar_lea.hbm %s3341_s22, 1024  ;;  %p3111_p4 = scmp.lt.u32.totalorder %s3341_s22, %s4936_s0 }
  0x22   : > { %p3106_p2 = scmp.ne.s32.totalorder %s3341_s22, %s3105_s12  ;;  %p3112_p7 = scmp.lt.u32.totalorder %s3110_s11, %s3105_s12 }
  0x23   : > { %p3114_p13 = scmp.lt.u32.totalorder %s3105_s12, %s3341_s22 }
  0x24   : > { %p3108_p5 = pnand %p3107_p3, %p3106_p2  ;;  %p3113_p10 = por %p3112_p7, %p3111_p4 }
  0x26   : > { %p3109_p6 = pneg %p3108_p5  ;;  %p3115_p12 = por %p3114_p13, %p3113_p10 }
  0x28   : > { %p3116_p1 = pnand %p3115_p12, %p3109_p6 }
  0x2a   : > { %3119 = shalt.err (!%p3116_p1)
}
  0x2b   : > { %s3120_s17 = scalar_lea.vmem %s3343_s30, 1024  ;;  %s3219_s23 = smov [#allocation4]  }
  0x2c   : > { %p3121_p2 = scmp.ne.s32.totalorder %s3343_s30, %s3120_s17  ;;  %s3125_s18 = sshll.u32 %s3219_s23, 4  ;;  %s3126_s18 = int_to_ptr.vmem [resolvable:$false] %s3125_s18 }
  0x2d   : > { %s3127_s19 = scalar_lea.vmem %s3126_s18, 2048  ;;  %p3128_p9 = scmp.lt.s32.totalorder %s3343_s30, %s3126_s18 }
  0x2e   : > { %p3123_p5 = pnand %p3121_p2, %p3107_p3  ;;  %p3129_p4 = scmp.lt.s32.totalorder %s3127_s19, %s3120_s17 }
  0x30   : > { %p3124_p11 = pneg %p3123_p5  ;;  %p3130_p7 = por %p3129_p4, %p3128_p9 }
  0x32   : > { %p3131_p10 = pnand %p3130_p7, %p3124_p11 }
  0x34   : > { %3134 = shalt.err (!%p3131_p10)
}
  0x35   : > { %s3220_s12 = smov 128   ;;  %s3221_s11 = smov 8  }
  0x36   : > { %3033 = dma.hbm_to_vmem [thread:$0]  (!%p3347_p0), %s3341_s22, 1024, %s3343_s30, %s3352_s10, %s3220_s12, %s3220_s12, %s3221_s11  }
  0x37   : > { %p338_p12 = scmp.lt.s32.totalorder %s3217_s29, 3  ;;  %p4938_p1 = scmp.ge.s32.totalorder %s3217_s29, 1 }
  0x39   : > { %p339_p3 = pnand %p4938_p1, %p338_p12 }
  0x3a   : > { %s3384_s20 = sand.u32 (!%p339_p3), 1, %s3201_s25  }
  0x3b   : > { %342 = sbr.rel (%p339_p3) target bundleno = 1296 (0x510), region = 48  ;;  %s4914_s21 = sshll.u32 (!%p339_p3), %s3384_s20, 6 }
  0x3c   : > { %s345_s17 = scalar_lea.sflag (!%p339_p3), [#allocation5], %s3384_s20  ;;  %s3390_s23 = scalar_lea.vmem (!%p339_p3), [#allocation4], %s4914_s21 }
  0x42   : > { %3188 = dma.done.wait (%p3319_p8), %s345_s17, 1024  }
  0x43   : > { %3190 = vsyncadd (%p3319_p8), %s345_s17, 4294966272  ;;  %s4939_s1 = sld [smem:[#allocation12_spill]]  ;;  %s4917_s18 = smov 127   ;;  %v3223_v4 = vmov 0   ;;  %vm441_vm0 = vcmask 146432   ;;  %vm444_vm1 = vcmask 140288  }
  0x44   : > { %3100 = vset.pattern.permute.xlu1 %v3223_v4  ;;  %3099 = vset.pattern.permute.xlu0 %v3223_v4  ;;  %s4915_s17 = smov 126   ;;  %v3225_v13 = vmov 0.0   ;;  %v456_v14 = vld [vmem:[%s3390_s23 + $0x8] sm:$0xff]  ;;  %v455_v15 = vld [vmem:[%s3390_s23] sm:$0xff]  ;;  %s3226_s22 = smov 1   ;;  %v458_v16 = vld [vmem:[%s3390_s23 + $0x18] sm:$0xff] }
  0x45   : > { %443 = vst.msk [vmem:[#allocation2 + $0x8] sm:$0xff] %vm441_vm0, %v3225_v13  ;;  %442 = vst.msk [vmem:[#allocation2] sm:$0xff] %vm441_vm0, %v3225_v13  ;;  %v457_v17 = vld [vmem:[%s3390_s23 + $0x10] sm:$0xff]  ;;  %v460_v18 = vld [vmem:[%s3390_s23 + $0x28] sm:$0xff]  ;;  %s4940_s2 = sld [smem:[#allocation13_spill]]  ;;  %s4941_s3 = sld [smem:[#allocation14_spill]] }
  0x46   : > { %445 = vst.msk [vmem:[#allocation2 + $0x10] sm:$0x3] %vm444_vm1, %v3225_v13  ;;  %448 = vst.msk [vmem:[#allocation2 + $0x28] sm:$0x3] %vm444_vm1, %v3225_v13  ;;  %v459_v19 = vld [vmem:[%s3390_s23 + $0x20] sm:$0xff]  ;;  %v462_v20 = vld [vmem:[%s3390_s23 + $0x38] sm:$0xff] }
  0x47   : > { %446 = vst.msk [vmem:[#allocation2 + $0x18] sm:$0xff] %vm441_vm0, %v3225_v13  ;;  %447 = vst.msk [vmem:[#allocation2 + $0x20] sm:$0xff] %vm441_vm0, %v3225_v13  ;;  %v461_v21 = vld [vmem:[%s3390_s23 + $0x30] sm:$0xff]  ;;  %vm495_vm2 = vcmask 138248   ;;  %s4944_s4 = sld [smem:[#allocation15_spill]]  ;;  %vm1100_vm3 = vcmask 162816  }
  0x48   : > { %449 = vst.msk [vmem:[#allocation2 + $0x30] sm:$0xff] %vm441_vm0, %v3225_v13  ;;  %450 = vst.msk [vmem:[#allocation2 + $0x38] sm:$0xff] %vm441_vm0, %v3225_v13  ;;  %vm1103_vm4 = vcmask 158720   ;;  %vm1146_vm5 = vcmask 146448   ;;  %vm2581_vm9 = vcmask 130048   ;;  %p4956_p9 = scmp.ne.s32.totalorder %s4934_s14, 0 }
  0x49   : > { %v514_v0 = vld [vmem:[%s4939_s1 + $0x8] sm:$0x1]  ;;  %v512_v1 = vld [vmem:[%s4939_s1] sm:$0x1]  ;;  %v513_v2 = vld [vmem:[%s4939_s1 + $0x4] sm:$0x1] }
  0x4a   : > { %552 = vrot.lane.b32.xlu1 %v514_v0, %s4917_s18  ;;  %548 = vrot.lane.b32.xlu0 %v512_v1, %s4917_s18  ;;  %2810 = vpush %v512_v1  ;;  %v515_v3 = vld [vmem:[%s4939_s1 + $0xc] sm:$0x1]  ;;  %v3419_v5 = vld [vmem:[%s4939_s1 + $0x5] sm:$0x1] }
  0x4b   : > { %2812 = vpush %v513_v2  ;;  %v3424_v6 = vld [vmem:[%s4939_s1 + $0x1] sm:$0x1]  ;;  %v3433_v7 = vld [vmem:[%s4939_s1 + $0xd] sm:$0x1]  ;;  %v3438_v8 = vld [vmem:[%s4939_s1 + $0x9] sm:$0x1] }
  0x4c   : > { %2814 = vpush %v514_v0  ;;  %v3455_v9 = vld [vmem:[%s4939_s1 + $0x6] sm:$0x1]  ;;  %v3460_v10 = vld [vmem:[%s4939_s1 + $0x2] sm:$0x1]  ;;  %v3469_v11 = vld [vmem:[%s4939_s1 + $0xe] sm:$0x1] }
  0x4d   : > { %2816 = vpush %v515_v3  ;;  %v3474_v12 = vld [vmem:[%s4939_s1 + $0xa] sm:$0x1]  ;;  %v2792_v22 = vld [vmem:[%s4940_s2 + $0x1] ss:$0 sm:$0xff]  ;;  %v2791_v23 = vld [vmem:[%s4940_s2] ss:$0 sm:$0xff] }
  0x4e   : > { %554 = vrot.lane.b32.xlu1 %v515_v3, %s4917_s18  ;;  %550 = vrot.lane.b32.xlu0 %v513_v2, %s4917_s18  ;;  %451 = vst.msk [vmem:[#allocation2 + $0x40] sm:$0x3] %vm444_vm1, %v3225_v13  ;;  %454 = vst.msk [vmem:[#allocation2 + $0x58] sm:$0x3] %vm444_vm1, %v3225_v13  ;;  %v2793_v24 = vld [vmem:[%s4940_s2 + $0x2] ss:$0 sm:$0xff] }
  0x4f   : > { %452 = vst.msk [vmem:[#allocation2 + $0x48] sm:$0xff] %vm441_vm0, %v3225_v13  ;;  %453 = vst.msk [vmem:[#allocation2 + $0x50] sm:$0xff] %vm441_vm0, %v3225_v13  ;;  %v2794_v25 = vld [vmem:[%s4940_s2 + $0x3] ss:$0 sm:$0xff]  ;;  %v3523_v26 = vld [vmem:[%s4941_s3] sm:$0x1] }
  0x50   : > { %v3528_v27 = vld [vmem:[%s4941_s3 + $0x4] sm:$0x1]  ;;  %v3537_v28 = vld [vmem:[%s4941_s3 + $0x8] sm:$0x1]  ;;  %v3542_v29 = vld [vmem:[%s4941_s3 + $0xc] sm:$0x1] }
  0x51   : > { %1102 = vst.msk [vmem:[#allocation3 + $0x8] sm:$0xff] %vm1100_vm3, %v3225_v13  ;;  %1101 = vst.msk [vmem:[#allocation3] sm:$0xff] %vm1100_vm3, %v3225_v13 }
  0x52   : > { %618 = vrot.lane.b32.xlu1 %v513_v2, %s4915_s17  ;;  %616 = vrot.lane.b32.xlu0 %v512_v1, %s4915_s17  ;;  %1104 = vst.msk [vmem:[#allocation3 + $0x10] sm:$0xf] %vm1103_vm4, %v3225_v13  ;;  %1107 = vst.msk [vmem:[#allocation3 + $0x28] sm:$0xf] %vm1103_vm4, %v3225_v13 }
  0x53   : > { %1105 = vst.msk [vmem:[#allocation3 + $0x18] sm:$0xff] %vm1100_vm3, %v3225_v13  ;;  %1106 = vst.msk [vmem:[#allocation3 + $0x20] sm:$0xff] %vm1100_vm3, %v3225_v13 }
  0x54   : > { %1108 = vst.msk [vmem:[#allocation3 + $0x30] sm:$0xff] %vm1100_vm3, %v3225_v13  ;;  %1109 = vst.msk [vmem:[#allocation3 + $0x38] sm:$0xff] %vm1100_vm3, %v3225_v13 }
  0x55   : > { %1110 = vst.msk [vmem:[#allocation3 + $0x40] sm:$0xf] %vm1103_vm4, %v3225_v13  ;;  %1113 = vst.msk [vmem:[#allocation3 + $0x58] sm:$0xf] %vm1103_vm4, %v3225_v13 }
  0x56   : > { %622 = vrot.lane.b32.xlu1 %v515_v3, %s4915_s17  ;;  %620 = vrot.lane.b32.xlu0 %v514_v0, %s4915_s17  ;;  %1111 = vst.msk [vmem:[#allocation3 + $0x48] sm:$0xff] %vm1100_vm3, %v3225_v13  ;;  %1112 = vst.msk [vmem:[#allocation3 + $0x50] sm:$0xff] %vm1100_vm3, %v3225_v13 }
  0x5a   : > { %730 = vrot.lane.b32.xlu1 %v3419_v5, %s4917_s18  ;;  %728 = vrot.lane.b32.xlu0 %v3424_v6, %s4917_s18 }
  0x5e   : > { %734 = vrot.lane.b32.xlu1 %v3433_v7, %s4917_s18  ;;  %732 = vrot.lane.b32.xlu0 %v3438_v8, %s4917_s18 }
  0x62   : > { %798 = vrot.lane.b32.xlu1 %v3419_v5, %s4915_s17  ;;  %796 = vrot.lane.b32.xlu0 %v3424_v6, %s4915_s17 }
  0x66   : > { %802 = vrot.lane.b32.xlu1 %v3433_v7, %s4915_s17  ;;  %800 = vrot.lane.b32.xlu0 %v3438_v8, %s4915_s17 }
  0x6a   : > { %910 = vrot.lane.b32.xlu1 %v3455_v9, %s4917_s18  ;;  %908 = vrot.lane.b32.xlu0 %v3460_v10, %s4917_s18 }
  0x6e   : > { %914 = vrot.lane.b32.xlu1 %v3469_v11, %s4917_s18  ;;  %912 = vrot.lane.b32.xlu0 %v3474_v12, %s4917_s18 }
  0x72   : > { %978 = vrot.lane.b32.xlu1 %v3455_v9, %s4915_s17  ;;  %976 = vrot.lane.b32.xlu0 %v3460_v10, %s4915_s17 }
  0x76   : > { %982 = vrot.lane.b32.xlu1 %v3469_v11, %s4915_s17  ;;  %980 = vrot.lane.b32.xlu0 %v3474_v12, %s4915_s17 }
  0x7a   : > { %473 = vrot.lane.b32.xlu1 %v456_v14, %s3226_s22  ;;  %471 = vrot.lane.b32.xlu0 %v455_v15, %s3226_s22 }
  0x7b   : > { %s2811_s13 = spop %2810 }
  0x7c   : > { %s3558_s11 = spop %2812  ;;  %v518_v58 = vstv %s2811_s13 }
  0x7d   : > { %s3564_s23 = spop %2814 }
  0x7e   : > { %477 = vrot.lane.b32.xlu1 %v458_v16, %s3226_s22  ;;  %475 = vrot.lane.b32.xlu0 %v457_v17, %s3226_s22 }
  0x82   : > { %481 = vrot.lane.b32.xlu1 %v460_v18, %s3226_s22  ;;  %479 = vrot.lane.b32.xlu0 %v459_v19, %s3226_s22 }
  0x86   : > { %485 = vrot.lane.b32.xlu1 %v462_v20, %s3226_s22  ;;  %483 = vrot.lane.b32.xlu0 %v461_v21, %s3226_s22  ;;  %s3568_s22 = spop %2816 }
  0x8a   : > { %1073 = vperm.xlu1 %3100, %v2792_v22   ;;  %1069 = vperm.xlu0 %3099, %v2791_v23  }
  0x8e   : > { %1077 = vperm.xlu1 %3100, %v2793_v24   ;;  %1081 = vperm.xlu0 %3099, %v2794_v25  }
  0x92   : > { %1199 = vrot.lane.b32.xlu1 %v3523_v26, %s4917_s18  ;;  %1201 = vrot.lane.b32.xlu0 %v3528_v27, %s4917_s18 }
  0x96   : > { %1203 = vrot.lane.b32.xlu1 %v3537_v28, %s4917_s18  ;;  %1205 = vrot.lane.b32.xlu0 %v3542_v29, %s4917_s18 }
  0x9a   : > { %1267 = vrot.lane.b32.xlu1 %v3523_v26, %s4915_s17 }
  0xbc   : > { %v553_v30 = vpop.permute.xlu1 %552  ;;  %v549_v31 = vpop.permute.xlu0 %548 }
  0xbd   : > { %2818 = vpush %v549_v31 }
  0xc0   : > { %v555_v32 = vpop.permute.xlu1 %554  ;;  %v551_v33 = vpop.permute.xlu0 %550 }
  0xc1   : > { %2820 = vpush %v551_v33 }
  0xc2   : > { %2822 = vpush %v553_v30 }
  0xc3   : > { %2824 = vpush %v555_v32 }
  0xc4   : > { %v619_v34 = vpop.permute.xlu1 %618  ;;  %v617_v35 = vpop.permute.xlu0 %616 }
  0xc5   : > { %2826 = vpush %v617_v35 }
  0xc6   : > { %2828 = vpush %v619_v34 }
  0xc8   : > { %v623_v36 = vpop.permute.xlu1 %622  ;;  %v621_v37 = vpop.permute.xlu0 %620 }
  0xc9   : > { %2830 = vpush %v621_v37 }
  0xca   : > { %2832 = vpush %v623_v36 }
  0xcb   : > { %2834 = vpush %v3424_v6 }
  0xcc   : > { %2836 = vpush %v3419_v5  ;;  %v731_v38 = vpop.permute.xlu1 %730  ;;  %v729_v39 = vpop.permute.xlu0 %728 }
  0xcd   : > { %2838 = vpush %v3438_v8 }
  0xce   : > { %2840 = vpush %v3433_v7 }
  0xcf   : > { %2842 = vpush %v729_v39 }
  0xd0   : > { %2844 = vpush %v731_v38  ;;  %v735_v40 = vpop.permute.xlu1 %734  ;;  %v733_v41 = vpop.permute.xlu0 %732 }
  0xd1   : > { %2846 = vpush %v733_v41 }
  0xd2   : > { %2848 = vpush %v735_v40 }
  0xd4   : > { %v799_v42 = vpop.permute.xlu1 %798  ;;  %v797_v43 = vpop.permute.xlu0 %796 }
  0xd5   : > { %2850 = vpush %v797_v43 }
  0xd6   : > { %2852 = vpush %v799_v42 }
  0xd8   : > { %v803_v44 = vpop.permute.xlu1 %802  ;;  %v801_v45 = vpop.permute.xlu0 %800 }
  0xd9   : > { %2854 = vpush %v801_v45 }
  0xda   : > { %2856 = vpush %v803_v44 }
  0xdb   : > { %2858 = vpush %v3460_v10 }
  0xdc   : > { %2860 = vpush %v3455_v9  ;;  %v911_v46 = vpop.permute.xlu1 %910  ;;  %v909_v47 = vpop.permute.xlu0 %908  ;;  %v522_v9 = vstv %s3558_s11 }
  0xdd   : > { %2862 = vpush %v3474_v12 }
  0xde   : > { %2864 = vpush %v3469_v11 }
  0xdf   : > { %2866 = vpush %v909_v47 }
  0xe0   : > { %2868 = vpush %v911_v46  ;;  %v915_v48 = vpop.permute.xlu1 %914  ;;  %v913_v49 = vpop.permute.xlu0 %912 }
  0xe1   : > { %2870 = vpush %v913_v49 }
  0xe2   : > { %2872 = vpush %v915_v48 }
  0xe4   : > { %v979_v50 = vpop.permute.xlu1 %978  ;;  %v977_v51 = vpop.permute.xlu0 %976 }
  0xe5   : > { %2874 = vpush %v977_v51 }
  0xe6   : > { %2876 = vpush %v979_v50 }
  0xe8   : > { %v983_v52 = vpop.permute.xlu1 %982  ;;  %v981_v53 = vpop.permute.xlu0 %980 }
  0xe9   : > { %2878 = vpush %v981_v53 }
  0xea   : > { %2880 = vpush %v983_v52 }
  0xeb   : > { %2882 = vpush %v3523_v26 }
  0xec   : > { %v474_v54 = vpop.permute.xlu1 %473  ;;  %v472_v55 = vpop.permute.xlu0 %471  ;;  %2884 = vpush %v3528_v27 }
  0xed   : > { %497 = vst.msk [vmem:[#allocation2 + $0x9] sm:$0xff] %vm495_vm2, %v474_v54  ;;  %496 = vst.msk [vmem:[#allocation2 + $0x1] sm:$0xff] %vm495_vm2, %v472_v55 }
  0xee   : > { %2886 = vpush %v3537_v28  ;;  %s2819_s30 = spop %2818 }
  0xef   : > { %2888 = vpush %v3542_v29  ;;  %v557_v61 = vstv %s2819_s30 }
  0xf0   : > { %v478_v56 = vpop.permute.xlu1 %477  ;;  %v476_v57 = vpop.permute.xlu0 %475 }
  0xf1   : > { %499 = vst.msk [vmem:[#allocation2 + $0x21] sm:$0xff] %vm495_vm2, %v478_v56  ;;  %498 = vst.msk [vmem:[#allocation2 + $0x19] sm:$0xff] %vm495_vm2, %v476_v57 }
  0xf2   : > { %s2821_s8 = spop %2820 }
  0xf3   : > { %s3576_s21 = spop %2822  ;;  %v560_v6 = vstv %s2821_s8 }
  0xf4   : > { %v3572_v59 = vld [vmem:[#allocation2] sm:$0xff]  ;;  %v3574_v60 = vld [vmem:[#allocation2 + $0x8] sm:$0xff]  ;;  %v482_v62 = vpop.permute.xlu1 %481  ;;  %v480_v63 = vpop.permute.xlu0 %479  ;;  %s3588_s10 = spop %2824  ;;  %v563_v15 = vstv %s3576_s21 }
  0xf5   : > { %v3579_v0 = vmul.f32 %v518_v58, %v3572_v59  ;;  %v3582_v1 = vmul.f32 %v518_v58, %v3574_v60  ;;  %v568_v2 = vmul.f32 %v557_v61, %v3572_v59  ;;  %v569_v3 = vmul.f32 %v557_v61, %v3574_v60  ;;  %501 = vst.msk [vmem:[#allocation2 + $0x39] sm:$0xff] %vm495_vm2, %v482_v62  ;;  %v3622_v18 = vld [vmem:[#allocation2 + $0x1] sm:$0xff]  ;;  %v3624_v19 = vld [vmem:[#allocation2 + $0x9] sm:$0xff] }
  0xf6   : > { %500 = vst.msk [vmem:[#allocation2 + $0x31] sm:$0xff] %vm495_vm2, %v480_v63  ;;  %s3590_s19 = spop %2826  ;;  %v566_v44 = vstv %s3588_s10  ;;  %v3704_v57 = vld [vmem:[#allocation2 + $0x2] sm:$0xff]  ;;  %v3706_v58 = vld [vmem:[#allocation2 + $0xa] sm:$0xff] }
  0xf7   : > { %586 = vrot.lane.b32.xlu1 %v569_v3, %s4917_s18  ;;  %584 = vrot.lane.b32.xlu0 %v568_v2, %s4917_s18  ;;  %s3601_s12 = spop %2828  ;;  %v625_v47 = vstv %s3590_s19  ;;  %s4942_s19 = smov 126  }
  0xf8   : > { %v3594_v4 = vld [vmem:[#allocation2 + $0x18] sm:$0xff]  ;;  %v3596_v5 = vld [vmem:[#allocation2 + $0x20] sm:$0xff]  ;;  %v486_v7 = vpop.permute.xlu1 %485  ;;  %v484_v8 = vpop.permute.xlu0 %483  ;;  %v637_v49 = vmul.f32 %v625_v47, %v3574_v60  ;;  %v636_v50 = vmul.f32 %v625_v47, %v3572_v59  ;;  %v628_v51 = vstv %s3601_s12 }
  0xf9   : > { %v570_v10 = vmul.f32 %v560_v6, %v3594_v4  ;;  %v571_v11 = vmul.f32 %v560_v6, %v3596_v5  ;;  %503 = vst.msk [vmem:[#allocation2 + $0x51] sm:$0xff] %vm495_vm2, %v486_v7  ;;  %502 = vst.msk [vmem:[#allocation2 + $0x49] sm:$0xff] %vm495_vm2, %v484_v8  ;;  %v3608_v12 = vmul.f32 %v522_v9, %v3596_v5  ;;  %v3637_v26 = vld [vmem:[#allocation2 + $0x19] sm:$0xff]  ;;  %v3639_v30 = vld [vmem:[#allocation2 + $0x21] sm:$0xff] }
  0xfa   : > { %s3605_s13 = spop %2830  ;;  %v3611_v14 = vmul.f32 %v522_v9, %v3594_v4  ;;  %v639_v54 = vmul.f32 %v628_v51, %v3596_v5  ;;  %v638_v55 = vmul.f32 %v628_v51, %v3594_v4  ;;  %v3719_v2 = vld [vmem:[#allocation2 + $0x1a] sm:$0xff]  ;;  %v3721_v3 = vld [vmem:[#allocation2 + $0x22] sm:$0xff] }
  0xfb   : > { %s3613_s30 = spop %2832  ;;  %590 = vrot.lane.b32.xlu1 %v571_v11, %s4917_s18  ;;  %588 = vrot.lane.b32.xlu0 %v570_v10, %s4917_s18  ;;  %v631_v56 = vstv %s3605_s13 }
  0xfc   : > { %s2835_s11 = spop %2834  ;;  %v3628_v22 = vld [vmem:[#allocation2 + $0x39] sm:$0xff]  ;;  %v634_v47 = vstv %s3613_s30 }
  0xfd   : > { %v3618_v16 = vld [vmem:[#allocation2 + $0x30] sm:$0xff]  ;;  %v3620_v17 = vld [vmem:[#allocation2 + $0x38] sm:$0xff]  ;;  %v698_v20 = vstv %s2835_s11  ;;  %s2837_s8 = spop %2836 }
  0xfe   : > { %v3626_v21 = vld [vmem:[#allocation2 + $0x31] sm:$0xff]  ;;  %v573_v23 = vmul.f32 %v563_v15, %v3620_v17  ;;  %v3632_v24 = vmul.f32 %v698_v20, %v3622_v18  ;;  %v3635_v25 = vmul.f32 %v698_v20, %v3624_v19  ;;  %v702_v31 = vstv %s2837_s8  ;;  %s2839_s21 = spop %2838  ;;  %v3733_v9 = vld [vmem:[#allocation2 + $0x3a] sm:$0xff] }
  0xff   : > { %v572_v32 = vmul.f32 %v563_v15, %v3618_v16  ;;  %v3643_v33 = vmul.f32 %v702_v31, %v3637_v26  ;;  %v3646_v34 = vmul.f32 %v702_v31, %v3639_v30  ;;  %v706_v35 = vstv %s2839_s21  ;;  %s2841_s11 = spop %2840  ;;  %v3731_v8 = vld [vmem:[#allocation2 + $0x32] sm:$0xff] }
 0x100   : > { %594 = vrot.lane.b32.xlu1 %v573_v23, %s4917_s18  ;;  %v3649_v36 = vld [vmem:[#allocation2 + $0x50] sm:$0xff]  ;;  %v3652_v37 = vmul.f32 %v706_v35, %v3626_v21  ;;  %v3655_v38 = vmul.f32 %v706_v35, %v3628_v22  ;;  %v710_v40 = vstv %s2841_s11  ;;  %v3660_v41 = vld [vmem:[#allocation2 + $0x48] sm:$0xff]  ;;  %s3667_s8 = spop %2842  ;;  %v641_v5 = vmul.f32 %v631_v56, %v3620_v17 }
 0x101   : > { %v3657_v39 = vld [vmem:[#allocation2 + $0x49] sm:$0xff]  ;;  %592 = vrot.lane.b32.xlu0 %v572_v32, %s4917_s18  ;;  %v3662_v42 = vld [vmem:[#allocation2 + $0x51] sm:$0xff]  ;;  %s3673_s21 = spop %2844  ;;  %v575_v46 = vmul.f32 %v566_v44, %v3649_v36  ;;  %v574_v48 = vmul.f32 %v566_v44, %v3660_v41  ;;  %v640_v11 = vmul.f32 %v631_v56, %v3618_v16 }
 0x102   : > { %v3665_v43 = vmul.f32 %v710_v40, %v3657_v39  ;;  %v3671_v45 = vmul.f32 %v710_v40, %v3662_v42  ;;  %s3677_s11 = spop %2846  ;;  %v3742_v23 = vld [vmem:[#allocation2 + $0x4a] sm:$0xff]  ;;  %v3744_v31 = vld [vmem:[#allocation2 + $0x52] sm:$0xff] }
 0x103   : > { %s3681_s17 = spop %2848 }
 0x104   : > { %598 = vrot.lane.b32.xlu1 %v575_v46, %s4917_s18 }
 0x105   : > { %596 = vrot.lane.b32.xlu0 %v574_v48, %s4917_s18  ;;  %v643_v48 = vmul.f32 %v634_v47, %v3649_v36 }
 0x106   : > { %s3685_s10 = spop %2850 }
 0x107   : > { %s3689_s0 = spop %2852 }
 0x108   : > { %654 = vrot.lane.b32.xlu1 %v637_v49, %s4942_s19  ;;  %v642_v49 = vmul.f32 %v634_v47, %v3660_v41 }
 0x109   : > { %v3692_v52 = vpop.permute.xlu1 %1073  ;;  %v3694_v53 = vpop.permute.xlu0 %1069  ;;  %652 = vrot.lane.b32.xlu0 %v636_v50, %s4942_s19  ;;  %v737_v50 = vstv %s3667_s8 }
 0x10a   : > { %s3697_s1 = spop %2854  ;;  %v748_v56 = vmul.f32 %v737_v50, %v3622_v18 }
 0x10b   : > { %s3700_s18 = spop %2856 }
 0x10c   : > { %s2859_s12 = spop %2858  ;;  %658 = vrot.lane.b32.xlu1 %v639_v54, %s4942_s19 }
 0x10d   : > { %v878_v59 = vstv %s2859_s12  ;;  %s2861_s2 = spop %2860  ;;  %v3709_v60 = vpop.permute.xlu1 %1077  ;;  %v3711_v61 = vpop.permute.xlu0 %1081  ;;  %656 = vrot.lane.b32.xlu0 %v638_v55, %s4942_s19  ;;  %v749_v55 = vmul.f32 %v737_v50, %v3624_v19 }
 0x10e   : > { %v3714_v62 = vmul.f32 %v878_v59, %v3704_v57  ;;  %v3717_v63 = vmul.f32 %v878_v59, %v3706_v58  ;;  %v882_v4 = vstv %s2861_s2  ;;  %s2863_s13 = spop %2862  ;;  %v740_v59 = vstv %s3673_s21  ;;  %s4943_s2 = smov 127  }
 0x10f   : > { %v3726_v6 = vmul.f32 %v882_v4, %v3719_v2  ;;  %v3729_v7 = vmul.f32 %v882_v4, %v3721_v3  ;;  %v886_v10 = vstv %s2863_s13  ;;  %s2865_s12 = spop %2864 }
 0x110   : > { %v3737_v15 = vmul.f32 %v886_v10, %v3731_v8  ;;  %v3740_v20 = vmul.f32 %v886_v10, %v3733_v9  ;;  %v890_v32 = vstv %s2865_s12  ;;  %662 = vrot.lane.b32.xlu1 %v641_v5, %s4942_s19  ;;  %v751_v5 = vmul.f32 %v740_v59, %v3639_v30 }
 0x111   : > { %v3747_v35 = vmul.f32 %v890_v32, %v3742_v23  ;;  %v3750_v40 = vmul.f32 %v890_v32, %v3744_v31  ;;  %v1200_v44 = vpop.permute.xlu1 %1199  ;;  %v1202_v46 = vpop.permute.xlu0 %1201  ;;  %660 = vrot.lane.b32.xlu0 %v640_v11, %s4942_s19  ;;  %v750_v10 = vmul.f32 %v740_v59, %v3637_v26  ;;  %v743_v11 = vstv %s3677_s11 }
 0x112   : > { %2890 = vpush %v1200_v44  ;;  %v753_v32 = vmul.f32 %v743_v11, %v3628_v22  ;;  %v752_v44 = vmul.f32 %v743_v11, %v3626_v21  ;;  %v811_v59 = vstv %s3697_s1 }
 0x113   : > { %2892 = vpush %v1202_v46  ;;  %v746_v46 = vstv %s3681_s17  ;;  %s2867_s17 = spop %2866 }
 0x114   : > { %666 = vrot.lane.b32.xlu1 %v643_v48, %s4942_s19  ;;  %v755_v47 = vmul.f32 %v746_v46, %v3662_v42  ;;  %v754_v48 = vmul.f32 %v746_v46, %v3657_v39 }
 0x115   : > { %v1204_v51 = vpop.permute.xlu1 %1203  ;;  %v1206_v54 = vpop.permute.xlu0 %1205  ;;  %664 = vrot.lane.b32.xlu0 %v642_v49, %s4942_s19  ;;  %v805_v49 = vstv %s3685_s10 }
 0x116   : > { %2894 = vpush %v1204_v51  ;;  %v817_v50 = vmul.f32 %v805_v49, %v3624_v19  ;;  %v816_v51 = vmul.f32 %v805_v49, %v3622_v18  ;;  %v820_v19 = vmul.f32 %v811_v59, %v3626_v21 }
 0x117   : > { %2896 = vpush %v1206_v54  ;;  %v808_v54 = vstv %s3689_s0  ;;  %s2869_s0 = spop %2868 }
 0x118   : > { %766 = vrot.lane.b32.xlu1 %v749_v55, %s4943_s2  ;;  %v819_v55 = vmul.f32 %v808_v54, %v3639_v30  ;;  %s2871_s1 = spop %2870 }
 0x119   : > { %v1268_v4 = vpop.permute.xlu1 %1267  ;;  %764 = vrot.lane.b32.xlu0 %v748_v56, %s4943_s2  ;;  %v818_v56 = vmul.f32 %v808_v54, %v3637_v26  ;;  %v917_v26 = vstv %s2867_s17  ;;  %v923_v11 = vstv %s2871_s1 }
 0x11a   : > { %2898 = vpush %v1268_v4  ;;  %v821_v4 = vmul.f32 %v811_v59, %v3628_v22  ;;  %v928_v22 = vmul.f32 %v917_v26, %v3704_v57  ;;  %v929_v21 = vmul.f32 %v917_v26, %v3706_v58 }
 0x11c   : > { %770 = vrot.lane.b32.xlu1 %v751_v5, %s4943_s2  ;;  %v814_v5 = vstv %s3700_s18  ;;  %s2873_s18 = spop %2872 }
 0x11d   : > { %768 = vrot.lane.b32.xlu0 %v750_v10, %s4943_s2  ;;  %v823_v18 = vmul.f32 %v814_v5, %v3662_v42  ;;  %v822_v30 = vmul.f32 %v814_v5, %v3657_v39  ;;  %v920_v10 = vstv %s2869_s0  ;;  %v926_v46 = vstv %s2873_s18  ;;  %s2875_s30 = spop %2874 }
 0x11e   : > { %v930_v42 = vmul.f32 %v920_v10, %v3719_v2  ;;  %v931_v39 = vmul.f32 %v920_v10, %v3721_v3  ;;  %v985_v49 = vstv %s2875_s30  ;;  %s2877_s8 = spop %2876 }
 0x11f   : > { %v988_v54 = vstv %s2877_s8  ;;  %s2879_s21 = spop %2878  ;;  %s4921_s8 = smov 124  }
 0x120   : > { %774 = vrot.lane.b32.xlu1 %v753_v32, %s4943_s2  ;;  %v932_v32 = vmul.f32 %v923_v11, %v3731_v8  ;;  %v991_v59 = vstv %s2879_s21  ;;  %s2881_s11 = spop %2880 }
 0x121   : > { %772 = vrot.lane.b32.xlu0 %v752_v44, %s4943_s2  ;;  %v933_v44 = vmul.f32 %v923_v11, %v3733_v9  ;;  %v2795_v11 = vld [vmem:[%s4944_s4] ss:$0 sm:$0xff]  ;;  %s4013_s21 = spop %2882 }
 0x124   : > { %778 = vrot.lane.b32.xlu1 %v755_v47, %s4943_s2  ;;  %v934_v47 = vmul.f32 %v926_v46, %v3742_v23 }
 0x125   : > { %776 = vrot.lane.b32.xlu0 %v754_v48, %s4943_s2  ;;  %v935_v48 = vmul.f32 %v926_v46, %v3744_v31 }
 0x128   : > { %834 = vrot.lane.b32.xlu1 %v817_v50, %s4942_s19  ;;  %v996_v50 = vmul.f32 %v985_v49, %v3704_v57  ;;  %v1000_v57 = vmul.f32 %v991_v59, %v3731_v8  ;;  %v3847_v8 = vld [vmem:[%s4941_s3 + $0x9] sm:$0x1] }
 0x129   : > { %832 = vrot.lane.b32.xlu0 %v816_v51, %s4942_s19  ;;  %v997_v51 = vmul.f32 %v985_v49, %v3706_v58  ;;  %v1001_v58 = vmul.f32 %v991_v59, %v3733_v9 }
 0x12c   : > { %838 = vrot.lane.b32.xlu1 %v819_v55, %s4942_s19  ;;  %v998_v55 = vmul.f32 %v988_v54, %v3719_v2 }
 0x12d   : > { %836 = vrot.lane.b32.xlu0 %v818_v56, %s4942_s19  ;;  %v999_v56 = vmul.f32 %v988_v54, %v3721_v3  ;;  %v3838_v3 = vld [vmem:[%s4941_s3 + $0x1] sm:$0x1] }
 0x130   : > { %842 = vrot.lane.b32.xlu1 %v821_v4, %s4942_s19  ;;  %v994_v4 = vstv %s2881_s11  ;;  %s4017_s11 = spop %2884 }
 0x131   : > { %840 = vrot.lane.b32.xlu0 %v820_v19, %s4942_s19  ;;  %v1002_v19 = vmul.f32 %v994_v4, %v3742_v23  ;;  %v1003_v2 = vmul.f32 %v994_v4, %v3744_v31  ;;  %v3874_v23 = vld [vmem:[%s4941_s3 + $0x2] sm:$0x1] }
 0x134   : > { %846 = vrot.lane.b32.xlu1 %v823_v18, %s4942_s19  ;;  %v3883_v18 = vld [vmem:[%s4941_s3 + $0xa] sm:$0x1] }
 0x135   : > { %844 = vrot.lane.b32.xlu0 %v822_v30, %s4942_s19  ;;  %v3888_v30 = vld [vmem:[%s4941_s3 + $0x6] sm:$0x1] }
 0x138   : > { %944 = vrot.lane.b32.xlu1 %v928_v22, %s4943_s2 }
 0x139   : > { %946 = vrot.lane.b32.xlu0 %v929_v21, %s4943_s2  ;;  %v3897_v21 = vld [vmem:[%s4941_s3 + $0xe] sm:$0x1] }
 0x13c   : > { %948 = vrot.lane.b32.xlu1 %v930_v42, %s4943_s2 }
 0x13d   : > { %950 = vrot.lane.b32.xlu0 %v931_v39, %s4943_s2 }
 0x140   : > { %952 = vrot.lane.b32.xlu1 %v932_v32, %s4943_s2 }
 0x141   : > { %954 = vrot.lane.b32.xlu0 %v933_v44, %s4943_s2 }
 0x144   : > { %956 = vrot.lane.b32.xlu1 %v934_v47, %s4943_s2 }
 0x145   : > { %958 = vrot.lane.b32.xlu0 %v935_v48, %s4943_s2 }
 0x148   : > { %1012 = vrot.lane.b32.xlu1 %v996_v50, %s4942_s19 }
 0x149   : > { %1014 = vrot.lane.b32.xlu0 %v997_v51, %s4942_s19  ;;  %v526_v51 = vstv %s3564_s23  ;;  %s4019_s23 = spop %2886 }
 0x14a   : > { %s4023_s10 = spop %2888 }
 0x14b   : > { %s2891_s13 = spop %2890 }
 0x14c   : > { %1016 = vrot.lane.b32.xlu1 %v998_v55, %s4942_s19  ;;  %v2796_v55 = vld [vmem:[%s4944_s4 + $0x1] ss:$0 sm:$0xff]  ;;  %s2893_s12 = spop %2892 }
 0x14d   : > { %1018 = vrot.lane.b32.xlu0 %v999_v56, %s4942_s19  ;;  %s2895_s17 = spop %2894 }
 0x14e   : > { %s2897_s0 = spop %2896 }
 0x14f   : > { %s2899_s1 = spop %2898 }
 0x150   : > { %1020 = vrot.lane.b32.xlu1 %v1000_v57, %s4942_s19 }
 0x151   : > { %1022 = vrot.lane.b32.xlu0 %v1001_v58, %s4942_s19  ;;  %v536_v58 = vmul.f32 %v526_v51, %v3618_v16 }
 0x154   : > { %1024 = vrot.lane.b32.xlu1 %v1002_v19, %s4942_s19 }
 0x155   : > { %1026 = vrot.lane.b32.xlu0 %v1003_v2, %s4942_s19 }
 0x158   : > { %1271 = vrot.lane.b32.xlu1 %v3537_v28, %s4942_s19  ;;  %v3861_v28 = vld [vmem:[%s4941_s3 + $0xd] sm:$0x1] }
 0x159   : > { %1269 = vrot.lane.b32.xlu0 %v3528_v27, %s4942_s19  ;;  %v3852_v27 = vld [vmem:[%s4941_s3 + $0x5] sm:$0x1] }
 0x15c   : > { %1379 = vrot.lane.b32.xlu1 %v3838_v3, %s4943_s2 }
 0x15d   : > { %1273 = vrot.lane.b32.xlu0 %v3542_v29, %s4942_s19 }
 0x160   : > { %1383 = vrot.lane.b32.xlu1 %v3847_v8, %s4943_s2 }
 0x161   : > { %1381 = vrot.lane.b32.xlu0 %v3852_v27, %s4943_s2 }
 0x164   : > { %1447 = vrot.lane.b32.xlu1 %v3838_v3, %s4942_s19 }
 0x165   : > { %1385 = vrot.lane.b32.xlu0 %v3861_v28, %s4943_s2 }
 0x168   : > { %1451 = vrot.lane.b32.xlu1 %v3847_v8, %s4942_s19 }
 0x169   : > { %v587_v29 = vpop.permute.xlu1 %586  ;;  %v585_v9 = vpop.permute.xlu0 %584  ;;  %1449 = vrot.lane.b32.xlu0 %v3852_v27, %s4942_s19 }
 0x16a   : > { %v609_v39 = vadd.f32 %v587_v29, %v3582_v1  ;;  %v608_v32 = vadd.f32 %v585_v9, %v3579_v0  ;;  %v2797_v1 = vld [vmem:[%s4944_s4 + $0x2] ss:$0 sm:$0xff]  ;;  %v2798_v29 = vld [vmem:[%s4944_s4 + $0x3] ss:$0 sm:$0xff] }
 0x16c   : > { %1559 = vrot.lane.b32.xlu1 %v3874_v23, %s4943_s2 }
 0x16d   : > { %v591_v31 = vpop.permute.xlu1 %590  ;;  %v589_v5 = vpop.permute.xlu0 %588  ;;  %1453 = vrot.lane.b32.xlu0 %v3861_v28, %s4942_s19 }
 0x16e   : > { %v611_v49 = vadd.f32 %v591_v31, %v3608_v12  ;;  %v610_v54 = vadd.f32 %v589_v5, %v3611_v14  ;;  %v537_v12 = vmul.f32 %v526_v51, %v3620_v17 }
 0x170   : > { %1563 = vrot.lane.b32.xlu1 %v3883_v18, %s4943_s2 }
 0x171   : > { %1561 = vrot.lane.b32.xlu0 %v3888_v30, %s4943_s2 }
 0x172   : > { %v595_v26 = vpop.permute.xlu1 %594 }
 0x173   : > { %v593_v22 = vpop.permute.xlu0 %592  ;;  %v613_v19 = vadd.f32 %v595_v26, %v537_v12 }
 0x174   : > { %1627 = vrot.lane.b32.xlu1 %v3874_v23, %s4942_s19  ;;  %v612_v14 = vadd.f32 %v593_v22, %v536_v58 }
 0x175   : > { %1565 = vrot.lane.b32.xlu0 %v3897_v21, %s4943_s2 }
 0x176   : > { %v599_v10 = vpop.permute.xlu1 %598 }
 0x177   : > { %v597_v42 = vpop.permute.xlu0 %596 }
 0x178   : > { %1631 = vrot.lane.b32.xlu1 %v3883_v18, %s4942_s19 }
 0x179   : > { %1629 = vrot.lane.b32.xlu0 %v3888_v30, %s4942_s19 }
 0x17a   : > { %v655_v44 = vpop.permute.xlu1 %654 }
 0x17b   : > { %v677_v46 = vadd.f32 %v655_v44, %v609_v39  ;;  %v653_v47 = vpop.permute.xlu0 %652 }
 0x17c   : > { %v676_v48 = vadd.f32 %v653_v47, %v608_v32  ;;  %1720 = vperm.xlu1 %3100, %v2795_v11  }
 0x17d   : > { %1633 = vrot.lane.b32.xlu0 %v3897_v21, %s4942_s19  ;;  %v721_v50 = vadd.f32 %v3635_v25, %v677_v46 }
 0x17e   : > { %v659_v0 = vpop.permute.xlu1 %658  ;;  %v720_v56 = vadd.f32 %v3632_v24, %v676_v48 }
 0x17f   : > { %v679_v59 = vadd.f32 %v659_v0, %v611_v49  ;;  %v657_v57 = vpop.permute.xlu0 %656  ;;  %v530_v49 = vstv %s3568_s22  ;;  %s4919_s22 = smov 2  }
 0x180   : > { %v678_v4 = vadd.f32 %v657_v57, %v610_v54  ;;  %1728 = vperm.xlu1 %3100, %v2797_v1   ;;  %v539_v54 = vmul.f32 %v530_v49, %v3649_v36 }
 0x181   : > { %1724 = vperm.xlu0 %3099, %v2796_v55   ;;  %v723_v25 = vadd.f32 %v3646_v34, %v679_v59  ;;  %v538_v55 = vmul.f32 %v530_v49, %v3660_v41 }
 0x182   : > { %v663_v2 = vpop.permute.xlu1 %662  ;;  %v722_v24 = vadd.f32 %v3643_v33, %v678_v4  ;;  %v615_v12 = vadd.f32 %v599_v10, %v539_v54 }
 0x183   : > { %v681_v9 = vadd.f32 %v663_v2, %v613_v19  ;;  %v661_v17 = vpop.permute.xlu0 %660  ;;  %v614_v58 = vadd.f32 %v597_v42, %v538_v55 }
 0x184   : > { %v680_v31 = vadd.f32 %v661_v17, %v612_v14 }
 0x185   : > { %1732 = vperm.xlu0 %3099, %v2798_v29   ;;  %v725_v16 = vadd.f32 %v3655_v38, %v681_v9 }
 0x186   : > { %v667_v5 = vpop.permute.xlu1 %666  ;;  %v724_v26 = vadd.f32 %v3652_v37, %v680_v31 }
 0x187   : > { %v665_v39 = vpop.permute.xlu0 %664 }
 0x188   : > { %v682_v29 = vadd.f32 %v665_v39, %v614_v58 }
 0x18a   : > { %v767_v34 = vpop.permute.xlu1 %766 }
 0x18b   : > { %v765_v22 = vpop.permute.xlu0 %764  ;;  %v789_v33 = vadd.f32 %v767_v34, %v721_v50  ;;  %v683_v50 = vadd.f32 %v667_v5, %v615_v12 }
 0x18c   : > { %v788_v1 = vadd.f32 %v765_v22, %v720_v56 }
 0x18e   : > { %v771_v11 = vpop.permute.xlu1 %770 }
 0x18f   : > { %v769_v32 = vpop.permute.xlu0 %768  ;;  %v791_v59 = vadd.f32 %v771_v11, %v723_v25  ;;  %v727_v25 = vadd.f32 %v3671_v45, %v683_v50 }
 0x190   : > { %v790_v4 = vadd.f32 %v769_v32, %v722_v24  ;;  %v726_v24 = vadd.f32 %v3665_v43, %v682_v29 }
 0x192   : > { %v775_v44 = vpop.permute.xlu1 %774 }
 0x193   : > { %v773_v46 = vpop.permute.xlu0 %772  ;;  %v793_v36 = vadd.f32 %v775_v44, %v725_v16 }
 0x194   : > { %v792_v31 = vadd.f32 %v773_v46, %v724_v26 }
 0x196   : > { %v779_v47 = vpop.permute.xlu1 %778 }
 0x197   : > { %v777_v48 = vpop.permute.xlu0 %776 }
 0x198   : > { %v794_v22 = vadd.f32 %v777_v48, %v726_v24 }
 0x19a   : > { %v835_v51 = vpop.permute.xlu1 %834 }
 0x19b   : > { %v857_v0 = vadd.f32 %v835_v51, %v789_v33  ;;  %v833_v38 = vpop.permute.xlu0 %832 }
 0x19c   : > { %v856_v37 = vadd.f32 %v833_v38, %v788_v1 }
 0x19d   : > { %v901_v57 = vadd.f32 %v3717_v63, %v857_v0 }
 0x19e   : > { %v839_v19 = vpop.permute.xlu1 %838  ;;  %v900_v14 = vadd.f32 %v3714_v62, %v856_v37  ;;  %v795_v62 = vadd.f32 %v779_v47, %v727_v25 }
 0x19f   : > { %v859_v2 = vadd.f32 %v839_v19, %v791_v59  ;;  %v837_v56 = vpop.permute.xlu0 %836 }
 0x1a0   : > { %v858_v9 = vadd.f32 %v837_v56, %v790_v4 }
 0x1a1   : > { %v903_v17 = vadd.f32 %v3729_v7, %v859_v2 }
 0x1a2   : > { %v843_v41 = vpop.permute.xlu1 %842  ;;  %v902_v10 = vadd.f32 %v3726_v6, %v858_v9 }
 0x1a3   : > { %v861_v63 = vadd.f32 %v843_v41, %v793_v36  ;;  %v841_v42 = vpop.permute.xlu0 %840 }
 0x1a4   : > { %v860_v34 = vadd.f32 %v841_v42, %v792_v31 }
 0x1a5   : > { %v905_v5 = vadd.f32 %v3740_v20, %v861_v63 }
 0x1a6   : > { %v847_v39 = vpop.permute.xlu1 %846  ;;  %v904_v16 = vadd.f32 %v3737_v15, %v860_v34 }
 0x1a7   : > { %v863_v11 = vadd.f32 %v847_v39, %v795_v62  ;;  %v845_v7 = vpop.permute.xlu0 %844 }
 0x1a8   : > { %v862_v26 = vadd.f32 %v845_v7, %v794_v22 }
 0x1a9   : > { %v907_v43 = vadd.f32 %v3750_v40, %v863_v11 }
 0x1aa   : > { %v945_v45 = vpop.permute.xlu1 %944  ;;  %v906_v6 = vadd.f32 %v3747_v35, %v862_v26 }
 0x1ab   : > { %v947_v15 = vpop.permute.xlu0 %946  ;;  %v968_v33 = vadd.f32 %v945_v45, %v900_v14 }
 0x1ac   : > { %v969_v49 = vadd.f32 %v947_v15, %v901_v57 }
 0x1ae   : > { %v949_v20 = vpop.permute.xlu1 %948 }
 0x1af   : > { %v951_v32 = vpop.permute.xlu0 %950  ;;  %v970_v38 = vadd.f32 %v949_v20, %v902_v10 }
 0x1b0   : > { %v971_v40 = vadd.f32 %v951_v32, %v903_v17 }
 0x1b2   : > { %v953_v44 = vpop.permute.xlu1 %952 }
 0x1b3   : > { %v955_v46 = vpop.permute.xlu0 %954  ;;  %v972_v19 = vadd.f32 %v953_v44, %v904_v16 }
 0x1b4   : > { %v973_v57 = vadd.f32 %v955_v46, %v905_v5 }
 0x1b6   : > { %v957_v47 = vpop.permute.xlu1 %956 }
 0x1b7   : > { %v959_v48 = vpop.permute.xlu0 %958  ;;  %v974_v17 = vadd.f32 %v957_v47, %v906_v6  ;;  %v4002_v47 = vld [vmem:[%s4910_s5 + $0xc] sm:$0x1] }
 0x1b8   : > { %v975_v41 = vadd.f32 %v959_v48, %v907_v43 }
 0x1ba   : > { %v1013_v1 = vpop.permute.xlu1 %1012 }
 0x1bb   : > { %v1036_v51 = vadd.f32 %v1013_v1, %v968_v33  ;;  %v1015_v54 = vpop.permute.xlu0 %1014 }
 0x1bc   : > { %v1037_v0 = vadd.f32 %v1015_v54, %v969_v49 }
 0x1bd   : > { %v1084_v13 = vadd.f32 %v3694_v53, %v1036_v51 }
 0x1be   : > { %v1085_v55 = vadd.f32 %v3694_v53, %v1037_v0  ;;  %v1017_v35 = vpop.permute.xlu1 %1016 }
 0x1bf   : > { %v1092_v37 = vmax.f32 %v1084_v13, 0.0  ;;  %v1038_v12 = vadd.f32 %v1017_v35, %v970_v38  ;;  %v1019_v59 = vpop.permute.xlu0 %1018  ;;  %v1208_v13 = vstv %s2891_s13 }
 0x1c0   : > { %v1093_v58 = vmax.f32 %v1085_v55, 0.0  ;;  %v1039_v4 = vadd.f32 %v1019_v59, %v971_v40 }
 0x1c1   : > { %v1086_v14 = vadd.f32 %v3692_v52, %v1038_v12  ;;  %1122 = vrot.lane.b32.xlu1 %v1092_v37, %s4919_s22 }
 0x1c2   : > { %v1087_v50 = vadd.f32 %v3692_v52, %v1039_v4  ;;  %1124 = vrot.lane.b32.xlu0 %v1093_v58, %s4919_s22  ;;  %v1021_v2 = vpop.permute.xlu1 %1020  ;;  %v1211_v58 = vstv %s2893_s12 }
 0x1c3   : > { %v1094_v56 = vmax.f32 %v1086_v14, 0.0  ;;  %v1040_v53 = vadd.f32 %v1021_v2, %v972_v19  ;;  %v1023_v29 = vpop.permute.xlu0 %1022 }
 0x1c4   : > { %v1095_v9 = vmax.f32 %v1087_v50, 0.0  ;;  %v1041_v36 = vadd.f32 %v1023_v29, %v973_v57 }
 0x1c5   : > { %v1088_v31 = vadd.f32 %v3709_v60, %v1040_v53  ;;  %1126 = vrot.lane.b32.xlu1 %v1094_v56, %s4919_s22  ;;  %v1214_v56 = vstv %s2895_s17 }
 0x1c6   : > { %v1089_v10 = vadd.f32 %v3709_v60, %v1041_v36  ;;  %1128 = vrot.lane.b32.xlu0 %v1095_v9, %s4919_s22  ;;  %v1025_v25 = vpop.permute.xlu1 %1024 }
 0x1c7   : > { %v1096_v52 = vmax.f32 %v1088_v31, 0.0  ;;  %v1042_v63 = vadd.f32 %v1025_v25, %v974_v17  ;;  %v1027_v42 = vpop.permute.xlu0 %1026  ;;  %v1217_v17 = vstv %s2897_s0 }
 0x1c8   : > { %v1097_v24 = vmax.f32 %v1089_v10, 0.0  ;;  %v1043_v34 = vadd.f32 %v1027_v42, %v975_v41 }
 0x1c9   : > { %v1090_v62 = vadd.f32 %v3711_v61, %v1042_v63  ;;  %1130 = vrot.lane.b32.xlu1 %v1096_v52, %s4919_s22  ;;  %v1276_v52 = vstv %s2899_s1 }
 0x1ca   : > { %v1091_v5 = vadd.f32 %v3711_v61, %v1043_v34  ;;  %1132 = vrot.lane.b32.xlu0 %v1097_v24, %s4919_s22  ;;  %v1272_v22 = vpop.permute.xlu1 %1271 }
 0x1cb   : > { %v1098_v39 = vmax.f32 %v1090_v62, 0.0  ;;  %v1270_v16 = vpop.permute.xlu0 %1269 }
 0x1cc   : > { %v1099_v60 = vmax.f32 %v1091_v5, 0.0  ;;  %2900 = vpush %v1270_v16 }
 0x1cd   : > { %1134 = vrot.lane.b32.xlu1 %v1098_v39, %s4919_s22  ;;  %2902 = vpush %v1272_v22 }
 0x1ce   : > { %1136 = vrot.lane.b32.xlu0 %v1099_v60, %s4919_s22  ;;  %v1380_v11 = vpop.permute.xlu1 %1379 }
 0x1cf   : > { %v1274_v7 = vpop.permute.xlu0 %1273 }
 0x1d0   : > { %2904 = vpush %v1274_v7 }
 0x1d1   : > { %2906 = vpush %v3838_v3 }
 0x1d2   : > { %v1384_v26 = vpop.permute.xlu1 %1383  ;;  %2908 = vpush %v3852_v27 }
 0x1d3   : > { %v1382_v61 = vpop.permute.xlu0 %1381  ;;  %2910 = vpush %v3847_v8 }
 0x1d4   : > { %2912 = vpush %v3861_v28 }
 0x1d5   : > { %2914 = vpush %v1380_v11 }
 0x1d6   : > { %v1448_v43 = vpop.permute.xlu1 %1447  ;;  %2916 = vpush %v1382_v61 }
 0x1d7   : > { %v1386_v45 = vpop.permute.xlu0 %1385  ;;  %2918 = vpush %v1384_v26 }
 0x1d8   : > { %2920 = vpush %v1386_v45 }
 0x1d9   : > { %2922 = vpush %v1448_v43 }
 0x1da   : > { %v1452_v6 = vpop.permute.xlu1 %1451 }
 0x1db   : > { %v1450_v15 = vpop.permute.xlu0 %1449 }
 0x1dc   : > { %2924 = vpush %v1450_v15 }
 0x1dd   : > { %2926 = vpush %v1452_v6 }
 0x1de   : > { %v1560_v3 = vpop.permute.xlu1 %1559 }
 0x1df   : > { %v1454_v20 = vpop.permute.xlu0 %1453 }
 0x1e0   : > { %2928 = vpush %v1454_v20 }
 0x1e1   : > { %2930 = vpush %v3874_v23  ;;  %v3986_v23 = vld [vmem:[%s4910_s5] sm:$0x1] }
 0x1e2   : > { %v1564_v27 = vpop.permute.xlu1 %1563  ;;  %2932 = vpush %v3888_v30 }
 0x1e3   : > { %v1562_v8 = vpop.permute.xlu0 %1561  ;;  %2934 = vpush %v3883_v18  ;;  %v3991_v18 = vld [vmem:[%s4910_s5 + $0x4] sm:$0x1] }
 0x1e4   : > { %2936 = vpush %v3897_v21  ;;  %v3996_v21 = vld [vmem:[%s4910_s5 + $0x8] sm:$0x1] }
 0x1e5   : > { %2938 = vpush %v1560_v3 }
 0x1e6   : > { %v1628_v28 = vpop.permute.xlu1 %1627  ;;  %2940 = vpush %v1562_v8 }
 0x1e7   : > { %v1566_v32 = vpop.permute.xlu0 %1565  ;;  %2942 = vpush %v1564_v27 }
 0x1e8   : > { %2944 = vpush %v1566_v32 }
 0x1e9   : > { %2946 = vpush %v1628_v28 }
 0x1ea   : > { %v1632_v44 = vpop.permute.xlu1 %1631 }
 0x1eb   : > { %v1630_v46 = vpop.permute.xlu0 %1629 }
 0x1ec   : > { %2948 = vpush %v1630_v46 }
 0x1ed   : > { %2950 = vpush %v1632_v44 }
 0x1ef   : > { %v1634_v30 = vpop.permute.xlu0 %1633 }
 0x1f0   : > { %2952 = vpush %v1634_v30 }
 0x1f1   : > { %2954 = vpush %v3986_v23 }
 0x1f2   : > { %2956 = vpush %v3991_v18 }
 0x1f3   : > { %2958 = vpush %v3996_v21 }
 0x1f4   : > { %2960 = vpush %v4002_v47 }
 0x1fb   : > { %v4007_v48 = vpop.permute.xlu1 %1720 }
 0x1fd   : > { %s2901_s18 = spop %2900 }
 0x1fe   : > { %s2903_s30 = spop %2902  ;;  %v1279_v24 = vstv %s2901_s18 }
 0x1ff   : > { %v4011_v49 = vpop.permute.xlu1 %1728  ;;  %v1282_v5 = vstv %s2903_s30 }
 0x200   : > { %v4009_v33 = vpop.permute.xlu0 %1724 }
 0x201   : > { %s2905_s13 = spop %2904 }
 0x202   : > { %s4069_s12 = spop %2906  ;;  %v1285_v16 = vstv %s2905_s13 }
 0x203   : > { %s4073_s17 = spop %2908 }
 0x204   : > { %v4015_v1 = vpop.permute.xlu0 %1732  ;;  %s4077_s0 = spop %2910 }
 0x205   : > { %s4081_s1 = spop %2912 }
 0x206   : > { %s2915_s18 = spop %2914 }
 0x207   : > { %v1388_v61 = vstv %s2915_s18  ;;  %s2917_s30 = spop %2916 }
 0x208   : > { %v1391_v3 = vstv %s2917_s30  ;;  %s2919_s13 = spop %2918 }
 0x209   : > { %v1394_v32 = vstv %s2919_s13  ;;  %s2921_s18 = spop %2920 }
 0x20a   : > { %s2923_s30 = spop %2922 }
 0x20d   : > { %s2925_s13 = spop %2924 }
 0x20e   : > { %s2927_s22 = spop %2926 }
 0x233   : > { %v1123_v51 = vpop.permute.xlu1 %1122 }
 0x234   : > { %v1125_v54 = vpop.permute.xlu0 %1124  ;;  %1147 = vst.msk [vmem:[#allocation3 + $0x2] sm:$0xff] %vm1146_vm5, %v1123_v51 }
 0x235   : > { %1148 = vst.msk [vmem:[#allocation3 + $0xa] sm:$0xff] %vm1146_vm5, %v1125_v54  ;;  %v1397_v54 = vstv %s2921_s18  ;;  %s4945_s18 = smov 124  }
 0x237   : > { %v1127_v0 = vpop.permute.xlu1 %1126 }
 0x238   : > { %v1129_v38 = vpop.permute.xlu0 %1128  ;;  %1149 = vst.msk [vmem:[#allocation3 + $0x1a] sm:$0xff] %vm1146_vm5, %v1127_v0 }
 0x239   : > { %1150 = vst.msk [vmem:[#allocation3 + $0x22] sm:$0xff] %vm1146_vm5, %v1129_v38 }
 0x23b   : > { %v1131_v40 = vpop.permute.xlu1 %1130  ;;  %v4027_v55 = vld [vmem:[#allocation3] sm:$0xff] }
 0x23c   : > { %v1133_v35 = vpop.permute.xlu0 %1132  ;;  %1151 = vst.msk [vmem:[#allocation3 + $0x32] sm:$0xff] %vm1146_vm5, %v1131_v40  ;;  %v4030_v37 = vld [vmem:[#allocation3 + $0x8] sm:$0xff]  ;;  %v1219_v12 = vmul.f32 %v1208_v13, %v4027_v55  ;;  %v1287_v63 = vmul.f32 %v1276_v52, %v4027_v55 }
 0x23d   : > { %1152 = vst.msk [vmem:[#allocation3 + $0x3a] sm:$0xff] %vm1146_vm5, %v1133_v35  ;;  %v1220_v59 = vmul.f32 %v1208_v13, %v4030_v37  ;;  %v1288_v42 = vmul.f32 %v1276_v52, %v4030_v37  ;;  %v4085_v7 = vld [vmem:[#allocation3 + $0x2] sm:$0xff]  ;;  %v4088_v26 = vld [vmem:[#allocation3 + $0xa] sm:$0xff]  ;;  %v1456_v13 = vstv %s2923_s30 }
 0x23e   : > { %1235 = vrot.lane.b32.xlu1 %v1219_v12, %s4942_s19  ;;  %v1399_v43 = vmul.f32 %v1388_v61, %v4085_v7  ;;  %v1400_v45 = vmul.f32 %v1388_v61, %v4088_v26  ;;  %v1467_v40 = vmul.f32 %v1456_v13, %v4085_v7  ;;  %v1468_v35 = vmul.f32 %v1456_v13, %v4088_v26 }
 0x23f   : > { %1237 = vrot.lane.b32.xlu0 %v1220_v59, %s4942_s19  ;;  %v1135_v4 = vpop.permute.xlu1 %1134  ;;  %v4037_v19 = vld [vmem:[#allocation3 + $0x18] sm:$0xff]  ;;  %v1459_v12 = vstv %s2925_s13 }
 0x240   : > { %v1137_v14 = vpop.permute.xlu0 %1136  ;;  %1153 = vst.msk [vmem:[#allocation3 + $0x4a] sm:$0xff] %vm1146_vm5, %v1135_v4  ;;  %v4040_v57 = vld [vmem:[#allocation3 + $0x20] sm:$0xff]  ;;  %v1221_v50 = vmul.f32 %v1211_v58, %v4037_v19  ;;  %v1289_v34 = vmul.f32 %v1279_v24, %v4037_v19  ;;  %v1462_v4 = vstv %s2927_s22 }
 0x241   : > { %1154 = vst.msk [vmem:[#allocation3 + $0x52] sm:$0xff] %vm1146_vm5, %v1137_v14  ;;  %v1222_v2 = vmul.f32 %v1211_v58, %v4040_v57  ;;  %v1290_v62 = vmul.f32 %v1279_v24, %v4040_v57  ;;  %v4093_v6 = vld [vmem:[#allocation3 + $0x1a] sm:$0xff]  ;;  %v4096_v15 = vld [vmem:[#allocation3 + $0x22] sm:$0xff] }
 0x242   : > { %1239 = vrot.lane.b32.xlu1 %v1221_v50, %s4942_s19  ;;  %v1401_v20 = vmul.f32 %v1391_v3, %v4093_v6  ;;  %v1402_v27 = vmul.f32 %v1391_v3, %v4096_v15  ;;  %v1469_v59 = vmul.f32 %v1459_v12, %v4093_v6  ;;  %v1470_v58 = vmul.f32 %v1459_v12, %v4096_v15  ;;  %v4152_v24 = vld [vmem:[#allocation3 + $0x24] sm:$0xff] }
 0x243   : > { %1241 = vrot.lane.b32.xlu0 %v1222_v2, %s4942_s19  ;;  %v4047_v53 = vld [vmem:[#allocation3 + $0x30] sm:$0xff] }
 0x244   : > { %v4049_v29 = vld [vmem:[#allocation3 + $0x38] sm:$0xff]  ;;  %v1223_v9 = vmul.f32 %v1214_v56, %v4047_v53  ;;  %v1291_v22 = vmul.f32 %v1282_v5, %v4047_v53 }
 0x245   : > { %v1224_v36 = vmul.f32 %v1214_v56, %v4049_v29  ;;  %v1292_v39 = vmul.f32 %v1282_v5, %v4049_v29  ;;  %v4101_v8 = vld [vmem:[#allocation3 + $0x32] sm:$0xff]  ;;  %v4104_v28 = vld [vmem:[#allocation3 + $0x3a] sm:$0xff] }
 0x246   : > { %1243 = vrot.lane.b32.xlu1 %v1223_v9, %s4942_s19  ;;  %v1403_v44 = vmul.f32 %v1394_v32, %v4101_v8  ;;  %v1404_v46 = vmul.f32 %v1394_v32, %v4104_v28  ;;  %v1471_v14 = vmul.f32 %v1462_v4, %v4101_v8  ;;  %v1472_v50 = vmul.f32 %v1462_v4, %v4104_v28 }
 0x247   : > { %1245 = vrot.lane.b32.xlu0 %v1224_v36, %s4942_s19  ;;  %v4055_v31 = vld [vmem:[#allocation3 + $0x48] sm:$0xff] }
 0x248   : > { %v4057_v41 = vld [vmem:[#allocation3 + $0x50] sm:$0xff]  ;;  %v1225_v10 = vmul.f32 %v1217_v17, %v4055_v31  ;;  %v1293_v60 = vmul.f32 %v1285_v16, %v4055_v31 }
 0x249   : > { %v1226_v25 = vmul.f32 %v1217_v17, %v4057_v41  ;;  %v1294_v11 = vmul.f32 %v1285_v16, %v4057_v41  ;;  %v4109_v30 = vld [vmem:[#allocation3 + $0x4a] sm:$0xff]  ;;  %v4112_v51 = vld [vmem:[#allocation3 + $0x52] sm:$0xff] }
 0x24a   : > { %1247 = vrot.lane.b32.xlu1 %v1225_v10, %s4942_s19  ;;  %v1405_v0 = vmul.f32 %v1397_v54, %v4109_v30  ;;  %v1406_v38 = vmul.f32 %v1397_v54, %v4112_v51  ;;  %v4141_v17 = vld [vmem:[#allocation3 + $0x4] sm:$0xff]  ;;  %v4144_v10 = vld [vmem:[#allocation3 + $0xc] sm:$0xff]  ;;  %v4168_v61 = vld [vmem:[#allocation3 + $0x54] sm:$0xff] }
 0x24b   : > { %1249 = vrot.lane.b32.xlu0 %v1226_v25, %s4942_s19 }
 0x24e   : > { %1303 = vrot.lane.b32.xlu1 %v1287_v63, %s4921_s8 }
 0x24f   : > { %1305 = vrot.lane.b32.xlu0 %v1288_v42, %s4921_s8  ;;  %v4149_v42 = vld [vmem:[#allocation3 + $0x1c] sm:$0xff] }
 0x252   : > { %1307 = vrot.lane.b32.xlu1 %v1289_v34, %s4921_s8 }
 0x253   : > { %1309 = vrot.lane.b32.xlu0 %v1290_v62, %s4921_s8 }
 0x256   : > { %1311 = vrot.lane.b32.xlu1 %v1291_v22, %s4921_s8  ;;  %v4157_v22 = vld [vmem:[#allocation3 + $0x34] sm:$0xff] }
 0x257   : > { %1313 = vrot.lane.b32.xlu0 %v1292_v39, %s4921_s8  ;;  %v4160_v39 = vld [vmem:[#allocation3 + $0x3c] sm:$0xff] }
 0x25a   : > { %1315 = vrot.lane.b32.xlu1 %v1293_v60, %s4921_s8 }
 0x25b   : > { %1317 = vrot.lane.b32.xlu0 %v1294_v11, %s4921_s8  ;;  %s2929_s8 = spop %2928  ;;  %v4165_v11 = vld [vmem:[#allocation3 + $0x4c] sm:$0xff] }
 0x25c   : > { %s4123_s3 = spop %2930  ;;  %v1465_v2 = vstv %s2929_s8 }
 0x25d   : > { %s4127_s30 = spop %2932  ;;  %v1473_v56 = vmul.f32 %v1465_v2, %v4109_v30  ;;  %v1474_v36 = vmul.f32 %v1465_v2, %v4112_v51 }
 0x25e   : > { %1415 = vrot.lane.b32.xlu1 %v1399_v43, %s4942_s19  ;;  %s4131_s4 = spop %2934 }
 0x25f   : > { %1417 = vrot.lane.b32.xlu0 %v1400_v45, %s4942_s19  ;;  %s4135_s13 = spop %2936 }
 0x260   : > { %s2939_s9 = spop %2938 }
 0x261   : > { %v1568_v9 = vstv %s2939_s9  ;;  %s2941_s22 = spop %2940 }
 0x262   : > { %1419 = vrot.lane.b32.xlu1 %v1401_v20, %s4942_s19  ;;  %v1579_v25 = vmul.f32 %v1568_v9, %v4141_v17  ;;  %v1571_v52 = vstv %s2941_s22  ;;  %v1580_v63 = vmul.f32 %v1568_v9, %v4144_v10  ;;  %s2943_s9 = spop %2942 }
 0x263   : > { %1421 = vrot.lane.b32.xlu0 %v1402_v27, %s4942_s19  ;;  %v1581_v34 = vmul.f32 %v1571_v52, %v4149_v42  ;;  %v1574_v62 = vstv %s2943_s9  ;;  %v1582_v5 = vmul.f32 %v1571_v52, %v4152_v24  ;;  %s2945_s8 = spop %2944  ;;  %v1349_v52 = vstv %s4069_s12 }
 0x264   : > { %v1583_v16 = vmul.f32 %v1574_v62, %v4157_v22  ;;  %v1584_v60 = vmul.f32 %v1574_v62, %v4160_v39  ;;  %v1577_v43 = vstv %s2945_s8  ;;  %s2947_s22 = spop %2946 }
 0x265   : > { %v1585_v45 = vmul.f32 %v1577_v43, %v4165_v11  ;;  %v1636_v3 = vstv %s2947_s22  ;;  %v1586_v20 = vmul.f32 %v1577_v43, %v4168_v61  ;;  %s2949_s9 = spop %2948  ;;  %v1363_v43 = vmul.f32 %v1349_v52, %v4085_v7 }
 0x266   : > { %1423 = vrot.lane.b32.xlu1 %v1403_v44, %s4942_s19  ;;  %v1647_v27 = vmul.f32 %v1636_v3, %v4141_v17  ;;  %v1639_v32 = vstv %s2949_s9  ;;  %v1648_v44 = vmul.f32 %v1636_v3, %v4144_v10  ;;  %s2951_s8 = spop %2950 }
 0x267   : > { %1425 = vrot.lane.b32.xlu0 %v1404_v46, %s4942_s19  ;;  %v1649_v46 = vmul.f32 %v1639_v32, %v4149_v42  ;;  %v1642_v54 = vstv %s2951_s8  ;;  %s2953_s22 = spop %2952 }
 0x268   : > { %v1645_v13 = vstv %s2953_s22 }
 0x269   : > { %v1654_v12 = vmul.f32 %v1645_v13, %v4168_v61 }
 0x26a   : > { %1427 = vrot.lane.b32.xlu1 %v1405_v0, %s4942_s19  ;;  %v1650_v0 = vmul.f32 %v1639_v32, %v4152_v24  ;;  %v1177_v32 = vstv %s4019_s23 }
 0x26b   : > { %1429 = vrot.lane.b32.xlu0 %v1406_v38, %s4942_s19  ;;  %v1651_v38 = vmul.f32 %v1642_v54, %v4157_v22 }
 0x26e   : > { %1483 = vrot.lane.b32.xlu1 %v1467_v40, %s4945_s18  ;;  %v1652_v40 = vmul.f32 %v1642_v54, %v4160_v39 }
 0x26f   : > { %1485 = vrot.lane.b32.xlu0 %v1468_v35, %s4945_s18  ;;  %v1653_v35 = vmul.f32 %v1645_v13, %v4165_v11  ;;  %v1357_v13 = vstv %s4077_s0 }
 0x272   : > { %1487 = vrot.lane.b32.xlu1 %v1469_v59, %s4945_s18 }
 0x273   : > { %1489 = vrot.lane.b32.xlu0 %v1470_v58, %s4945_s18 }
 0x276   : > { %1491 = vrot.lane.b32.xlu1 %v1471_v14, %s4945_s18 }
 0x277   : > { %1493 = vrot.lane.b32.xlu0 %v1472_v50, %s4945_s18 }
 0x27a   : > { %1495 = vrot.lane.b32.xlu1 %v1473_v56, %s4945_s18  ;;  %v1169_v56 = vstv %s4013_s21  ;;  %s4371_s21 = spop %2954 }
 0x27b   : > { %1497 = vrot.lane.b32.xlu0 %v1474_v36, %s4945_s18  ;;  %v1183_v36 = vmul.f32 %v1169_v56, %v4027_v55 }
 0x27e   : > { %1595 = vrot.lane.b32.xlu1 %v1579_v25, %s4942_s19 }
 0x27f   : > { %1597 = vrot.lane.b32.xlu0 %v1580_v63, %s4942_s19  ;;  %v1184_v63 = vmul.f32 %v1169_v56, %v4030_v37 }
 0x282   : > { %1599 = vrot.lane.b32.xlu1 %v1581_v34, %s4942_s19  ;;  %v1173_v34 = vstv %s4017_s11  ;;  %s4373_s11 = spop %2956 }
 0x283   : > { %1601 = vrot.lane.b32.xlu0 %v1582_v5, %s4942_s19  ;;  %v1185_v5 = vmul.f32 %v1173_v34, %v4037_v19  ;;  %v1186_v3 = vmul.f32 %v1173_v34, %v4040_v57  ;;  %v1187_v19 = vmul.f32 %v1177_v32, %v4047_v53  ;;  %v1188_v57 = vmul.f32 %v1177_v32, %v4049_v29  ;;  %s4375_s23 = spop %2958 }
 0x284   : > { %v1368_v29 = vmul.f32 %v1357_v13, %v4104_v28 }
 0x286   : > { %1603 = vrot.lane.b32.xlu1 %v1583_v16, %s4942_s19 }
 0x287   : > { %1605 = vrot.lane.b32.xlu0 %v1584_v60, %s4942_s19 }
 0x28a   : > { %1607 = vrot.lane.b32.xlu1 %v1585_v45, %s4942_s19  ;;  %v1353_v45 = vstv %s4073_s17 }
 0x28b   : > { %1609 = vrot.lane.b32.xlu0 %v1586_v20, %s4942_s19  ;;  %v1364_v20 = vmul.f32 %v1349_v52, %v4088_v26  ;;  %v1365_v7 = vmul.f32 %v1353_v45, %v4093_v6  ;;  %v1366_v26 = vmul.f32 %v1353_v45, %v4096_v15  ;;  %v1367_v52 = vmul.f32 %v1357_v13, %v4101_v8 }
 0x28e   : > { %1663 = vrot.lane.b32.xlu1 %v1647_v27, %s4945_s18 }
 0x28f   : > { %1665 = vrot.lane.b32.xlu0 %v1648_v44, %s4945_s18 }
 0x292   : > { %1667 = vrot.lane.b32.xlu1 %v1649_v46, %s4945_s18 }
 0x293   : > { %1669 = vrot.lane.b32.xlu0 %v1650_v0, %s4945_s18 }
 0x296   : > { %1671 = vrot.lane.b32.xlu1 %v1651_v38, %s4945_s18 }
 0x297   : > { %1673 = vrot.lane.b32.xlu0 %v1652_v40, %s4945_s18 }
 0x29a   : > { %1675 = vrot.lane.b32.xlu1 %v1653_v35, %s4945_s18 }
 0x29b   : > { %1677 = vrot.lane.b32.xlu0 %v1654_v12, %s4945_s18 }
 0x29e   : > { %2021 = vrot.lane.b32.xlu1 %v3986_v23, %s4943_s2 }
 0x29f   : > { %2023 = vrot.lane.b32.xlu0 %v3991_v18, %s4943_s2 }
 0x2a2   : > { %2025 = vrot.lane.b32.xlu1 %v3996_v21, %s4943_s2 }
 0x2a3   : > { %2027 = vrot.lane.b32.xlu0 %v4002_v47, %s4943_s2 }
 0x2a6   : > { %2089 = vrot.lane.b32.xlu1 %v3986_v23, %s4942_s19 }
 0x2a7   : > { %2091 = vrot.lane.b32.xlu0 %v3991_v18, %s4942_s19 }
 0x2b0   : > { %v1236_v59 = vpop.permute.xlu1 %1235 }
 0x2b1   : > { %v1238_v58 = vpop.permute.xlu0 %1237  ;;  %v1259_v23 = vadd.f32 %v1236_v59, %v1183_v36  ;;  %v1181_v59 = vstv %s4023_s10  ;;  %s4377_s10 = spop %2960 }
 0x2b2   : > { %v1260_v62 = vadd.f32 %v1238_v58, %v1184_v63  ;;  %v1189_v56 = vmul.f32 %v1181_v59, %v4055_v31  ;;  %v1361_v63 = vstv %s4081_s1  ;;  %v1190_v6 = vmul.f32 %v1181_v59, %v4057_v41 }
 0x2b3   : > { %v1369_v31 = vmul.f32 %v1361_v63, %v4109_v30 }
 0x2b4   : > { %v1240_v4 = vpop.permute.xlu1 %1239 }
 0x2b5   : > { %v1242_v14 = vpop.permute.xlu0 %1241  ;;  %v1261_v27 = vadd.f32 %v1240_v4, %v1185_v5 }
 0x2b6   : > { %v1262_v44 = vadd.f32 %v1242_v14, %v1186_v3 }
 0x2b8   : > { %v1244_v50 = vpop.permute.xlu1 %1243 }
 0x2b9   : > { %v1246_v2 = vpop.permute.xlu0 %1245  ;;  %v1263_v35 = vadd.f32 %v1244_v50, %v1187_v19 }
 0x2ba   : > { %v1264_v58 = vadd.f32 %v1246_v2, %v1188_v57 }
 0x2bc   : > { %v1248_v9 = vpop.permute.xlu1 %1247 }
 0x2bd   : > { %v1250_v25 = vpop.permute.xlu0 %1249  ;;  %v1265_v34 = vadd.f32 %v1248_v9, %v1189_v56 }
 0x2be   : > { %v1266_v50 = vadd.f32 %v1250_v25, %v1190_v6  ;;  %v1541_v6 = vstv %s4135_s13 }
 0x2c0   : > { %v1304_v18 = vpop.permute.xlu1 %1303 }
 0x2c1   : > { %v1306_v16 = vpop.permute.xlu0 %1305  ;;  %v1327_v60 = vadd.f32 %v1304_v18, %v1259_v23 }
 0x2c2   : > { %v1328_v55 = vadd.f32 %v1306_v16, %v1260_v62 }
 0x2c3   : > { %v1371_v37 = vadd.f32 %v1363_v43, %v1327_v60  ;;  %v1370_v60 = vmul.f32 %v1361_v63, %v4112_v51 }
 0x2c4   : > { %v1308_v46 = vpop.permute.xlu1 %1307  ;;  %v1372_v54 = vadd.f32 %v1364_v20, %v1328_v55 }
 0x2c5   : > { %v1310_v0 = vpop.permute.xlu0 %1309  ;;  %v1329_v38 = vadd.f32 %v1308_v46, %v1261_v27  ;;  %v1529_v27 = vstv %s4123_s3  ;;  %s4946_s3 = smov 2  }
 0x2c6   : > { %v1330_v40 = vadd.f32 %v1310_v0, %v1262_v44  ;;  %v1543_v51 = vmul.f32 %v1529_v27, %v4141_v17  ;;  %v1533_v0 = vstv %s4127_s30 }
 0x2c7   : > { %v1373_v12 = vadd.f32 %v1365_v7, %v1329_v38  ;;  %v1544_v7 = vmul.f32 %v1529_v27, %v4144_v10  ;;  %v1546_v56 = vmul.f32 %v1533_v0, %v4152_v24 }
 0x2c8   : > { %v1312_v4 = vpop.permute.xlu1 %1311  ;;  %v1374_v14 = vadd.f32 %v1366_v26, %v1330_v40 }
 0x2c9   : > { %v1314_v53 = vpop.permute.xlu0 %1313  ;;  %v1331_v36 = vadd.f32 %v1312_v4, %v1263_v35 }
 0x2ca   : > { %v1332_v23 = vadd.f32 %v1314_v53, %v1264_v58 }
 0x2cb   : > { %v1375_v15 = vadd.f32 %v1367_v52, %v1331_v36 }
 0x2cc   : > { %v1316_v62 = vpop.permute.xlu1 %1315  ;;  %v1376_v18 = vadd.f32 %v1368_v29, %v1332_v23 }
 0x2cd   : > { %v1318_v2 = vpop.permute.xlu0 %1317  ;;  %v1333_v5 = vadd.f32 %v1316_v62, %v1265_v34 }
 0x2ce   : > { %v1334_v16 = vadd.f32 %v1318_v2, %v1266_v50 }
 0x2cf   : > { %v1377_v8 = vadd.f32 %v1369_v31, %v1333_v5  ;;  %v1550_v31 = vmul.f32 %v1541_v6, %v4168_v61 }
 0x2d0   : > { %v1416_v43 = vpop.permute.xlu1 %1415  ;;  %v1378_v41 = vadd.f32 %v1370_v60, %v1334_v16 }
 0x2d1   : > { %v1418_v45 = vpop.permute.xlu0 %1417  ;;  %v1439_v32 = vadd.f32 %v1416_v43, %v1371_v37  ;;  %v1545_v37 = vmul.f32 %v1533_v0, %v4149_v42 }
 0x2d2   : > { %v1440_v44 = vadd.f32 %v1418_v45, %v1372_v54  ;;  %v1537_v54 = vstv %s4131_s4 }
 0x2d3   : > { %v1548_v29 = vmul.f32 %v1537_v54, %v4160_v39 }
 0x2d4   : > { %v1420_v3 = vpop.permute.xlu1 %1419 }
 0x2d5   : > { %v1422_v28 = vpop.permute.xlu0 %1421  ;;  %v1441_v13 = vadd.f32 %v1420_v3, %v1373_v12 }
 0x2d6   : > { %v1442_v40 = vadd.f32 %v1422_v28, %v1374_v14  ;;  %v1547_v14 = vmul.f32 %v1537_v54, %v4157_v22 }
 0x2d8   : > { %v1424_v9 = vpop.permute.xlu1 %1423 }
 0x2d9   : > { %v1426_v55 = vpop.permute.xlu0 %1425  ;;  %v1443_v53 = vadd.f32 %v1424_v9, %v1375_v15  ;;  %v1549_v15 = vmul.f32 %v1541_v6, %v4165_v11 }
 0x2da   : > { %v1444_v36 = vadd.f32 %v1426_v55, %v1376_v18 }
 0x2dc   : > { %v1428_v25 = vpop.permute.xlu1 %1427 }
 0x2dd   : > { %v1430_v20 = vpop.permute.xlu0 %1429  ;;  %v1445_v34 = vadd.f32 %v1428_v25, %v1377_v8 }
 0x2de   : > { %v1446_v42 = vadd.f32 %v1430_v20, %v1378_v41 }
 0x2e0   : > { %v1484_v46 = vpop.permute.xlu1 %1483 }
 0x2e1   : > { %v1486_v30 = vpop.permute.xlu0 %1485  ;;  %v1507_v19 = vadd.f32 %v1484_v46, %v1439_v32 }
 0x2e2   : > { %v1508_v38 = vadd.f32 %v1486_v30, %v1440_v44 }
 0x2e3   : > { %v1551_v57 = vadd.f32 %v1543_v51, %v1507_v19 }
 0x2e4   : > { %v1488_v26 = vpop.permute.xlu1 %1487  ;;  %v1552_v35 = vadd.f32 %v1544_v7, %v1508_v38 }
 0x2e5   : > { %v1490_v59 = vpop.permute.xlu0 %1489  ;;  %v1509_v58 = vadd.f32 %v1488_v26, %v1441_v13 }
 0x2e6   : > { %v1510_v4 = vadd.f32 %v1490_v59, %v1442_v40 }
 0x2e7   : > { %v1553_v17 = vadd.f32 %v1545_v37, %v1509_v58 }
 0x2e8   : > { %v1492_v52 = vpop.permute.xlu1 %1491  ;;  %v1554_v63 = vadd.f32 %v1546_v56, %v1510_v4 }
 0x2e9   : > { %v1494_v10 = vpop.permute.xlu0 %1493  ;;  %v1511_v12 = vadd.f32 %v1492_v52, %v1443_v53 }
 0x2ea   : > { %v1512_v23 = vadd.f32 %v1494_v10, %v1444_v36 }
 0x2eb   : > { %v1555_v50 = vadd.f32 %v1547_v14, %v1511_v12 }
 0x2ec   : > { %v1496_v62 = vpop.permute.xlu1 %1495  ;;  %v1556_v2 = vadd.f32 %v1548_v29, %v1512_v23 }
 0x2ed   : > { %v1498_v5 = vpop.permute.xlu0 %1497  ;;  %v1513_v24 = vadd.f32 %v1496_v62, %v1445_v34  ;;  %v4302_v62 = vld [vmem:[%s4910_s5 + $0x1] sm:$0x1] }
 0x2ee   : > { %v1514_v18 = vadd.f32 %v1498_v5, %v1446_v42  ;;  %v4321_v5 = vld [vmem:[%s4910_s5 + $0xd] sm:$0x1] }
 0x2ef   : > { %v1557_v16 = vadd.f32 %v1549_v15, %v1513_v24  ;;  %v4338_v24 = vld [vmem:[%s4910_s5 + $0x2] sm:$0x1]  ;;  %v4343_v15 = vld [vmem:[%s4910_s5 + $0x6] sm:$0x1] }
 0x2f0   : > { %v1596_v60 = vpop.permute.xlu1 %1595  ;;  %v1558_v43 = vadd.f32 %v1550_v31, %v1514_v18  ;;  %v4352_v18 = vld [vmem:[%s4910_s5 + $0xa] sm:$0x1]  ;;  %v4357_v31 = vld [vmem:[%s4910_s5 + $0xe] sm:$0x1] }
 0x2f1   : > { %v1598_v22 = vpop.permute.xlu0 %1597  ;;  %v1619_v41 = vadd.f32 %v1596_v60, %v1551_v57  ;;  %v4381_v60 = vld [vmem:[#allocation2 + $0x8] sm:$0xff] }
 0x2f2   : > { %v1620_v55 = vadd.f32 %v1598_v22, %v1552_v35 }
 0x2f4   : > { %v1600_v45 = vpop.permute.xlu1 %1599 }
 0x2f5   : > { %v1602_v3 = vpop.permute.xlu0 %1601  ;;  %v1621_v11 = vadd.f32 %v1600_v45, %v1553_v17 }
 0x2f6   : > { %v1622_v61 = vadd.f32 %v1602_v3, %v1554_v63 }
 0x2f8   : > { %v1604_v28 = vpop.permute.xlu1 %1603 }
 0x2f9   : > { %v1606_v39 = vpop.permute.xlu0 %1605  ;;  %v1623_v13 = vadd.f32 %v1604_v28, %v1555_v50  ;;  %v4387_v28 = vld [vmem:[#allocation2 + $0x18] sm:$0xff] }
 0x2fa   : > { %v1624_v40 = vadd.f32 %v1606_v39, %v1556_v2  ;;  %v4307_v2 = vld [vmem:[%s4910_s5 + $0x5] sm:$0x1] }
 0x2fb   : > { %v4389_v39 = vld [vmem:[#allocation2 + $0x20] sm:$0xff] }
 0x2fc   : > { %v1608_v8 = vpop.permute.xlu1 %1607 }
 0x2fd   : > { %v1610_v9 = vpop.permute.xlu0 %1609  ;;  %v1625_v4 = vadd.f32 %v1608_v8, %v1557_v16  ;;  %v4379_v16 = vld [vmem:[#allocation2] sm:$0xff] }
 0x300   : > { %v1664_v25 = vpop.permute.xlu1 %1663 }
 0x301   : > { %v1666_v20 = vpop.permute.xlu0 %1665  ;;  %v1687_v27 = vadd.f32 %v1664_v25, %v1619_v41 }
 0x302   : > { %v1688_v32 = vadd.f32 %v1666_v20, %v1620_v55  ;;  %v4395_v55 = vld [vmem:[#allocation2 + $0x30] sm:$0xff]  ;;  %v4398_v20 = vld [vmem:[#allocation2 + $0x38] sm:$0xff] }
 0x303   : > { %v4240_v44 = vadd.f32 %v4007_v48, %v1687_v27 }
 0x304   : > { %v4243_v46 = vadd.f32 %v4007_v48, %v1688_v32  ;;  %v1668_v30 = vpop.permute.xlu1 %1667 }
 0x305   : > { %v1743_v19 = vmax.f32 %v4240_v44, 0.0  ;;  %v1670_v51 = vpop.permute.xlu0 %1669  ;;  %v1689_v0 = vadd.f32 %v1668_v30, %v1621_v11  ;;  %v4403_v11 = vld [vmem:[#allocation2 + $0x48] sm:$0xff]  ;;  %v4406_v30 = vld [vmem:[#allocation2 + $0x50] sm:$0xff] }
 0x306   : > { %v1744_v38 = vmax.f32 %v4243_v46, 0.0  ;;  %v1690_v7 = vadd.f32 %v1670_v51, %v1622_v61 }
 0x307   : > { %v4248_v57 = vadd.f32 %v4009_v33, %v1689_v0  ;;  %1803 = vrot.lane.b32.xlu1 %v1743_v19, %s4946_s3 }
 0x308   : > { %v4254_v48 = vadd.f32 %v4009_v33, %v1690_v7  ;;  %1805 = vrot.lane.b32.xlu0 %v1744_v38, %s4946_s3  ;;  %v1672_v26 = vpop.permute.xlu1 %1671  ;;  %v1626_v33 = vadd.f32 %v1610_v9, %v1558_v43 }
 0x309   : > { %v1745_v35 = vmax.f32 %v4248_v57, 0.0  ;;  %v1674_v59 = vpop.permute.xlu0 %1673  ;;  %v1691_v58 = vadd.f32 %v1672_v26, %v1623_v13 }
 0x30a   : > { %v1746_v37 = vmax.f32 %v4254_v48, 0.0  ;;  %v1692_v54 = vadd.f32 %v1674_v59, %v1624_v40 }
 0x30b   : > { %v4262_v56 = vadd.f32 %v4011_v49, %v1691_v58  ;;  %1807 = vrot.lane.b32.xlu1 %v1745_v35, %s4946_s3 }
 0x30c   : > { %v4268_v53 = vadd.f32 %v4011_v49, %v1692_v54  ;;  %1809 = vrot.lane.b32.xlu0 %v1746_v37, %s4946_s3  ;;  %v1676_v17 = vpop.permute.xlu1 %1675 }
 0x30d   : > { %v1747_v36 = vmax.f32 %v4262_v56, 0.0  ;;  %v1678_v52 = vpop.permute.xlu0 %1677  ;;  %v1693_v63 = vadd.f32 %v1676_v17, %v1625_v4 }
 0x30e   : > { %v1748_v10 = vmax.f32 %v4268_v53, 0.0  ;;  %v1694_v12 = vadd.f32 %v1678_v52, %v1626_v33 }
 0x30f   : > { %v4276_v14 = vadd.f32 %v4015_v1, %v1693_v63  ;;  %1811 = vrot.lane.b32.xlu1 %v1747_v36, %s4946_s3 }
 0x310   : > { %1813 = vrot.lane.b32.xlu0 %v1748_v10, %s4946_s3  ;;  %v2022_v49 = vpop.permute.xlu1 %2021  ;;  %v4286_v29 = vadd.f32 %v4015_v1, %v1694_v12 }
 0x311   : > { %v4925_v6 = vmax.f32 %v4276_v14, 0.0  ;;  %v2024_v23 = vpop.permute.xlu0 %2023  ;;  %2962 = vpush %v2022_v49 }
 0x312   : > { %2964 = vpush %v2024_v23  ;;  %v4924_v42 = vmax.f32 %v4286_v29, 0.0 }
 0x313   : > { %1815 = vrot.lane.b32.xlu1 %v4925_v6, %s4946_s3 }
 0x314   : > { %2095 = vrot.lane.b32.xlu0 %v4002_v47, %s4942_s19  ;;  %v2026_v34 = vpop.permute.xlu1 %2025 }
 0x315   : > { %v2028_v50 = vpop.permute.xlu0 %2027  ;;  %2966 = vpush %v2026_v34 }
 0x316   : > { %2968 = vpush %v2028_v50 }
 0x317   : > { %2093 = vrot.lane.b32.xlu1 %v3996_v21, %s4942_s19  ;;  %v4316_v21 = vld [vmem:[%s4910_s5 + $0x9] sm:$0x1] }
 0x318   : > { %1817 = vrot.lane.b32.xlu0 %v4924_v42, %s4946_s3  ;;  %v2090_v1 = vpop.permute.xlu1 %2089 }
 0x319   : > { %v2092_v47 = vpop.permute.xlu0 %2091  ;;  %2970 = vpush %v2090_v1 }
 0x31a   : > { %2972 = vpush %v2092_v47 }
 0x31b   : > { %2201 = vrot.lane.b32.xlu1 %v4302_v62, %s4943_s2 }
 0x31c   : > { %2203 = vrot.lane.b32.xlu0 %v4307_v2, %s4943_s2 }
 0x31f   : > { %2205 = vrot.lane.b32.xlu1 %v4316_v21, %s4943_s2 }
 0x320   : > { %2207 = vrot.lane.b32.xlu0 %v4321_v5, %s4943_s2 }
 0x323   : > { %2269 = vrot.lane.b32.xlu1 %v4302_v62, %s4942_s19 }
 0x324   : > { %2271 = vrot.lane.b32.xlu0 %v4307_v2, %s4942_s19 }
 0x327   : > { %2273 = vrot.lane.b32.xlu1 %v4316_v21, %s4942_s19 }
 0x328   : > { %2275 = vrot.lane.b32.xlu0 %v4321_v5, %s4942_s19 }
 0x32b   : > { %2381 = vrot.lane.b32.xlu1 %v4338_v24, %s4943_s2 }
 0x32c   : > { %2383 = vrot.lane.b32.xlu0 %v4343_v15, %s4943_s2 }
 0x32f   : > { %2385 = vrot.lane.b32.xlu1 %v4352_v18, %s4943_s2 }
 0x330   : > { %2387 = vrot.lane.b32.xlu0 %v4357_v31, %s4943_s2 }
 0x333   : > { %2449 = vrot.lane.b32.xlu1 %v4338_v24, %s4942_s19 }
 0x334   : > { %2451 = vrot.lane.b32.xlu0 %v4343_v15, %s4942_s19 }
 0x337   : > { %2453 = vrot.lane.b32.xlu1 %v4352_v18, %s4942_s19 }
 0x338   : > { %2455 = vrot.lane.b32.xlu0 %v4357_v31, %s4942_s19 }
 0x342   : > { %s2963_s12 = spop %2962 }
 0x343   : > { %v2030_v43 = vstv %s2963_s12  ;;  %s2965_s17 = spop %2964 }
 0x344   : > { %v2041_v22 = vmul.f32 %v2030_v43, %v4379_v16  ;;  %v2042_v45 = vmul.f32 %v2030_v43, %v4381_v60  ;;  %v2033_v3 = vstv %s2965_s17 }
 0x345   : > { %v2043_v8 = vmul.f32 %v2033_v3, %v4387_v28  ;;  %v2044_v9 = vmul.f32 %v2033_v3, %v4389_v39 }
 0x346   : > { %2059 = vrot.lane.b32.xlu0 %v2042_v45, %s4943_s2  ;;  %2057 = vrot.lane.b32.xlu1 %v2041_v22, %s4943_s2  ;;  %s2967_s0 = spop %2966 }
 0x347   : > { %v2036_v41 = vstv %s2967_s0  ;;  %s2969_s1 = spop %2968 }
 0x348   : > { %v2045_v25 = vmul.f32 %v4395_v55, %v2036_v41  ;;  %v2046_v27 = vmul.f32 %v4398_v20, %v2036_v41  ;;  %v2039_v32 = vstv %s2969_s1 }
 0x349   : > { %v2047_v61 = vmul.f32 %v4403_v11, %v2039_v32  ;;  %v2048_v51 = vmul.f32 %v4406_v30, %v2039_v32 }
 0x34a   : > { %2063 = vrot.lane.b32.xlu0 %v2044_v9, %s4943_s2  ;;  %2061 = vrot.lane.b32.xlu1 %v2043_v8, %s4943_s2  ;;  %s2971_s18 = spop %2970 }
 0x34b   : > { %v2098_v49 = vstv %s2971_s18  ;;  %s2973_s30 = spop %2972 }
 0x34c   : > { %v2110_v50 = vmul.f32 %v2098_v49, %v4381_v60  ;;  %v2109_v22 = vmul.f32 %v2098_v49, %v4379_v16 }
 0x34e   : > { %2067 = vrot.lane.b32.xlu0 %v2046_v27, %s4943_s2  ;;  %2065 = vrot.lane.b32.xlu1 %v2045_v25, %s4943_s2 }
 0x352   : > { %2071 = vrot.lane.b32.xlu0 %v2048_v51, %s4943_s2  ;;  %2069 = vrot.lane.b32.xlu1 %v2047_v61, %s4943_s2 }
 0x379   : > { %v1804_v0 = vpop.permute.xlu1 %1803 }
 0x37a   : > { %v1806_v7 = vpop.permute.xlu0 %1805  ;;  %1827 = vst.msk [vmem:[#allocation3 + $0x2] sm:$0xff] %vm1146_vm5, %v1804_v0 }
 0x37b   : > { %1828 = vst.msk [vmem:[#allocation3 + $0xa] sm:$0xff] %vm1146_vm5, %v1806_v7 }
 0x37d   : > { %v1808_v13 = vpop.permute.xlu1 %1807 }
 0x37e   : > { %v1810_v40 = vpop.permute.xlu0 %1809  ;;  %1829 = vst.msk [vmem:[#allocation3 + $0x1a] sm:$0xff] %vm1146_vm5, %v1808_v13 }
 0x37f   : > { %1830 = vst.msk [vmem:[#allocation3 + $0x22] sm:$0xff] %vm1146_vm5, %v1810_v40  ;;  %v1995_v40 = vstv %s4373_s11 }
 0x381   : > { %v1812_v26 = vpop.permute.xlu1 %1811  ;;  %v1835_v59 = vld [vmem:[#allocation3 + $0x1] sm:$0xff] }
 0x382   : > { %v1814_v58 = vpop.permute.xlu0 %1813  ;;  %1831 = vst.msk [vmem:[#allocation3 + $0x32] sm:$0xff] %vm1146_vm5, %v1812_v26  ;;  %v1836_v54 = vld [vmem:[#allocation3 + $0x9] sm:$0xff]  ;;  %1855 = vrot.lane.b32.xlu1 %v1835_v59, %s4942_s19 }
 0x383   : > { %1832 = vst.msk [vmem:[#allocation3 + $0x3a] sm:$0xff] %vm1146_vm5, %v1814_v58  ;;  %1857 = vrot.lane.b32.xlu0 %v1836_v54, %s4942_s19 }
 0x385   : > { %v1816_v4 = vpop.permute.xlu1 %1815  ;;  %v1837_v33 = vld [vmem:[#allocation3 + $0x19] sm:$0xff] }
 0x386   : > { %v2096_v17 = vpop.permute.xlu0 %2095  ;;  %1833 = vst.msk [vmem:[#allocation3 + $0x4a] sm:$0xff] %vm1146_vm5, %v1816_v4  ;;  %v1838_v52 = vld [vmem:[#allocation3 + $0x21] sm:$0xff]  ;;  %1859 = vrot.lane.b32.xlu1 %v1837_v33, %s4942_s19  ;;  %v2008_v4 = vmul.f32 %v1995_v40, %v4389_v39  ;;  %v1999_v33 = vstv %s4375_s23 }
 0x387   : > { %1861 = vrot.lane.b32.xlu0 %v1838_v52, %s4942_s19 }
 0x389   : > { %v2094_v63 = vpop.permute.xlu1 %2093  ;;  %v1839_v12 = vld [vmem:[#allocation3 + $0x31] sm:$0xff] }
 0x38a   : > { %v1818_v23 = vpop.permute.xlu0 %1817  ;;  %v1840_v34 = vld [vmem:[#allocation3 + $0x39] sm:$0xff]  ;;  %1863 = vrot.lane.b32.xlu1 %v1839_v12, %s4942_s19  ;;  %2974 = vpush %v2094_v63 }
 0x38b   : > { %1834 = vst.msk [vmem:[#allocation3 + $0x52] sm:$0xff] %vm1146_vm5, %v1818_v23  ;;  %1865 = vrot.lane.b32.xlu0 %v1840_v34, %s4942_s19  ;;  %v2009_v34 = vmul.f32 %v4395_v55, %v1999_v33 }
 0x38c   : > { %2976 = vpush %v2096_v17  ;;  %v2007_v17 = vmul.f32 %v1995_v40, %v4387_v28 }
 0x38d   : > { %2978 = vpush %v4302_v62  ;;  %v2202_v1 = vpop.permute.xlu1 %2201  ;;  %v1841_v47 = vld [vmem:[#allocation3 + $0x49] sm:$0xff]  ;;  %v2101_v62 = vstv %s2973_s30 }
 0x38e   : > { %2980 = vpush %v4307_v2  ;;  %v2204_v43 = vpop.permute.xlu0 %2203  ;;  %1867 = vrot.lane.b32.xlu1 %v1841_v47, %s4942_s19 }
 0x38f   : > { %2982 = vpush %v4316_v21  ;;  %2127 = vrot.lane.b32.xlu0 %v2110_v50, %s4942_s19  ;;  %v2111_v21 = vmul.f32 %v2101_v62, %v4387_v28  ;;  %v4460_v50 = vld [vmem:[#allocation2 + $0x1] sm:$0xff] }
 0x390   : > { %2984 = vpush %v4321_v5  ;;  %v2112_v5 = vmul.f32 %v2101_v62, %v4389_v39  ;;  %v2010_v39 = vmul.f32 %v4398_v20, %v1999_v33 }
 0x391   : > { %2986 = vpush %v2202_v1  ;;  %v2206_v45 = vpop.permute.xlu1 %2205  ;;  %v4462_v1 = vld [vmem:[#allocation2 + $0x9] sm:$0xff] }
 0x392   : > { %2988 = vpush %v2204_v43  ;;  %v2208_v3 = vpop.permute.xlu0 %2207  ;;  %v1842_v2 = vld [vmem:[#allocation3 + $0x51] sm:$0xff]  ;;  %2125 = vrot.lane.b32.xlu1 %v2109_v22, %s4942_s19 }
 0x393   : > { %2990 = vpush %v2206_v45  ;;  %1869 = vrot.lane.b32.xlu0 %v1842_v2, %s4942_s19  ;;  %v4473_v45 = vld [vmem:[#allocation2 + $0x19] sm:$0xff] }
 0x394   : > { %2992 = vpush %v2208_v3 }
 0x395   : > { %v2270_v8 = vpop.permute.xlu1 %2269 }
 0x396   : > { %v2272_v9 = vpop.permute.xlu0 %2271  ;;  %2129 = vrot.lane.b32.xlu1 %v2111_v21, %s4942_s19  ;;  %2994 = vpush %v2270_v8  ;;  %v4488_v8 = vld [vmem:[#allocation2 + $0x39] sm:$0xff] }
 0x397   : > { %2131 = vrot.lane.b32.xlu0 %v2112_v5, %s4942_s19  ;;  %2996 = vpush %v2272_v9  ;;  %v4486_v5 = vld [vmem:[#allocation2 + $0x31] sm:$0xff] }
 0x399   : > { %v2274_v41 = vpop.permute.xlu1 %2273 }
 0x39a   : > { %v2276_v25 = vpop.permute.xlu0 %2275  ;;  %2998 = vpush %v2274_v41 }
 0x39b   : > { %3000 = vpush %v2276_v25 }
 0x39c   : > { %3002 = vpush %v4338_v24 }
 0x39d   : > { %3004 = vpush %v4343_v15  ;;  %v2382_v27 = vpop.permute.xlu1 %2381 }
 0x39e   : > { %3006 = vpush %v4352_v18  ;;  %v2384_v32 = vpop.permute.xlu0 %2383  ;;  %v1991_v18 = vstv %s4371_s21 }
 0x39f   : > { %3008 = vpush %v4357_v31  ;;  %v2005_v13 = vmul.f32 %v1991_v18, %v4379_v16  ;;  %v2006_v31 = vmul.f32 %v1991_v18, %v4381_v60 }
 0x3a0   : > { %3010 = vpush %v2382_v27 }
 0x3a1   : > { %3012 = vpush %v2384_v32  ;;  %v2386_v61 = vpop.permute.xlu1 %2385 }
 0x3a2   : > { %v2388_v51 = vpop.permute.xlu0 %2387  ;;  %3014 = vpush %v2386_v61  ;;  %v4496_v61 = vld [vmem:[#allocation2 + $0x49] sm:$0xff] }
 0x3a3   : > { %3016 = vpush %v2388_v51  ;;  %v4498_v51 = vld [vmem:[#allocation2 + $0x51] sm:$0xff] }
 0x3a5   : > { %v2450_v0 = vpop.permute.xlu1 %2449 }
 0x3a6   : > { %v2452_v7 = vpop.permute.xlu0 %2451  ;;  %3018 = vpush %v2450_v0 }
 0x3a7   : > { %3020 = vpush %v2452_v7 }
 0x3a9   : > { %v2454_v24 = vpop.permute.xlu1 %2453 }
 0x3aa   : > { %v2456_v15 = vpop.permute.xlu0 %2455  ;;  %3022 = vpush %v2454_v24 }
 0x3ab   : > { %3024 = vpush %v2456_v15 }
 0x3b8   : > { %v2060_v26 = vpop.permute.xlu0 %2059  ;;  %v2058_v59 = vpop.permute.xlu1 %2057 }
 0x3b9   : > { %v4447_v58 = vadd.f32 %v2060_v26, %v2006_v31  ;;  %v4449_v54 = vadd.f32 %v2058_v59, %v2005_v13 }
 0x3bb   : > { %s2975_s13 = spop %2974 }
 0x3bc   : > { %v2104_v52 = vstv %s2975_s13  ;;  %v2064_v63 = vpop.permute.xlu0 %2063  ;;  %v2062_v12 = vpop.permute.xlu1 %2061 }
 0x3bd   : > { %s2977_s9 = spop %2976  ;;  %v2113_v16 = vmul.f32 %v4395_v55, %v2104_v52  ;;  %v2114_v60 = vmul.f32 %v4398_v20, %v2104_v52  ;;  %v4456_v23 = vadd.f32 %v2064_v63, %v2008_v4  ;;  %v4464_v47 = vadd.f32 %v2062_v12, %v2007_v17  ;;  %v4475_v55 = vld [vmem:[#allocation2 + $0x21] sm:$0xff] }
 0x3be   : > { %v2107_v49 = vstv %s2977_s9  ;;  %s2979_s8 = spop %2978  ;;  %v4533_v12 = vld [vmem:[#allocation2 + $0x2] sm:$0xff] }
 0x3bf   : > { %v2171_v28 = vstv %s2979_s8  ;;  %s2981_s22 = spop %2980  ;;  %v2115_v43 = vmul.f32 %v4403_v11, %v2107_v49  ;;  %2135 = vrot.lane.b32.xlu0 %v2114_v60, %s4942_s19  ;;  %2133 = vrot.lane.b32.xlu1 %v2113_v16, %s4942_s19  ;;  %v2116_v3 = vmul.f32 %v4406_v30, %v2107_v49  ;;  %v4535_v16 = vld [vmem:[#allocation2 + $0xa] sm:$0xff] }
 0x3c0   : > { %v4468_v22 = vmul.f32 %v2171_v28, %v4460_v50  ;;  %v4471_v62 = vmul.f32 %v2171_v28, %v4462_v1  ;;  %v2175_v20 = vstv %s2981_s22  ;;  %s2983_s4 = spop %2982  ;;  %v2068_v41 = vpop.permute.xlu0 %2067  ;;  %v2066_v25 = vpop.permute.xlu1 %2065  ;;  %v4545_v28 = vld [vmem:[#allocation2 + $0x22] sm:$0xff] }
 0x3c1   : > { %v4481_v2 = vmul.f32 %v2175_v20, %v4473_v45  ;;  %v4484_v21 = vmul.f32 %v2175_v20, %v4475_v55  ;;  %v2179_v9 = vstv %s2983_s4  ;;  %s2985_s21 = spop %2984  ;;  %v4500_v7 = vadd.f32 %v2068_v41, %v2010_v39  ;;  %v4543_v39 = vld [vmem:[#allocation2 + $0x1a] sm:$0xff]  ;;  %v4556_v41 = vld [vmem:[#allocation2 + $0x32] sm:$0xff]  ;;  %s2809_s4 = sshll.u32 %s3209_s27, 10 }
 0x3c2   : > { %v4491_v27 = vmul.f32 %v2179_v9, %v4486_v5  ;;  %v4494_v32 = vmul.f32 %v2179_v9, %v4488_v8  ;;  %v2183_v0 = vstv %s2985_s21  ;;  %s2987_s11 = spop %2986  ;;  %v4508_v13 = vadd.f32 %v2066_v25, %v2009_v34  ;;  %v4558_v25 = vld [vmem:[#allocation2 + $0x3a] sm:$0xff]  ;;  %s2591_s27 = scalar_lea.sflag [#allocation6], %s3384_s20 }
 0x3c3   : > { %v4503_v24 = vmul.f32 %v2183_v0, %v4496_v61  ;;  %v4506_v15 = vmul.f32 %v2183_v0, %v4498_v51  ;;  %v2210_v18 = vstv %s2987_s11  ;;  %s2989_s23 = spop %2988  ;;  %2139 = vrot.lane.b32.xlu0 %v2116_v3, %s4942_s19  ;;  %2137 = vrot.lane.b32.xlu1 %v2115_v43, %s4942_s19 }
 0x3c4   : > { %v2221_v31 = vmul.f32 %v2210_v18, %v4460_v50  ;;  %v2222_v40 = vmul.f32 %v2210_v18, %v4462_v1  ;;  %s2991_s12 = spop %2990  ;;  %v2213_v26 = vstv %s2989_s23 }
 0x3c5   : > { %s4514_s17 = spop %2992  ;;  %v2223_v59 = vmul.f32 %v2213_v26, %v4473_v45  ;;  %v2224_v4 = vmul.f32 %v2213_v26, %v4475_v55  ;;  %v2216_v33 = vstv %s2991_s12  ;;  %v4567_v26 = vld [vmem:[#allocation2 + $0x4a] sm:$0xff] }
 0x3c6   : > { %v2225_v17 = vmul.f32 %v2216_v33, %v4486_v5  ;;  %v2226_v52 = vmul.f32 %v2216_v33, %v4488_v8  ;;  %v2219_v63 = vstv %s4514_s17  ;;  %s3229_s17 = smov [#allocation7]  }
 0x3c7   : > { %2239 = vrot.lane.b32.xlu0 %v2222_v40, %s4943_s2  ;;  %2237 = vrot.lane.b32.xlu1 %v2221_v31, %s4943_s2  ;;  %s4518_s0 = spop %2994  ;;  %v2227_v20 = vmul.f32 %v2219_v63, %v4496_v61  ;;  %v2228_v18 = vmul.f32 %v2219_v63, %v4498_v51 }
 0x3c8   : > { %s4522_s1 = spop %2996  ;;  %v2278_v33 = vstv %s4518_s0  ;;  %s3139_s0 = sshll.u32 %s3229_s17, 4  ;;  %s3140_s0 = int_to_ptr.vmem [resolvable:$false] %s3139_s0 }
 0x3c9   : > { %v2289_v63 = vmul.f32 %v2278_v33, %v4460_v50 }
 0x3cb   : > { %2243 = vrot.lane.b32.xlu0 %v2224_v4, %s4943_s2  ;;  %2241 = vrot.lane.b32.xlu1 %v2223_v59, %s4943_s2  ;;  %s4526_s18 = spop %2998  ;;  %v4569_v59 = vld [vmem:[#allocation2 + $0x52] sm:$0xff] }
 0x3cc   : > { %s4528_s30 = spop %3000  ;;  %v2284_v48 = vstv %s4526_s18 }
 0x3cd   : > { %s3003_s13 = spop %3002  ;;  %v2294_v56 = vmul.f32 %v2284_v48, %v4488_v8  ;;  %v2287_v8 = vstv %s4528_s30 }
 0x3ce   : > { %v2351_v60 = vstv %s3003_s13  ;;  %s3005_s9 = spop %3004 }
 0x3cf   : > { %v4538_v49 = vmul.f32 %v2351_v60, %v4533_v12  ;;  %v4541_v34 = vmul.f32 %v2351_v60, %v4535_v16  ;;  %v2355_v43 = vstv %s3005_s9  ;;  %s3007_s8 = spop %3006  ;;  %2247 = vrot.lane.b32.xlu0 %v2226_v52, %s4943_s2  ;;  %2245 = vrot.lane.b32.xlu1 %v2225_v17, %s4943_s2  ;;  %v2290_v60 = vmul.f32 %v2278_v33, %v4462_v1  ;;  %v4590_v1 = vpop.permute.xlu1 %2069  ;;  %v4592_v33 = vpop.permute.xlu0 %2071 }
 0x3d0   : > { %v4551_v3 = vmul.f32 %v2355_v43, %v4543_v39  ;;  %v4554_v9 = vmul.f32 %v2355_v43, %v4545_v28  ;;  %v2359_v0 = vstv %s3007_s8  ;;  %s3009_s22 = spop %3008  ;;  %v2281_v43 = vstv %s4522_s1  ;;  %s3141_s1 = scalar_lea.vmem %s3140_s0, 2048 }
 0x3d1   : > { %v4562_v31 = vmul.f32 %v2359_v0, %v4556_v41  ;;  %v4565_v40 = vmul.f32 %v2359_v0, %v4558_v25  ;;  %v2363_v4 = vstv %s3009_s22  ;;  %v2291_v0 = vmul.f32 %v2281_v43, %v4473_v45  ;;  %s3011_s23 = spop %3010 }
 0x3d2   : > { %v4573_v17 = vmul.f32 %v2363_v4, %v4567_v26  ;;  %v4576_v52 = vmul.f32 %v2363_v4, %v4569_v59  ;;  %v2292_v42 = vmul.f32 %v2281_v43, %v4475_v55  ;;  %s3013_s18 = spop %3012 }
 0x3d3   : > { %2251 = vrot.lane.b32.xlu0 %v2228_v18, %s4943_s2  ;;  %2249 = vrot.lane.b32.xlu1 %v2227_v20, %s4943_s2  ;;  %v1751_v18 = vlaneseq  ;;  %s3015_s30 = spop %3014 }
 0x3d4   : > { %s3017_s13 = spop %3016 }
 0x3d5   : > { %v1752_v20 = vshrl.u32 %v1751_v18, 7 }
 0x3d7   : > { %2307 = vrot.lane.b32.xlu0 %v2290_v60, %s4942_s19  ;;  %2305 = vrot.lane.b32.xlu1 %v2289_v63, %s4942_s19  ;;  %v1753_v4 = vadd.s32 8, %v1752_v20  ;;  %v1758_v50 = vand.u32 1, %v1752_v20  ;;  %v4952_v63 = vmax.f32 %v4286_v29, 0.0  ;;  %s3019_s9 = spop %3018 }
 0x3d8   : > { %s3021_s8 = spop %3020 }
 0x3d9   : > { %v1765_v6 = vand.u32 1, %v1753_v4  ;;  %vm4594_vm6 = vcmp.eq.s32.totalorder %v1758_v50, 0 }
 0x3db   : > { %2311 = vrot.lane.b32.xlu0 %v2292_v42, %s4942_s19  ;;  %2309 = vrot.lane.b32.xlu1 %v2291_v0, %s4942_s19  ;;  %vm4598_vm7 = vcmp.eq.s32.totalorder %v1765_v6, 0  ;;  %s3023_s22 = spop %3022 }
 0x3f4   : > { %v1856_v42 = vpop.permute.xlu1 %1855 }
 0x3f5   : > { %v1858_v55 = vpop.permute.xlu0 %1857  ;;  %v4606_v60 = vsel %vm4594_vm6, %v1743_v19, %v1856_v42 }
 0x3f6   : > { %v4612_v43 = vsel %vm4598_vm7, %v1744_v38, %v1858_v55  ;;  %1895 = vrot.lane.b32.xlu1 %v4606_v60, %s4946_s3 }
 0x3f7   : > { %1897 = vrot.lane.b32.xlu0 %v4612_v43, %s4946_s3 }
 0x3f8   : > { %v1860_v6 = vpop.permute.xlu1 %1859 }
 0x3f9   : > { %v1862_v0 = vpop.permute.xlu0 %1861  ;;  %v4622_v44 = vsel %vm4594_vm6, %v1745_v35, %v1860_v6 }
 0x3fa   : > { %v4628_v46 = vsel %vm4598_vm7, %v1746_v37, %v1862_v0  ;;  %1899 = vrot.lane.b32.xlu1 %v4622_v44, %s4946_s3  ;;  %v2296_v0 = vmul.f32 %v2287_v8, %v4498_v51 }
 0x3fb   : > { %1901 = vrot.lane.b32.xlu0 %v4628_v46, %s4946_s3 }
 0x3fc   : > { %v1864_v19 = vpop.permute.xlu1 %1863 }
 0x3fd   : > { %v1866_v38 = vpop.permute.xlu0 %1865  ;;  %v4638_v57 = vsel %vm4594_vm6, %v1747_v36, %v1864_v19  ;;  %v4951_v36 = vmax.f32 %v4276_v14, 0.0  ;;  %v2799_v19 = vld [vmem:[%s4911_s6] ss:$0 sm:$0xff] }
 0x3fe   : > { %v4645_v35 = vsel %vm4598_vm7, %v1748_v10, %v1866_v38  ;;  %1903 = vrot.lane.b32.xlu1 %v4638_v57, %s4946_s3  ;;  %v2293_v10 = vmul.f32 %v2284_v48, %v4486_v5  ;;  %v2393_v48 = vstv %s3013_s18 }
 0x3ff   : > { %1905 = vrot.lane.b32.xlu0 %v4645_v35, %s4946_s3 }
 0x400   : > { %v1868_v37 = vpop.permute.xlu1 %1867 }
 0x401   : > { %v2128_v20 = vpop.permute.xlu0 %2127  ;;  %v4656_v4 = vsel %vm4594_vm6, %v4951_v36, %v1868_v37  ;;  %v2403_v37 = vmul.f32 %v2393_v48, %v4543_v39 }
 0x402   : > { %v2150_v53 = vadd.f32 %v2128_v20, %v4447_v58  ;;  %1907 = vrot.lane.b32.xlu1 %v4656_v4, %s4946_s3  ;;  %v2396_v20 = vstv %s3015_s30 }
 0x403   : > { %2315 = vrot.lane.b32.xlu0 %v2294_v56, %s4942_s19  ;;  %v2404_v56 = vmul.f32 %v2393_v48, %v4545_v28  ;;  %v2405_v36 = vmul.f32 %v2396_v20, %v4556_v41 }
 0x404   : > { %v2126_v50 = vpop.permute.xlu1 %2125  ;;  %v4664_v42 = vadd.f32 %v4471_v62, %v2150_v53  ;;  %v2295_v62 = vmul.f32 %v2287_v8, %v4496_v61  ;;  %v2800_v61 = vld [vmem:[%s4911_s6 + $0x1] ss:$0 sm:$0xff]  ;;  %v2406_v53 = vmul.f32 %v2396_v20, %v4558_v25 }
 0x405   : > { %v1870_v55 = vpop.permute.xlu0 %1869  ;;  %v2149_v14 = vadd.f32 %v2126_v50, %v4449_v54 }
 0x406   : > { %v4672_v58 = vsel %vm4598_vm7, %v4952_v63, %v1870_v55  ;;  %2313 = vrot.lane.b32.xlu1 %v2293_v10, %s4942_s19  ;;  %v2399_v10 = vstv %s3017_s13  ;;  %v2458_v55 = vstv %s3019_s9 }
 0x407   : > { %1909 = vrot.lane.b32.xlu0 %v4672_v58, %s4946_s3  ;;  %v4678_v5 = vadd.f32 %v4468_v22, %v2149_v14  ;;  %v2407_v50 = vmul.f32 %v2399_v10, %v4567_v26  ;;  %v2408_v8 = vmul.f32 %v2399_v10, %v4569_v59  ;;  %v2469_v14 = vmul.f32 %v2458_v55, %v4533_v12 }
 0x408   : > { %v2130_v6 = vpop.permute.xlu1 %2129  ;;  %v2470_v63 = vmul.f32 %v2458_v55, %v4535_v16 }
 0x409   : > { %v2132_v54 = vpop.permute.xlu0 %2131  ;;  %v2151_v29 = vadd.f32 %v2130_v6, %v4464_v47  ;;  %v2802_v47 = vld [vmem:[%s4911_s6 + $0x3] ss:$0 sm:$0xff] }
 0x40a   : > { %v2152_v45 = vadd.f32 %v2132_v54, %v4456_v23  ;;  %2317 = vrot.lane.b32.xlu1 %v2295_v62, %s4942_s19  ;;  %v2801_v23 = vld [vmem:[%s4911_s6 + $0x2] ss:$0 sm:$0xff]  ;;  %v2461_v62 = vstv %s3021_s8  ;;  %v2464_v54 = vstv %s3023_s22 }
 0x40b   : > { %2319 = vrot.lane.b32.xlu0 %v2296_v0, %s4942_s19  ;;  %v4690_v22 = vadd.f32 %v4481_v2, %v2151_v29  ;;  %v2390_v2 = vstv %s3011_s23  ;;  %v2471_v6 = vmul.f32 %v2461_v62, %v4543_v39  ;;  %v2472_v0 = vmul.f32 %v2461_v62, %v4545_v28  ;;  %s4852_s23 = scalar_lea.hbm %s4912_s7, %s2809_s4 }
 0x40c   : > { %v4696_v51 = vadd.f32 %v4484_v21, %v2152_v45  ;;  %v2401_v38 = vmul.f32 %v2390_v2, %v4533_v12  ;;  %v2402_v21 = vmul.f32 %v2390_v2, %v4535_v16  ;;  %v2473_v29 = vmul.f32 %v2464_v54, %v4556_v41 }
 0x40d   : > { %v2474_v12 = vmul.f32 %v2464_v54, %v4558_v25  ;;  %v2003_v16 = vstv %s4377_s10  ;;  %s3025_s10 = spop %3024 }
 0x40e   : > { %2542 = vperm.xlu1 %3100, %v2799_v19   ;;  %v2011_v39 = vmul.f32 %v4403_v11, %v2003_v16  ;;  %v2012_v28 = vmul.f32 %v4406_v30, %v2003_v16 }
 0x40f   : > { %2546 = vperm.xlu0 %3099, %v2800_v61  }
 0x410   : > { %v2087_v41 = vadd.f32 %v4590_v1, %v2011_v39 }
 0x412   : > { %2550 = vperm.xlu1 %3100, %v2801_v23  }
 0x413   : > { %2554 = vperm.xlu0 %3099, %v2802_v47   ;;  %v2088_v47 = vadd.f32 %v4592_v33, %v2012_v28 }
 0x416   : > { %2417 = vrot.lane.b32.xlu1 %v2401_v38, %s4943_s2 }
 0x417   : > { %2419 = vrot.lane.b32.xlu0 %v2402_v21, %s4943_s2 }
 0x41a   : > { %2421 = vrot.lane.b32.xlu1 %v2403_v37, %s4943_s2 }
 0x41b   : > { %2423 = vrot.lane.b32.xlu0 %v2404_v56, %s4943_s2 }
 0x41e   : > { %2425 = vrot.lane.b32.xlu1 %v2405_v36, %s4943_s2 }
 0x41f   : > { %2427 = vrot.lane.b32.xlu0 %v2406_v53, %s4943_s2 }
 0x422   : > { %2429 = vrot.lane.b32.xlu1 %v2407_v50, %s4943_s2 }
 0x423   : > { %2431 = vrot.lane.b32.xlu0 %v2408_v8, %s4943_s2 }
 0x426   : > { %2485 = vrot.lane.b32.xlu1 %v2469_v14, %s4942_s19 }
 0x427   : > { %2487 = vrot.lane.b32.xlu0 %v2470_v63, %s4942_s19 }
 0x42a   : > { %2489 = vrot.lane.b32.xlu1 %v2471_v6, %s4942_s19 }
 0x42b   : > { %2491 = vrot.lane.b32.xlu0 %v2472_v0, %s4942_s19 }
 0x42e   : > { %2493 = vrot.lane.b32.xlu1 %v2473_v29, %s4942_s19 }
 0x42f   : > { %2495 = vrot.lane.b32.xlu0 %v2474_v12, %s4942_s19 }
 0x431   : > { %v2136_v45 = vpop.permute.xlu0 %2135  ;;  %v2134_v19 = vpop.permute.xlu1 %2133 }
 0x432   : > { %v2154_v61 = vadd.f32 %v2136_v45, %v4500_v7  ;;  %v2153_v23 = vadd.f32 %v2134_v19, %v4508_v13 }
 0x434   : > { %v2198_v25 = vadd.f32 %v4494_v32, %v2154_v61  ;;  %v2197_v2 = vadd.f32 %v4491_v27, %v2153_v23 }
 0x435   : > { %v2140_v38 = vpop.permute.xlu0 %2139  ;;  %v2138_v21 = vpop.permute.xlu1 %2137 }
 0x436   : > { %v2156_v48 = vadd.f32 %v2140_v38, %v2088_v47  ;;  %v2155_v37 = vadd.f32 %v2138_v21, %v2087_v41 }
 0x438   : > { %v2200_v11 = vadd.f32 %v4506_v15, %v2156_v48  ;;  %v2199_v30 = vadd.f32 %v4503_v24, %v2155_v37 }
 0x439   : > { %v2240_v56 = vpop.permute.xlu0 %2239  ;;  %v2238_v7 = vpop.permute.xlu1 %2237 }
 0x43a   : > { %v2262_v13 = vadd.f32 %v2240_v56, %v4664_v42  ;;  %v2261_v33 = vadd.f32 %v2238_v7, %v4678_v5 }
 0x43d   : > { %v2244_v20 = vpop.permute.xlu0 %2243  ;;  %v2242_v1 = vpop.permute.xlu1 %2241 }
 0x43e   : > { %v2264_v32 = vadd.f32 %v2244_v20, %v4696_v51  ;;  %v2263_v27 = vadd.f32 %v2242_v1, %v4690_v22 }
 0x441   : > { %v2248_v36 = vpop.permute.xlu0 %2247  ;;  %v2246_v53 = vpop.permute.xlu1 %2245 }
 0x442   : > { %v2266_v10 = vadd.f32 %v2248_v36, %v2198_v25  ;;  %v2265_v50 = vadd.f32 %v2246_v53, %v2197_v2 }
 0x445   : > { %v2252_v8 = vpop.permute.xlu0 %2251  ;;  %v2250_v15 = vpop.permute.xlu1 %2249 }
 0x446   : > { %v2268_v55 = vadd.f32 %v2252_v8, %v2200_v11  ;;  %v2267_v24 = vadd.f32 %v2250_v15, %v2199_v30  ;;  %v2467_v30 = vstv %s3025_s10 }
 0x447   : > { %v2475_v20 = vmul.f32 %v2467_v30, %v4567_v26 }
 0x449   : > { %v2308_v14 = vpop.permute.xlu0 %2307  ;;  %v2306_v63 = vpop.permute.xlu1 %2305 }
 0x44a   : > { %v2330_v62 = vadd.f32 %v2308_v14, %v2262_v13  ;;  %v2329_v42 = vadd.f32 %v2306_v63, %v2261_v33 }
 0x44c   : > { %v4748_v5 = vadd.f32 %v4541_v34, %v2330_v62  ;;  %v4751_v6 = vadd.f32 %v4538_v49, %v2329_v42 }
 0x44d   : > { %v2312_v51 = vpop.permute.xlu0 %2311  ;;  %v2310_v22 = vpop.permute.xlu1 %2309 }
 0x44e   : > { %v2332_v0 = vadd.f32 %v2312_v51, %v2264_v32  ;;  %v2331_v54 = vadd.f32 %v2310_v22, %v2263_v27 }
 0x450   : > { %v4754_v29 = vadd.f32 %v4554_v9, %v2332_v0  ;;  %v4757_v12 = vadd.f32 %v4551_v3, %v2331_v54 }
 0x468   : > { %v1896_v16 = vpop.permute.xlu1 %1895 }
 0x469   : > { %v1898_v45 = vpop.permute.xlu0 %1897  ;;  %1919 = vst.msk [vmem:[#allocation3 + $0x2] sm:$0xff] %vm1146_vm5, %v1896_v16 }
 0x46a   : > { %1920 = vst.msk [vmem:[#allocation3 + $0xa] sm:$0xff] %vm1146_vm5, %v1898_v45 }
 0x46c   : > { %v1900_v34 = vpop.permute.xlu1 %1899 }
 0x46d   : > { %v1902_v19 = vpop.permute.xlu0 %1901  ;;  %1921 = vst.msk [vmem:[#allocation3 + $0x1a] sm:$0xff] %vm1146_vm5, %v1900_v34 }
 0x46e   : > { %1922 = vst.msk [vmem:[#allocation3 + $0x22] sm:$0xff] %vm1146_vm5, %v1902_v19 }
 0x470   : > { %v1904_v49 = vpop.permute.xlu1 %1903  ;;  %v1927_v39 = vld [vmem:[#allocation3 + $0x2] sm:$0xff] }
 0x471   : > { %v1906_v28 = vpop.permute.xlu0 %1905  ;;  %1923 = vst.msk [vmem:[#allocation3 + $0x32] sm:$0xff] %vm1146_vm5, %v1904_v49  ;;  %v1928_v9 = vld [vmem:[#allocation3 + $0xa] sm:$0xff]  ;;  %1945 = vrot.lane.b32.xlu1 %v1927_v39, %s4943_s2 }
 0x472   : > { %1924 = vst.msk [vmem:[#allocation3 + $0x3a] sm:$0xff] %vm1146_vm5, %v1906_v28  ;;  %1947 = vrot.lane.b32.xlu0 %v1928_v9, %s4943_s2 }
 0x474   : > { %v1908_v3 = vpop.permute.xlu1 %1907  ;;  %v1929_v61 = vld [vmem:[#allocation3 + $0x1a] sm:$0xff] }
 0x475   : > { %v2316_v23 = vpop.permute.xlu0 %2315  ;;  %1925 = vst.msk [vmem:[#allocation3 + $0x4a] sm:$0xff] %vm1146_vm5, %v1908_v3  ;;  %v1930_v47 = vld [vmem:[#allocation3 + $0x22] sm:$0xff]  ;;  %1949 = vrot.lane.b32.xlu1 %v1929_v61, %s4943_s2 }
 0x476   : > { %v2334_v41 = vadd.f32 %v2316_v23, %v2266_v10  ;;  %1951 = vrot.lane.b32.xlu0 %v1930_v47, %s4943_s2 }
 0x478   : > { %v2314_v25 = vpop.permute.xlu1 %2313  ;;  %v1931_v2 = vld [vmem:[#allocation3 + $0x32] sm:$0xff]  ;;  %v2378_v38 = vadd.f32 %v4565_v40, %v2334_v41 }
 0x479   : > { %v1910_v21 = vpop.permute.xlu0 %1909  ;;  %v2333_v48 = vadd.f32 %v2314_v25, %v2265_v50  ;;  %v1932_v37 = vld [vmem:[#allocation3 + $0x3a] sm:$0xff]  ;;  %1953 = vrot.lane.b32.xlu1 %v1931_v2, %s4943_s2 }
 0x47a   : > { %1926 = vst.msk [vmem:[#allocation3 + $0x52] sm:$0xff] %vm1146_vm5, %v1910_v21  ;;  %1955 = vrot.lane.b32.xlu0 %v1932_v37, %s4943_s2 }
 0x47b   : > { %v2377_v11 = vadd.f32 %v4562_v31, %v2333_v48  ;;  %v2476_v31 = vmul.f32 %v2467_v30, %v4569_v59  ;;  %v1781_v59 = vand.u32 127, %v1751_v18 }
 0x47c   : > { %v2318_v56 = vpop.permute.xlu1 %2317  ;;  %v1933_v7 = vld [vmem:[#allocation3 + $0x4a] sm:$0xff] }
 0x47d   : > { %v2320_v13 = vpop.permute.xlu0 %2319  ;;  %v2335_v33 = vadd.f32 %v2318_v56, %v2267_v24  ;;  %1957 = vrot.lane.b32.xlu1 %v1933_v7, %s4943_s2  ;;  %v1786_v45 = vand.u32 1, %v1781_v59 }
 0x47e   : > { %v2336_v40 = vadd.f32 %v2320_v13, %v2268_v55 }
 0x47f   : > { %v4778_v1 = vadd.f32 %v4573_v17, %v2335_v33  ;;  %vm4796_vm8 = vcmp.eq.s32.totalorder %v1786_v45, 0 }
 0x480   : > { %v4781_v32 = vadd.f32 %v4576_v52, %v2336_v40 }
 0x481   : > { %v1934_v27 = vld [vmem:[#allocation3 + $0x52] sm:$0xff]  ;;  %2497 = vrot.lane.b32.xlu1 %v2475_v20, %s4942_s19 }
 0x482   : > { %1959 = vrot.lane.b32.xlu0 %v1934_v27, %s4943_s2 }
 0x486   : > { %2499 = vrot.lane.b32.xlu0 %v2476_v31, %s4942_s19  ;;  %s4955_s19 = sshll.u32 %s3384_s20, 6 }
 0x487   : > { %s4808_s2 = scalar_lea.vmem [#allocation7], %s4955_s19 }
 0x488   : > { %s2607_s21 = sshll.u32 %s4808_s2, 4  ;;  %s4854_s21 = int_to_ptr.vmem [resolvable:$true] %s2607_s21 }
 0x489   : > { %s3135_s12 = scalar_lea.vmem %s4854_s21, 1024  ;;  %p3142_p6 = scmp.lt.s32.totalorder %s4854_s21, %s3140_s0 }
 0x48a   : > { %p3136_p8 = scmp.ne.s32.totalorder %s4854_s21, %s3135_s12  ;;  %p3143_p13 = scmp.lt.s32.totalorder %s3141_s1, %s3135_s12 }
 0x48c   : > { %p3137_p11 = pnand %p3136_p8, %p4956_p9  ;;  %p3144_p2 = por %p3143_p13, %p3142_p6 }
 0x48d   : > { %v2543_v36 = vpop.permute.xlu1 %2542 }
 0x48e   : > { %v2547_v53 = vpop.permute.xlu0 %2546  ;;  %p3138_p0 = pneg %p3137_p11 }
 0x490   : > { %p3145_p5 = pnand %p3144_p2, %p3138_p0 }
 0x491   : > { %v2551_v10 = vpop.permute.xlu1 %2550 }
 0x492   : > { %v4787_v50 = vpop.permute.xlu0 %2554 }
 0x495   : > { %v2418_v26 = vpop.permute.xlu1 %2417 }
 0x496   : > { %v2420_v17 = vpop.permute.xlu0 %2419  ;;  %v2441_v42 = vadd.f32 %v2418_v26, %v4751_v6 }
 0x497   : > { %v2442_v22 = vadd.f32 %v2420_v17, %v4748_v5 }
 0x499   : > { %v2422_v8 = vpop.permute.xlu1 %2421 }
 0x49a   : > { %v2424_v15 = vpop.permute.xlu0 %2423  ;;  %v2443_v34 = vadd.f32 %v2422_v8, %v4757_v12 }
 0x49b   : > { %v2444_v19 = vadd.f32 %v2424_v15, %v4754_v29 }
 0x49d   : > { %v2426_v52 = vpop.permute.xlu1 %2425 }
 0x49e   : > { %v2428_v55 = vpop.permute.xlu0 %2427  ;;  %v2445_v6 = vadd.f32 %v2426_v52, %v2377_v11 }
 0x49f   : > { %v2446_v5 = vadd.f32 %v2428_v55, %v2378_v38 }
 0x4a1   : > { %v2430_v24 = vpop.permute.xlu1 %2429 }
 0x4a2   : > { %v4789_v14 = vpop.permute.xlu0 %2431  ;;  %v2447_v15 = vadd.f32 %v2430_v24, %v4778_v1 }
 0x4a5   : > { %v2486_v63 = vpop.permute.xlu1 %2485 }
 0x4a6   : > { %v2488_v62 = vpop.permute.xlu0 %2487  ;;  %v2509_v54 = vadd.f32 %v2486_v63, %v2441_v42 }
 0x4a7   : > { %v2510_v16 = vadd.f32 %v2488_v62, %v2442_v22 }
 0x4a8   : > { %v2557_v49 = vadd.f32 %v2543_v36, %v2509_v54 }
 0x4a9   : > { %v2490_v51 = vpop.permute.xlu1 %2489  ;;  %v2558_v9 = vadd.f32 %v2543_v36, %v2510_v16 }
 0x4aa   : > { %v2492_v0 = vpop.permute.xlu0 %2491  ;;  %v2511_v39 = vadd.f32 %v2490_v51, %v2443_v34  ;;  %v2565_v23 = vmax.f32 %v2557_v49, 0.0 }
 0x4ab   : > { %v2512_v3 = vadd.f32 %v2492_v0, %v2444_v19  ;;  %v2566_v25 = vmax.f32 %v2558_v9, 0.0 }
 0x4ac   : > { %v2559_v47 = vadd.f32 %v2547_v53, %v2511_v39 }
 0x4ad   : > { %v2494_v28 = vpop.permute.xlu1 %2493  ;;  %v2560_v29 = vadd.f32 %v2547_v53, %v2512_v3 }
 0x4ae   : > { %v2496_v61 = vpop.permute.xlu0 %2495  ;;  %v2513_v41 = vadd.f32 %v2494_v28, %v2445_v6  ;;  %v2567_v30 = vmax.f32 %v2559_v47, 0.0 }
 0x4af   : > { %v2514_v2 = vadd.f32 %v2496_v61, %v2446_v5  ;;  %v2568_v13 = vmax.f32 %v2560_v29, 0.0 }
 0x4b0   : > { %v2561_v56 = vadd.f32 %v2551_v10, %v2513_v41 }
 0x4b2   : > { %v2569_v31 = vmax.f32 %v2561_v56, 0.0 }
 0x4e3   : > { %v1946_v12 = vpop.permute.xlu1 %1945 }
 0x4e4   : > { %v1948_v21 = vpop.permute.xlu0 %1947  ;;  %v1969_v48 = vsel %vm4796_vm8, %v4606_v60, %v1946_v12  ;;  %v2562_v60 = vadd.f32 %v2551_v10, %v2514_v2 }
 0x4e5   : > { %v1970_v37 = vsel %vm4796_vm8, %v4612_v43, %v1948_v21  ;;  %v2573_v11 = vadd.f32 %v2565_v23, %v1969_v48 }
 0x4e6   : > { %v2574_v38 = vadd.f32 %v2566_v25, %v1970_v37  ;;  %v2570_v53 = vmax.f32 %v2562_v60, 0.0 }
 0x4e7   : > { %2582 = vst.msk [vmem:[%s4808_s2] sm:$0xff] %vm2581_vm9, %v2573_v11  ;;  %v1950_v7 = vpop.permute.xlu1 %1949 }
 0x4e8   : > { %2583 = vst.msk [vmem:[%s4808_s2 + $0x8] sm:$0xff] %vm2581_vm9, %v2574_v38  ;;  %v1952_v43 = vpop.permute.xlu0 %1951  ;;  %v1971_v33 = vsel %vm4796_vm8, %v4622_v44, %v1950_v7 }
 0x4e9   : > { %v1972_v40 = vsel %vm4796_vm8, %v4628_v46, %v1952_v43  ;;  %v2575_v20 = vadd.f32 %v2567_v30, %v1971_v33 }
 0x4ea   : > { %v2576_v27 = vadd.f32 %v2568_v13, %v1972_v40 }
 0x4eb   : > { %2584 = vst.msk [vmem:[%s4808_s2 + $0x10] sm:$0xff] %vm2581_vm9, %v2575_v20  ;;  %v1954_v36 = vpop.permute.xlu1 %1953 }
 0x4ec   : > { %2585 = vst.msk [vmem:[%s4808_s2 + $0x18] sm:$0xff] %vm2581_vm9, %v2576_v27  ;;  %v1956_v10 = vpop.permute.xlu0 %1955  ;;  %v1973_v26 = vsel %vm4796_vm8, %v4638_v57, %v1954_v36 }
 0x4ed   : > { %v1974_v44 = vsel %vm4796_vm8, %v4645_v35, %v1956_v10  ;;  %v2577_v17 = vadd.f32 %v2569_v31, %v1973_v26  ;;  %v2448_v35 = vadd.f32 %v4789_v14, %v4781_v32 }
 0x4ee   : > { %v2578_v46 = vadd.f32 %v2570_v53, %v1974_v44 }
 0x4ef   : > { %2586 = vst.msk [vmem:[%s4808_s2 + $0x20] sm:$0xff] %vm2581_vm9, %v2577_v17  ;;  %v1958_v8 = vpop.permute.xlu1 %1957 }
 0x4f0   : > { %2587 = vst.msk [vmem:[%s4808_s2 + $0x28] sm:$0xff] %vm2581_vm9, %v2578_v46  ;;  %v1975_v42 = vsel %vm4796_vm8, %v4656_v4, %v1958_v8 }
 0x4f3   : > { %v2498_v52 = vpop.permute.xlu1 %2497 }
 0x4f4   : > { %v1960_v55 = vpop.permute.xlu0 %1959  ;;  %v2515_v63 = vadd.f32 %v2498_v52, %v2447_v15 }
 0x4f5   : > { %v1976_v32 = vsel %vm4796_vm8, %v4672_v58, %v1960_v55 }
 0x4f6   : > { %v2563_v57 = vadd.f32 %v4787_v50, %v2515_v63 }
 0x4f8   : > { %v2571_v62 = vmax.f32 %v2563_v57, 0.0  ;;  %v2500_v59 = vpop.permute.xlu0 %2499 }
 0x4f9   : > { %v2516_v51 = vadd.f32 %v2500_v59, %v2448_v35 }
 0x4fa   : > { %v2579_v22 = vadd.f32 %v2571_v62, %v1975_v42 }
 0x4fb   : > { %v2564_v1 = vadd.f32 %v4787_v50, %v2516_v51 }
 0x4fc   : > { %2588 = vst.msk [vmem:[%s4808_s2 + $0x30] sm:$0xff] %vm2581_vm9, %v2579_v22 }
 0x4fd   : > { %v2572_v24 = vmax.f32 %v2564_v1, 0.0 }
 0x4ff   : > { %v2580_v4 = vadd.f32 %v2572_v24, %v1976_v32 }
 0x501   : > { %2589 = vst.msk [vmem:[%s4808_s2 + $0x38] sm:$0xff] %vm2581_vm9, %v2580_v4 }
 0x502   : > { %3148 = shalt.err (!%p3145_p5)
}
 0x503   : > { %s3149_s18 = scalar_lea.hbm %s4852_s23, 1024  ;;  %s3153_s9 = scalar_lea.hbm %s4912_s7, 2048 }
 0x504   : > { %p3150_p4 = scmp.ne.s32.totalorder %s4852_s23, %s3149_s18  ;;  %p3154_p12 = scmp.lt.u32.totalorder %s4852_s23, %s4912_s7 }
 0x505   : > { %p3155_p1 = scmp.lt.u32.totalorder %s3153_s9, %s3149_s18  ;;  %p3157_p8 = scmp.lt.u32.totalorder %s3149_s18, %s4852_s23 }
 0x506   : > { %p3151_p7 = pnand %p3150_p4, %p4956_p9 }
 0x507   : > { %p3156_p3 = por %p3155_p1, %p3154_p12 }
 0x508   : > { %p3152_p10 = pneg %p3151_p7 }
 0x509   : > { %p3158_p11 = por %p3157_p8, %p3156_p3 }
 0x50b   : > { %p3159_p0 = pnand %p3158_p11, %p3152_p10 }
 0x50d   : > { %3162 = shalt.err (!%p3159_p0)
}
 0x50e   : > { %s3230_s10 = smov 128   ;;  %s3231_s19 = smov 8  }
 0x50f   : > { %3028 = dma.vmem_to_hbm [thread:$0]  (%p4956_p9), %s4854_s21, 1024, %s4852_s23, %s2591_s27, %s3230_s10, %s3230_s10, %s3231_s19  }
 0x510 PF: > { %s2622_s2 = sand.u32 1, %s3197_s24   ;;  %p4957_p6 = scmp.ne.s32.totalorder %s4935_s16, 0 }
 0x511   : > { %p4958_p13 = scmp.ge.s32.totalorder %s3217_s29, 2  ;;  %s2623_s4 = scalar_lea.sflag [#allocation6], %s2622_s2 }
 0x513   : > { %p3035_p2 = pnand %p4958_p13, %p4957_p6 }
 0x515   : > { %3192 = dma.done.wait (!%p3035_p2), %s2623_s4, 1024  }
 0x516   : > { %3194 = vsyncadd (!%p3035_p2), %s2623_s4, 4294966272  ;;  %s23_s29 = sadd.s32 1, %s3217_s29   ;;  %s4959_s14 = sld [smem:[#allocation10_spill]] }
 0x517   : > { %p20_p5 = scmp.ge.s32.totalorder %s23_s29, 4   ;;  %s4960_s24 = smov %s3201_s25 }
 0x518   : > { %s4961_s25 = smov %s3205_s26  ;;  %s4962_s26 = smov %s3328_s15 }
 0x519   : > { %s4963_s27 = smov %s3213_s28  ;;  %22 = sbr.rel (!%p20_p5) target bundleno = 12 (0xc), region = 111 }
 0x51c   : > { %s4964_s28 = smov %s4959_s14 }
 0x520   :  { %2628 = vsyncpa [#allocation5], 1 }
 0x521   :  { %2630 = vsyncpa [#allocation5 + $0x1], 1 }
 0x522   :  { %2631 = vsyncpa [#allocation6], 1 }
 0x523   :  { %2633 = vsyncpa [#allocation6 + $0x1], 1 }

</bundles_post_ra>
